<compile_context>
chip_gen: v5e
topology: v5e:2x2
jax: 0.10.0
libtpu: 0.0.40
codegen_flags: <defaults>
</compile_context>

<pallas_src>
import functools

import jax
import jax.numpy as jnp
from jax.experimental import pallas as pl
from jax.experimental.pallas import tpu as pltpu

NDIM = 128        # hidden width (lane-dense: multiple of 128)
NUM_LAYERS = 2    # ResLinear depth
DEFAULT_TILE_B = 256


def variance_sampler_kernel(t_ref, x_ref, w_ref, p_ref, var_ref, cat_ref):
    """
    t_ref:   (tile_b, 1)        f32
    x_ref:   (tile_b, ndim)     f32
    w_ref:   ((4+2L)*ndim, ndim) bf16   rows: [w2 | wj(2*ndim) | wra0 | wrb0 | ... | wh]
    p_ref:   (5+2L, ndim)       f32    rows: [w1, b1, b2, bj, bra0, brb0, ..., bh]
    var_ref: (tile_b, ndim)     f32    output
    cat_ref: (tile_b, 2*ndim)   bf16   VMEM scratch for the fused join
    """
    ndim = x_ref.shape[-1]
    num_layers = (p_ref.shape[0] - 5) // 2

    w1 = p_ref[0:1, :]
    b1 = p_ref[1:2, :]
    b2 = p_ref[2:3, :]
    bj = p_ref[3:4, :]

    # bottom1: Linear(1, ndim) == outer product; do it on the VPU (skip a K=1 MXU launch).
    t_feat = jnp.maximum(t_ref[...] * w1 + b1, 0.0)                           # (tb, ndim) f32

    # bottom2: Linear(ndim, ndim) + ReLU   (bf16 MXU, f32 accumulate)
    x_feat = jnp.maximum(
        jnp.dot(x_ref[...].astype(jnp.bfloat16), w_ref[0:ndim, :],
                preferred_element_type=jnp.float32) + b2,
        0.0,
    )                                                                          # (tb, ndim) f32

    # join(cat([t_feat, x_feat], -1)): two lane-aligned stores into the (tb, 2*ndim) scratch,
    # then a single fused K=2*ndim matmul against the original join weight.
    cat_ref[:, 0:ndim] = t_feat.astype(jnp.bfloat16)
    cat_ref[:, ndim:2 * ndim] = x_feat.astype(jnp.bfloat16)
    h = jnp.maximum(
        jnp.dot(cat_ref[...], w_ref[ndim:3 * ndim, :],
                preferred_element_type=jnp.float32) + bj,
        0.0,
    )                                                                          # (tb, ndim) f32

    # ResLinear: x = relu( Linear(relu(Linear(x))) + x ), statically unrolled.
    off = 3 * ndim
    for l in range(num_layers):
        wa = w_ref[off + (2 * l) * ndim: off + (2 * l + 1) * ndim, :]
        wb = w_ref[off + (2 * l + 1) * ndim: off + (2 * l + 2) * ndim, :]
        ba = p_ref[4 + 2 * l: 5 + 2 * l, :]
        bb = p_ref[5 + 2 * l: 6 + 2 * l, :]
        res = h
        u = jnp.maximum(
            jnp.dot(h.astype(jnp.bfloat16), wa, preferred_element_type=jnp.float32) + ba,
            0.0,
        )
        v = jnp.dot(u.astype(jnp.bfloat16), wb, preferred_element_type=jnp.float32) + bb
        h = jnp.maximum(v + res, 0.0)

    # head: Linear(ndim, ndim) + Softplus (f32 elementwise math)
    h_off = off + 2 * num_layers * ndim
    bh = p_ref[4 + 2 * num_layers: 5 + 2 * num_layers, :]
    g = jnp.dot(h.astype(jnp.bfloat16), w_ref[h_off: h_off + ndim, :],
                preferred_element_type=jnp.float32) + bh
    var_ref[...] = jax.nn.softplus(g)


def pack_params(params):
    """Pack PyTorch-layout params into the kernel's two slabs.
    Call once and reuse across invocations (amortizes packing + keeps call-site cheap)."""
    ndim = params["w2"].shape[0]
    num_layers = params["wra"].shape[0]

    w_pieces = [params["w2"], params["wj"]]          # (ndim,ndim), (2*ndim,ndim)
    p_rows = [params["w1"][0], params["b1"], params["b2"], params["bj"]]
    for l in range(num_layers):
        w_pieces.append(params["wra"][l])
        w_pieces.append(params["wrb"][l])
        p_rows.append(params["bra"][l])
        p_rows.append(params["brb"][l])
    w_pieces.append(params["wh"])
    p_rows.append(params["bh"])

    w_slab = jnp.concatenate(w_pieces, axis=0).astype(jnp.bfloat16)   # ((4+2L)*ndim, ndim)
    p_slab = jnp.stack(p_rows, axis=0).astype(jnp.float32)            # (5+2L, ndim)
    assert w_slab.shape == ((4 + 2 * num_layers) * ndim, ndim)
    assert p_slab.shape == (5 + 2 * num_layers, ndim)
    return {"w_slab": w_slab, "p_slab": p_slab, "ndim": ndim, "num_layers": num_layers}


def _round_up(a, b):
    return ((a + b - 1) // b) * b


@functools.partial(jax.jit, static_argnames=("tile_b",))
def _variance_sampler_call(t, x, w_slab, p_slab, tile_b):
    B_pad, ndim = x.shape
    num_layers = (p_slab.shape[0] - 5) // 2
    grid = (B_pad // tile_b,)

    cost = pl.CostEstimate(
        flops=int(2 * B_pad * ndim * ndim * (4 + 2 * num_layers)),
        transcendentals=int(2 * B_pad * ndim),
        bytes_accessed=int(w_slab.size * 2 + p_slab.size * 4
                           + x.size * 4 + t.size * 4 + B_pad * ndim * 4),
    )

    return pl.pallas_call(
        variance_sampler_kernel,
        out_shape=jax.ShapeDtypeStruct((B_pad, ndim), jnp.float32),
        grid_spec=pltpu.PrefetchScalarGridSpec(
            num_scalar_prefetch=0,
            grid=grid,
            in_specs=[
                pl.BlockSpec((tile_b, 1), lambda i: (i, 0)),        # t tile streams
                pl.BlockSpec((tile_b, ndim), lambda i: (i, 0)),     # x tile streams
                pl.BlockSpec(w_slab.shape, lambda i: (0, 0)),       # weights: resident
                pl.BlockSpec(p_slab.shape, lambda i: (0, 0)),       # biases:  resident
            ],
            out_specs=pl.BlockSpec((tile_b, ndim), lambda i: (i, 0)),
            scratch_shapes=[pltpu.VMEM((tile_b, 2 * ndim), jnp.bfloat16)],
        ),
        compiler_params=pltpu.CompilerParams(
            dimension_semantics=("parallel",),   # v7x: shard batch tiles across both TCs
        ),
        cost_estimate=cost,
    )(t, x, w_slab, p_slab)


def variance_sampler_forward(x, t, packed, tile_b=DEFAULT_TILE_B):
    """x: (B, ndim) f32, t: (B, 1) f32. Returns variance: (B, ndim) f32."""
    B, ndim = x.shape
    assert ndim % 128 == 0, "ndim must be a multiple of 128 for lane-dense layout"

    tile_b = max(8, (min(tile_b, _round_up(B, 8)) // 8) * 8)
    B_pad = _round_up(B, tile_b)
    if B_pad != B:
        x = jnp.pad(x, ((0, B_pad - B), (0, 0)))
        t = jnp.pad(t, ((0, B_pad - B), (0, 0)))

    out = _variance_sampler_call(t, x, packed["w_slab"], packed["p_slab"], tile_b)
    return out[:B]


def init_params(key, ndim=NDIM, num_layers=NUM_LAYERS):
    """PyTorch-style uniform(-1/sqrt(fan_in), 1/sqrt(fan_in)) init.
    All weights stored as (in_features, out_features) (transposed vs PyTorch)."""
    ks = jax.random.split(key, 10 + 4 * num_layers)

    def u(k, shape, fan_in):
        bound = 1.0 / jnp.sqrt(float(fan_in))
        return jax.random.uniform(k, shape, jnp.float32, -bound, bound)

    p = {
        "w1": u(ks[0], (1, ndim), 1), "b1": u(ks[1], (ndim,), 1),
        "w2": u(ks[2], (ndim, ndim), ndim), "b2": u(ks[3], (ndim,), ndim),
        "wj": u(ks[4], (2 * ndim, ndim), 2 * ndim), "bj": u(ks[5], (ndim,), 2 * ndim),
        "wh": u(ks[6], (ndim, ndim), ndim), "bh": u(ks[7], (ndim,), ndim),
    }
    wra, bra, wrb, brb = [], [], [], []
    for l in range(num_layers):
        base = 8 + 4 * l
        wra.append(u(ks[base + 0], (ndim, ndim), ndim))
        bra.append(u(ks[base + 1], (ndim,), ndim))
        wrb.append(u(ks[base + 2], (ndim, ndim), ndim))
        brb.append(u(ks[base + 3], (ndim,), ndim))
    p["wra"] = jnp.stack(wra)
    p["bra"] = jnp.stack(bra)
    p["wrb"] = jnp.stack(wrb)
    p["brb"] = jnp.stack(brb)
    return p


def reference_forward(x, t, params, emulate_bf16=False):
    """Pure-JAX reference of the PyTorch forward. With emulate_bf16=True, matmul
    operands are rounded to bf16 (matching the kernel's MXU inputs) but all math is f32."""
    def prep(a):
        return a.astype(jnp.bfloat16).astype(jnp.float32) if emulate_bf16 else a

    def mm(a, w):
        return prep(a) @ prep(w)

    t_feat = jnp.maximum(t @ params["w1"] + params["b1"], 0.0)   # bottom1 stays f32 (as in kernel)
    x_feat = jnp.maximum(mm(x, params["w2"]) + params["b2"], 0.0)
    h = jnp.concatenate([t_feat, x_feat], axis=-1)
    h = jnp.maximum(mm(h, params["wj"]) + params["bj"], 0.0)
    for l in range(params["wra"].shape[0]):
        res = h
        u = jnp.maximum(mm(h, params["wra"][l]) + params["bra"][l], 0.0)
        v = mm(u, params["wrb"][l]) + params["brb"][l]
        h = jnp.maximum(v + res, 0.0)
    return jax.nn.softplus(mm(h, params["wh"]) + params["bh"])


if __name__ == "__main__":
    key = jax.random.PRNGKey(0)
    k_param, k_x, k_t = jax.random.split(key, 3)

    B, ndim = 512, NDIM   # 2 batch tiles of 256 rows -> exercises the grid + resident weights
    params = init_params(k_param, ndim=ndim, num_layers=NUM_LAYERS)
    packed = pack_params(params)

    x = jax.random.normal(k_x, (B, ndim), jnp.float32)
    t = jax.random.uniform(k_t, (B, 1), jnp.float32)

    variance = variance_sampler_forward(x, t, packed)
    jax.block_until_ready(variance)

    assert variance.shape == (B, ndim)
    assert bool(jnp.all(variance >= 0.0))
    assert bool(jnp.all(jnp.isfinite(variance)))

    with jax.default_matmul_precision("highest"):
        # Tight check against a reference that emulates the kernel's bf16 matmul inputs.
        ref_bf16 = reference_forward(x, t, params, emulate_bf16=True)
        # Loose sanity check against the pure-f32 PyTorch-equivalent forward.
        ref_f32 = reference_forward(x, t, params, emulate_bf16=False)

    assert bool(jnp.allclose(variance, ref_bf16, atol=2e-3, rtol=2e-3))
    assert bool(jnp.allclose(variance, ref_f32, atol=1e-1, rtol=1e-1))

    print("KERNEL_OK")
</pallas_src>

<mosaic_0001>
module attributes {stable_mosaic.version = 11 : i64} {
  func.func @variance_sampler_kernel(%arg0: i32, %arg1: memref<256x1xf32, #tpu.memory_space<vmem>>, %arg2: memref<256x128xf32, #tpu.memory_space<vmem>>, %arg3: memref<1024x128xbf16, #tpu.memory_space<vmem>>, %arg4: memref<9x128xf32, #tpu.memory_space<vmem>>, %arg5: memref<256x128xf32, #tpu.memory_space<vmem>>, %arg6: memref<256x256xbf16, #tpu.memory_space<vmem>>) attributes {dimension_semantics = [#tpu.dimension_semantics<parallel>], iteration_bounds = array<i64: 2>, scalar_prefetch = 0 : i64, scratch_operands = 1 : i64, tpu.core_type = #tpu.core_type<tc>, window_params = [{transform_indices = @transform_0, window_bounds = array<i64: 256, 1>}, {transform_indices = @transform_1, window_bounds = array<i64: 256, 128>}, {pipeline_mode = #tpu.pipeline_mode<synchronous>, transform_indices = @transform_2, window_bounds = array<i64: 1024, 128>}, {pipeline_mode = #tpu.pipeline_mode<synchronous>, transform_indices = @transform_3, window_bounds = array<i64: 9, 128>}, {transform_indices = @transform_4, window_bounds = array<i64: 256, 128>}]} {
    %c0 = arith.constant 0 : index
    %c0_0 = arith.constant 0 : index
    %0 = vector.load %arg4[%c0, %c0_0] : memref<9x128xf32, #tpu.memory_space<vmem>>, vector<1x128xf32>
    %c1 = arith.constant 1 : index
    %c0_1 = arith.constant 0 : index
    %1 = vector.load %arg4[%c1, %c0_1] : memref<9x128xf32, #tpu.memory_space<vmem>>, vector<1x128xf32>
    %c2 = arith.constant 2 : index
    %c0_2 = arith.constant 0 : index
    %2 = vector.load %arg4[%c2, %c0_2] : memref<9x128xf32, #tpu.memory_space<vmem>>, vector<1x128xf32>
    %c3 = arith.constant 3 : index
    %c0_3 = arith.constant 0 : index
    %3 = vector.load %arg4[%c3, %c0_3] : memref<9x128xf32, #tpu.memory_space<vmem>>, vector<1x128xf32>
    %c0_4 = arith.constant 0 : index
    %c0_5 = arith.constant 0 : index
    %4 = vector.load %arg1[%c0_4, %c0_5] : memref<256x1xf32, #tpu.memory_space<vmem>>, vector<256x1xf32>
    %5 = vector.broadcast %4 : vector<256x1xf32> to vector<256x128xf32>
    %6 = vector.broadcast %0 : vector<1x128xf32> to vector<256x128xf32>
    %7 = arith.mulf %5, %6 : vector<256x128xf32>
    %8 = vector.broadcast %1 : vector<1x128xf32> to vector<256x128xf32>
    %9 = arith.addf %7, %8 : vector<256x128xf32>
    %cst = arith.constant 0.000000e+00 : f32
    %10 = vector.broadcast %cst : f32 to vector<256x128xf32>
    %11 = arith.maximumf %9, %10 : vector<256x128xf32>
    %c0_6 = arith.constant 0 : index
    %c0_7 = arith.constant 0 : index
    %12 = vector.load %arg2[%c0_6, %c0_7] : memref<256x128xf32, #tpu.memory_space<vmem>>, vector<256x128xf32>
    %13 = arith.truncf %12 : vector<256x128xf32> to vector<256x128xbf16>
    %c0_8 = arith.constant 0 : index
    %c0_9 = arith.constant 0 : index
    %14 = vector.load %arg3[%c0_8, %c0_9] : memref<1024x128xbf16, #tpu.memory_space<vmem>>, vector<128x128xbf16>
    %cst_10 = arith.constant dense<0.000000e+00> : vector<256x128xf32>
    %15 = tpu.matmul %13, %14, %cst_10 {dimension_numbers = #tpu.dot_dimension_numbers<[1], [0], [0], [1], [0, 0, 1, 1], [], []>} : vector<256x128xbf16>, vector<128x128xbf16>, vector<256x128xf32> -> vector<256x128xf32>
    %16 = vector.broadcast %2 : vector<1x128xf32> to vector<256x128xf32>
    %17 = arith.addf %15, %16 : vector<256x128xf32>
    %cst_11 = arith.constant 0.000000e+00 : f32
    %18 = vector.broadcast %cst_11 : f32 to vector<256x128xf32>
    %19 = arith.maximumf %17, %18 : vector<256x128xf32>
    %20 = arith.truncf %11 : vector<256x128xf32> to vector<256x128xbf16>
    %c0_12 = arith.constant 0 : index
    %c0_13 = arith.constant 0 : index
    %21 = vector.load %arg6[%c0_12, %c0_13] : memref<256x256xbf16, #tpu.memory_space<vmem>>, vector<256x128xbf16>
    tpu.vector_store %arg6[%c0_12, %c0_13], %20 {strides = array<i32>} : memref<256x256xbf16, #tpu.memory_space<vmem>>, vector<256x128xbf16>,
    %22 = arith.truncf %19 : vector<256x128xf32> to vector<256x128xbf16>
    %c0_14 = arith.constant 0 : index
    %c128 = arith.constant 128 : index
    %23 = vector.load %arg6[%c0_14, %c128] : memref<256x256xbf16, #tpu.memory_space<vmem>>, vector<256x128xbf16>
    tpu.vector_store %arg6[%c0_14, %c128], %22 {strides = array<i32>} : memref<256x256xbf16, #tpu.memory_space<vmem>>, vector<256x128xbf16>,
    %c0_15 = arith.constant 0 : index
    %c0_16 = arith.constant 0 : index
    %24 = vector.load %arg6[%c0_15, %c0_16] : memref<256x256xbf16, #tpu.memory_space<vmem>>, vector<256x256xbf16>
    %c128_17 = arith.constant 128 : index
    %c0_18 = arith.constant 0 : index
    %25 = vector.load %arg3[%c128_17, %c0_18] : memref<1024x128xbf16, #tpu.memory_space<vmem>>, vector<256x128xbf16>
    %cst_19 = arith.constant dense<0.000000e+00> : vector<256x128xf32>
    %26 = tpu.matmul %24, %25, %cst_19 {dimension_numbers = #tpu.dot_dimension_numbers<[1], [0], [0], [1], [0, 0, 1, 1], [], []>} : vector<256x256xbf16>, vector<256x128xbf16>, vector<256x128xf32> -> vector<256x128xf32>
    %27 = vector.broadcast %3 : vector<1x128xf32> to vector<256x128xf32>
    %28 = arith.addf %26, %27 : vector<256x128xf32>
    %cst_20 = arith.constant 0.000000e+00 : f32
    %29 = vector.broadcast %cst_20 : f32 to vector<256x128xf32>
    %30 = arith.maximumf %28, %29 : vector<256x128xf32>
    %c384 = arith.constant 384 : index
    %c0_21 = arith.constant 0 : index
    %31 = vector.load %arg3[%c384, %c0_21] : memref<1024x128xbf16, #tpu.memory_space<vmem>>, vector<128x128xbf16>
    %c512 = arith.constant 512 : index
    %c0_22 = arith.constant 0 : index
    %32 = vector.load %arg3[%c512, %c0_22] : memref<1024x128xbf16, #tpu.memory_space<vmem>>, vector<128x128xbf16>
    %c4 = arith.constant 4 : index
    %c0_23 = arith.constant 0 : index
    %33 = vector.load %arg4[%c4, %c0_23] : memref<9x128xf32, #tpu.memory_space<vmem>>, vector<1x128xf32>
    %c5 = arith.constant 5 : index
    %c0_24 = arith.constant 0 : index
    %34 = vector.load %arg4[%c5, %c0_24] : memref<9x128xf32, #tpu.memory_space<vmem>>, vector<1x128xf32>
    %35 = arith.truncf %30 : vector<256x128xf32> to vector<256x128xbf16>
    %cst_25 = arith.constant dense<0.000000e+00> : vector<256x128xf32>
    %36 = tpu.matmul %35, %31, %cst_25 {dimension_numbers = #tpu.dot_dimension_numbers<[1], [0], [0], [1], [0, 0, 1, 1], [], []>} : vector<256x128xbf16>, vector<128x128xbf16>, vector<256x128xf32> -> vector<256x128xf32>
    %37 = vector.broadcast %33 : vector<1x128xf32> to vector<256x128xf32>
    %38 = arith.addf %36, %37 : vector<256x128xf32>
    %cst_26 = arith.constant 0.000000e+00 : f32
    %39 = vector.broadcast %cst_26 : f32 to vector<256x128xf32>
    %40 = arith.maximumf %38, %39 : vector<256x128xf32>
    %41 = arith.truncf %40 : vector<256x128xf32> to vector<256x128xbf16>
    %cst_27 = arith.constant dense<0.000000e+00> : vector<256x128xf32>
    %42 = tpu.matmul %41, %32, %cst_27 {dimension_numbers = #tpu.dot_dimension_numbers<[1], [0], [0], [1], [0, 0, 1, 1], [], []>} : vector<256x128xbf16>, vector<128x128xbf16>, vector<256x128xf32> -> vector<256x128xf32>
    %43 = vector.broadcast %34 : vector<1x128xf32> to vector<256x128xf32>
    %44 = arith.addf %42, %43 : vector<256x128xf32>
    %45 = arith.addf %44, %30 : vector<256x128xf32>
    %cst_28 = arith.constant 0.000000e+00 : f32
    %46 = vector.broadcast %cst_28 : f32 to vector<256x128xf32>
    %47 = arith.maximumf %45, %46 : vector<256x128xf32>
    %c640 = arith.constant 640 : index
    %c0_29 = arith.constant 0 : index
    %48 = vector.load %arg3[%c640, %c0_29] : memref<1024x128xbf16, #tpu.memory_space<vmem>>, vector<128x128xbf16>
    %c768 = arith.constant 768 : index
    %c0_30 = arith.constant 0 : index
    %49 = vector.load %arg3[%c768, %c0_30] : memref<1024x128xbf16, #tpu.memory_space<vmem>>, vector<128x128xbf16>
    %c6 = arith.constant 6 : index
    %c0_31 = arith.constant 0 : index
    %50 = vector.load %arg4[%c6, %c0_31] : memref<9x128xf32, #tpu.memory_space<vmem>>, vector<1x128xf32>
    %c7 = arith.constant 7 : index
    %c0_32 = arith.constant 0 : index
    %51 = vector.load %arg4[%c7, %c0_32] : memref<9x128xf32, #tpu.memory_space<vmem>>, vector<1x128xf32>
    %52 = arith.truncf %47 : vector<256x128xf32> to vector<256x128xbf16>
    %cst_33 = arith.constant dense<0.000000e+00> : vector<256x128xf32>
    %53 = tpu.matmul %52, %48, %cst_33 {dimension_numbers = #tpu.dot_dimension_numbers<[1], [0], [0], [1], [0, 0, 1, 1], [], []>} : vector<256x128xbf16>, vector<128x128xbf16>, vector<256x128xf32> -> vector<256x128xf32>
    %54 = vector.broadcast %50 : vector<1x128xf32> to vector<256x128xf32>
    %55 = arith.addf %53, %54 : vector<256x128xf32>
    %cst_34 = arith.constant 0.000000e+00 : f32
    %56 = vector.broadcast %cst_34 : f32 to vector<256x128xf32>
    %57 = arith.maximumf %55, %56 : vector<256x128xf32>
    %58 = arith.truncf %57 : vector<256x128xf32> to vector<256x128xbf16>
    %cst_35 = arith.constant dense<0.000000e+00> : vector<256x128xf32>
    %59 = tpu.matmul %58, %49, %cst_35 {dimension_numbers = #tpu.dot_dimension_numbers<[1], [0], [0], [1], [0, 0, 1, 1], [], []>} : vector<256x128xbf16>, vector<128x128xbf16>, vector<256x128xf32> -> vector<256x128xf32>
    %60 = vector.broadcast %51 : vector<1x128xf32> to vector<256x128xf32>
    %61 = arith.addf %59, %60 : vector<256x128xf32>
    %62 = arith.addf %61, %47 : vector<256x128xf32>
    %cst_36 = arith.constant 0.000000e+00 : f32
    %63 = vector.broadcast %cst_36 : f32 to vector<256x128xf32>
    %64 = arith.maximumf %62, %63 : vector<256x128xf32>
    %c8 = arith.constant 8 : index
    %c0_37 = arith.constant 0 : index
    %65 = vector.load %arg4[%c8, %c0_37] : memref<9x128xf32, #tpu.memory_space<vmem>>, vector<1x128xf32>
    %66 = arith.truncf %64 : vector<256x128xf32> to vector<256x128xbf16>
    %c896 = arith.constant 896 : index
    %c0_38 = arith.constant 0 : index
    %67 = vector.load %arg3[%c896, %c0_38] : memref<1024x128xbf16, #tpu.memory_space<vmem>>, vector<128x128xbf16>
    %cst_39 = arith.constant dense<0.000000e+00> : vector<256x128xf32>
    %68 = tpu.matmul %66, %67, %cst_39 {dimension_numbers = #tpu.dot_dimension_numbers<[1], [0], [0], [1], [0, 0, 1, 1], [], []>} : vector<256x128xbf16>, vector<128x128xbf16>, vector<256x128xf32> -> vector<256x128xf32>
    %69 = vector.broadcast %65 : vector<1x128xf32> to vector<256x128xf32>
    %70 = arith.addf %68, %69 : vector<256x128xf32>
    %cst_40 = arith.constant 0.000000e+00 : f32
    %71 = vector.broadcast %cst_40 : f32 to vector<256x128xf32>
    %72 = arith.maximumf %70, %71 : vector<256x128xf32>
    %73 = vector.broadcast %cst_40 : f32 to vector<256x128xf32>
    %74 = arith.subf %70, %73 : vector<256x128xf32>
    %75 = arith.cmpf one, %74, %74 : vector<256x128xf32>
    %76 = vector.broadcast %cst_40 : f32 to vector<256x128xf32>
    %77 = arith.addf %70, %76 : vector<256x128xf32>
    %78 = math.absf %74 : vector<256x128xf32>
    %cst_41 = arith.constant 0.000000e+00 : f32
    %79 = vector.broadcast %cst_41 : f32 to vector<256x128xf32>
    %80 = arith.subf %79, %78 : vector<256x128xf32>
    %81 = math.exp %80 : vector<256x128xf32>
    %82 = math.log1p %81 : vector<256x128xf32>
    %83 = arith.addf %72, %82 : vector<256x128xf32>
    %84 = arith.select %75, %77, %83 : vector<256x128xi1>, vector<256x128xf32>
    %c0_42 = arith.constant 0 : index
    %c0_43 = arith.constant 0 : index
    %85 = vector.load %arg5[%c0_42, %c0_43] : memref<256x128xf32, #tpu.memory_space<vmem>>, vector<256x128xf32>
    tpu.vector_store %arg5[%c0_42, %c0_43], %84 {strides = array<i32>} : memref<256x128xf32, #tpu.memory_space<vmem>>, vector<256x128xf32>,
    return
  }
  func.func @transform_0(%arg0: i32) -> (i32, i32) {
    %c0_i32 = arith.constant 0 : i32
    %c0_i32_0 = arith.constant 0 : i32
    return %arg0, %c0_i32 : i32, i32
  }
  func.func @transform_1(%arg0: i32) -> (i32, i32) {
    %c0_i32 = arith.constant 0 : i32
    %c0_i32_0 = arith.constant 0 : i32
    return %arg0, %c0_i32 : i32, i32
  }
  func.func @transform_2(%arg0: i32) -> (i32, i32) {
    %c0_i32 = arith.constant 0 : i32
    %c0_i32_0 = arith.constant 0 : i32
    %c0_i32_1 = arith.constant 0 : i32
    return %c0_i32, %c0_i32_0 : i32, i32
  }
  func.func @transform_3(%arg0: i32) -> (i32, i32) {
    %c0_i32 = arith.constant 0 : i32
    %c0_i32_0 = arith.constant 0 : i32
    %c0_i32_1 = arith.constant 0 : i32
    return %c0_i32, %c0_i32_0 : i32, i32
  }
  func.func @transform_4(%arg0: i32) -> (i32, i32) {
    %c0_i32 = arith.constant 0 : i32
    %c0_i32_0 = arith.constant 0 : i32
    return %arg0, %c0_i32 : i32, i32
  }
}

</mosaic_0001>

<bundles_post_ra>
// kernel: _variance_sampler_call.1
= control target key start
LH: loop header
LB: loop body
LE: loop exit
PB: predicated region body
PF: predicated region fallthrough
CT: control target
= control target key end

     0   :  { %9 = vsyncpa [#allocation4], 0  ;;  %s5326_s0 = inlined_call_operand.vmem [shape: f32[512,1], index: 0, kind: input, shape index: {}]   ;;  %s5327_s1 = inlined_call_operand.vmem [shape: f32[512,128], index: 1, kind: input, shape index: {}]   ;;  %s5328_s2 = inlined_call_operand.hbm [shape: bf16[1024,128], index: 2, kind: input, shape index: {}]   ;;  %s5329_s3 = inlined_call_operand.hbm [shape: f32[9,128], index: 3, kind: input, shape index: {}]   ;;  %s5330_s4 = inlined_call_operand.hbm [shape: f32[512,128], index: 4, kind: output, shape index: {}]  }
   0x1   :  { %10 = vsyncpa [#allocation7], 0 }
   0x2   :  { %11 = vsyncpa [#allocation5], 0 }
   0x3   :  { %13 = vsyncpa [#allocation5 + $0x1], 0  ;;  %s4082_s15 = smov 0   ;;  %s4084_s16 = smov 0  }
   0x4   :  { %s4086_s17 = smov 0   ;;  %s4088_s18 = smov 0  }
   0x5 LB: > { %s4103_s19 = sadd.s32 4294967295, %s4046_s18   ;;  %s3209_s20 = sadd.s32 4294967294, %s4046_s18   ;;  %s4046_s18 = sphi %s4088_s18, %s5407_s18   ;;  %s4042_s17 = sphi %s4086_s17, %s5406_s17   ;;  %s4038_s16 = sphi %s4084_s16, %s5405_s16   ;;  %s4034_s15 = sphi %s4082_s15, %s5404_s15  }
   0x6   : > { %s4107_s21 = sadd.s32 1, %s4046_s18   ;;  %s120_s22 = sadd.s32 1, %s4042_s17 }
   0x7   : > { %s117_s23 = ssub.s32 %s4046_s18, %s4107_s21  ;;  %p130_p0 = scmp.ne.s32.totalorder %s4042_s17, %s4038_s16 }
   0x8   : > { %p118_p1 = scmp.eq.s32.totalorder %s117_s23, 0  ;;  %p131_p2 = scmp.eq.s32.totalorder %s4103_s19, 1 }
   0x9   : > { %p136_p3 = scmp.ne.s32.totalorder %s4038_s16, %s4034_s15  ;;  %p137_p4 = scmp.eq.s32.totalorder %s3209_s20, 1 }
   0xa   : > { %s4118_s24 = scalar_select %p118_p1, %s4042_s17, %s120_s22  }
   0xb   : > { %p4120_p5 = por %p131_p2, %p130_p0  ;;  %p4124_p6 = por %p137_p4, %p136_p3 }
   0xc   : > { %p3210_p7 = scmp.ge.s32.totalorder %s4046_s18, 1  ;;  %p144_p8 = scmp.lt.s32.totalorder %s4046_s18, 3 }
   0xd   : > { %p3729_p9 = scmp.eq.s32.totalorder %s4103_s19, 0  ;;  %s155_s30 = sshll.u32 %s5328_s2, 4  ;;  %s156_s30 = int_to_ptr.hbm [resolvable:$true] %s155_s30 }
   0xe   : > { %p4131_p10 = pnand %p3210_p7, %p144_p8  ;;  %s4048_s5 = smov [#allocation3]  }
   0xf   : > { %s157_s6 = sshll.u32 %s4048_s5, 4  ;;  %s169_s9 = sshll.u32 %s5329_s3, 4  ;;  %s158_s6 = int_to_ptr.vmem [resolvable:$true] %s157_s6  ;;  %s170_s9 = int_to_ptr.hbm [resolvable:$true] %s169_s9 }
  0x10   : > { %p3718_p11 = pneg %p4131_p10  ;;  %s4049_s10 = smov 64  }
  0x11   : > { %s4050_s11 = smov 4   ;;  %s4051_s12 = smov [#allocation6]  }
  0x12   : > { %p3719_p12 = pnand %p3729_p9, %p3718_p11  ;;  %s171_s13 = sshll.u32 %s4051_s12, 4  ;;  %s172_s13 = int_to_ptr.vmem [resolvable:$true] %s171_s13 }
  0x13   : > { %s4052_s14 = smov 128   ;;  %s4053_s20 = smov 8  }
  0x14   : > { %3721 = dma.hbm_to_vmem [thread:$0]  (!%p3719_p12), %s156_s30, 8192, %s158_s6, [#allocation4], %s4049_s10, %s4049_s10, %s4050_s11  }
  0x15   : > { %3724 = dma.hbm_to_vmem [thread:$0]  (!%p3719_p12), %s170_s9, 256, %s172_s13, [#allocation7], %s4052_s14, %s4052_s14, %s4053_s20  }
  0x16   : > { %205 = sbr.rel (%p4131_p10) target bundleno = 1350 (0x546), region = 36 }
  0x1b   : > { %4021 = dma.done.wait (%p3729_p9), [#allocation4], 8192  }
  0x1c   : > { %4023 = vsyncadd (%p3729_p9), [#allocation4], 4294959104 }
  0x1d   : > { %4025 = dma.done.wait (%p3729_p9), [#allocation7], 256  }
  0x1e   : > { %4027 = vsyncadd (%p3729_p9), [#allocation7], 4294967040  ;;  %s3218_s22 = sshll.u32 %s4103_s19, 5  ;;  %v4054_v0 = vmov 0   ;;  %v3618_v3 = vld [vmem:[#allocation3 + $0x38] sm:$0xff]  ;;  %v3617_v4 = vld [vmem:[#allocation3 + $0x30] sm:$0xff] }
  0x1f   : > { %3776 = vset.pattern.permute.xlu1 %v4054_v0  ;;  %3775 = vset.pattern.permute.xlu0 %v4054_v0  ;;  %p243_p13 = scmp.lt.s32.totalorder %s3218_s22, 63  ;;  %v3616_v8 = vld [vmem:[#allocation3 + $0x28] sm:$0xff]  ;;  %v3615_v9 = vld [vmem:[#allocation3 + $0x20] sm:$0xff]  ;;  %v3614_v13 = vld [vmem:[#allocation3 + $0x18] sm:$0xff]  ;;  %s239_s7 = sand.u32 1, %s4038_s16  }
  0x20   : > { %3777 = vset.pattern.permute.xlu2 %v4054_v0  ;;  %662 = vmatpush.bf16.msra.mxu0 %v3618_v3  ;;  %v3613_v14 = vld [vmem:[#allocation3 + $0x10] sm:$0xff]  ;;  %v3612_v18 = vld [vmem:[#allocation3 + $0x8] sm:$0xff]  ;;  %v3611_v19 = vld [vmem:[#allocation3] sm:$0xff]  ;;  %s3217_s8 = sshll.u32 %s239_s7, 8  ;;  %s3707_s10 = sshll.u32 %s4103_s19, 8 }
  0x21   : > { %s5409_s22 = smov (!%p243_p13, %s3218_s22), 63  ;;  %v3658_v45 = vld [vmem:[#allocation3 + $0x78] sm:$0xff]  ;;  %v3657_v54 = vld [vmem:[#allocation3 + $0x70] sm:$0xff]  ;;  %v3656_v55 = vld [vmem:[#allocation3 + $0x68] sm:$0xff]  ;;  %s4990_s9 = scalar_lea.vmem [#allocation8], %s3217_s8 }
  0x22   : > { %s3219_s23 = sshll.u32 %s5409_s22, 3  ;;  %1232 = vmatpush.bf16.msra.mxu1 %v3658_v45  ;;  %v3655_v56 = vld [vmem:[#allocation3 + $0x60] sm:$0xff]  ;;  %v3654_v61 = vld [vmem:[#allocation3 + $0x58] sm:$0xff]  ;;  %s3109_s13 = scalar_lea.hbm %s5330_s4, %s3707_s10 }
  0x23   : > { %s4164_s29 = scalar_lea.vmem %s5326_s0, %s3219_s23  ;;  %s4182_s6 = scalar_lea.vmem %s5327_s1, %s3219_s23  ;;  %v4215_v60 = vld [vmem:[#allocation6] ss:$0 sm:$0xff]  ;;  %v4218_v0 = vld [vmem:[#allocation6 + $0x1] ss:$0 sm:$0xff] }
  0x24   : > { %v261_v1 = vld [vmem:[%s4164_s29 + $0x10] sm:$0xff]  ;;  %v259_v2 = vld [vmem:[%s4164_s29] sm:$0xff]  ;;  %663 = vmatpush.bf16.msra.mxu0 %v3617_v4  ;;  %v262_v6 = vld [vmem:[%s4164_s29 + $0x18] sm:$0xff]  ;;  %s3110_s14 = sshll.u32 %s4990_s9, 4  ;;  %s3112_s19 = sshll.u32 %s3109_s13, 4  ;;  %s3111_s14 = int_to_ptr.vmem [resolvable:$true] %s3110_s14  ;;  %s3113_s19 = int_to_ptr.hbm [resolvable:$true] %s3112_s19 }
  0x25   : > { %303 = vperm.xlu1 %3776, %v261_v1   ;;  %293 = vperm.xlu0 %3775, %v259_v2   ;;  %v263_v5 = vld [vmem:[%s4164_s29 + $0x20] sm:$0xff]  ;;  %v260_v7 = vld [vmem:[%s4164_s29 + $0x8] sm:$0xff]  ;;  %v266_v11 = vld [vmem:[%s4164_s29 + $0x38] sm:$0xff]  ;;  %s3098_s20 = scalar_lea.sflag [#allocation5], %s239_s7  ;;  %s3990_s22 = sshra.s32 %s3113_s19, 4  ;;  %s3991_s22 = int_to_ptr.hbm [resolvable:$true] %s3990_s22 }
  0x26   : > { %313 = vperm.xlu2 %3777, %v263_v5   ;;  %v264_v10 = vld [vmem:[%s4164_s29 + $0x28] sm:$0xff]  ;;  %v265_v12 = vld [vmem:[%s4164_s29 + $0x30] sm:$0xff]  ;;  %v267_v15 = vld [vmem:[%s4164_s29 + $0x40] sm:$0xff]  ;;  %1233 = vmatpush.bf16.msra.mxu1 %v3657_v54  ;;  %s3992_s23 = scalar_lea.hbm %s3991_s22, 256  ;;  %p3997_p3 = scmp.lt.s32.totalorder %s3991_s22, %s5330_s4 }
  0x27   : > { %v269_v16 = vld [vmem:[%s4164_s29 + $0x50] sm:$0xff]  ;;  %v268_v17 = vld [vmem:[%s4164_s29 + $0x48] sm:$0xff]  ;;  %v270_v20 = vld [vmem:[%s4164_s29 + $0x58] sm:$0xff]  ;;  %p3993_p0 = scmp.ne.s32.totalorder %s3991_s22, %s3992_s23 }
  0x28   : > { %664 = vmatpush.bf16.msra.mxu0 %v3616_v8  ;;  %v549_v21 = vld [vmem:[%s4182_s6] sm:$0xff]  ;;  %v550_v22 = vld [vmem:[%s4182_s6 + $0x8] sm:$0xff]  ;;  %v273_v26 = vld [vmem:[%s4164_s29 + $0x70] sm:$0xff] }
  0x29   : > { %v272_v23 = vld [vmem:[%s4164_s29 + $0x68] sm:$0xff]  ;;  %v271_v24 = vld [vmem:[%s4164_s29 + $0x60] sm:$0xff]  ;;  %v581_v25 = vpack.c.bf16 %v550_v22, %v549_v21  ;;  %v274_v28 = vld [vmem:[%s4164_s29 + $0x78] sm:$0xff]  ;;  %p3994_p1 = pnand %p3993_p0, %p4120_p5 }
  0x2a   : > { %v275_v27 = vld [vmem:[%s4164_s29 + $0x80] sm:$0xff]  ;;  %v276_v29 = vld [vmem:[%s4164_s29 + $0x88] sm:$0xff]  ;;  %v551_v30 = vld [vmem:[%s4182_s6 + $0x10] sm:$0xff]  ;;  %1234 = vmatpush.bf16.msra.mxu1 %v3656_v55 }
  0x2b   : > { %v552_v31 = vld [vmem:[%s4182_s6 + $0x18] sm:$0xff]  ;;  %v277_v33 = vld [vmem:[%s4164_s29 + $0x90] sm:$0xff]  ;;  %v279_v35 = vld [vmem:[%s4164_s29 + $0xa0] sm:$0xff]  ;;  %p3995_p2 = pneg %p3994_p1 }
  0x2c   : > { %665 = vmatpush.bf16.msra.mxu0 %v3615_v9  ;;  %v278_v32 = vld [vmem:[%s4164_s29 + $0x98] sm:$0xff]  ;;  %v582_v34 = vpack.c.bf16 %v552_v31, %v551_v30  ;;  %v281_v36 = vld [vmem:[%s4164_s29 + $0xb0] sm:$0xff]  ;;  %v280_v37 = vld [vmem:[%s4164_s29 + $0xa8] sm:$0xff] }
  0x2d   : > { %308 = vperm.xlu1 %3776, %v262_v6   ;;  %298 = vperm.xlu0 %3775, %v260_v7   ;;  %v282_v38 = vld [vmem:[%s4164_s29 + $0xb8] sm:$0xff]  ;;  %v553_v39 = vld [vmem:[%s4182_s6 + $0x20] sm:$0xff]  ;;  %v554_v40 = vld [vmem:[%s4182_s6 + $0x28] sm:$0xff] }
  0x2e   : > { %318 = vperm.xlu2 %3777, %v264_v10   ;;  %v284_v41 = vld [vmem:[%s4164_s29 + $0xc8] sm:$0xff]  ;;  %v283_v42 = vld [vmem:[%s4164_s29 + $0xc0] sm:$0xff]  ;;  %v583_v43 = vpack.c.bf16 %v554_v40, %v553_v39  ;;  %v285_v44 = vld [vmem:[%s4164_s29 + $0xd0] sm:$0xff]  ;;  %1235 = vmatpush.bf16.msra.mxu1 %v3655_v56 }
  0x2f   : > { %v287_v46 = vld [vmem:[%s4164_s29 + $0xe0] sm:$0xff]  ;;  %v286_v47 = vld [vmem:[%s4164_s29 + $0xd8] sm:$0xff]  ;;  %v288_v48 = vld [vmem:[%s4164_s29 + $0xe8] sm:$0xff] }
  0x30   : > { %666 = vmatpush.bf16.msra.mxu0 %v3614_v13  ;;  %v555_v49 = vld [vmem:[%s4182_s6 + $0x30] sm:$0xff]  ;;  %v556_v50 = vld [vmem:[%s4182_s6 + $0x38] sm:$0xff]  ;;  %v557_v57 = vld [vmem:[%s4182_s6 + $0x40] sm:$0xff] }
  0x31   : > { %v290_v51 = vld [vmem:[%s4164_s29 + $0xf8] sm:$0xff]  ;;  %v289_v52 = vld [vmem:[%s4164_s29 + $0xf0] sm:$0xff]  ;;  %v584_v53 = vpack.c.bf16 %v556_v50, %v555_v49  ;;  %v558_v58 = vld [vmem:[%s4182_s6 + $0x48] sm:$0xff]  ;;  %s3996_s29 = scalar_lea.hbm %s5330_s4, 512 }
  0x32   : > { %v585_v59 = vpack.c.bf16 %v558_v58, %v557_v57  ;;  %1236 = vmatpush.bf16.msra.mxu1 %v3654_v61  ;;  %v3653_v2 = vld [vmem:[#allocation3 + $0x50] sm:$0xff]  ;;  %v3652_v5 = vld [vmem:[#allocation3 + $0x48] sm:$0xff]  ;;  %v3651_v9 = vld [vmem:[#allocation3 + $0x40] sm:$0xff]  ;;  %p3998_p4 = scmp.lt.s32.totalorder %s3996_s29, %s3992_s23 }
  0x33   : > { %v559_v10 = vld [vmem:[%s4182_s6 + $0x50] sm:$0xff]  ;;  %v3663_v56 = vld [vmem:[#allocation3 + $0xa0] sm:$0xff] }
  0x34   : > { %667 = vmatpush.bf16.msra.mxu0 %v3613_v14  ;;  %p3999_p7 = por %p3998_p4, %p3997_p3 }
  0x35   : > { %328 = vperm.xlu1 %3776, %v266_v11   ;;  %323 = vperm.xlu0 %3775, %v265_v12   ;;  %v560_v11 = vld [vmem:[%s4182_s6 + $0x58] sm:$0xff] }
  0x36   : > { %333 = vperm.xlu2 %3777, %v267_v15   ;;  %1237 = vmatpush.bf16.msra.mxu1 %v3653_v2  ;;  %v586_v13 = vpack.c.bf16 %v560_v11, %v559_v10  ;;  %v3662_v2 = vld [vmem:[#allocation3 + $0x98] sm:$0xff]  ;;  %p4000_p8 = pnand %p3999_p7, %p3995_p2 }
  0x38   : > { %668 = vmatpush.bf16.msra.mxu0 %v3612_v18 }
  0x3a   : > { %1238 = vmatpush.bf16.msra.mxu1 %v3652_v5 }
  0x3c   : > { %669 = vmatpush.bf16.msra.mxu0 %v3611_v19 }
  0x3d   : > { %343 = vperm.xlu1 %3776, %v269_v16   ;;  %338 = vperm.xlu0 %3775, %v268_v17  }
  0x3e   : > { %348 = vperm.xlu2 %3777, %v270_v20   ;;  %1239 = vmatpush.bf16.msra.mxu1 %v3651_v9 }
  0x3f   : > { %670 = vmatmul.bf16.vlgmr.msra.gmra.mxu0 %v581_v25 }
  0x45   : > { %358 = vperm.xlu1 %3776, %v272_v23   ;;  %353 = vperm.xlu0 %3775, %v271_v24  }
  0x46   : > { %363 = vperm.xlu2 %3777, %v273_v26  }
  0x4d   : > { %373 = vperm.xlu1 %3776, %v275_v27   ;;  %368 = vperm.xlu0 %3775, %v274_v28   ;;  %v3666_v27 = vld [vmem:[#allocation3 + $0xb8] sm:$0xff] }
  0x4e   : > { %378 = vperm.xlu2 %3777, %v276_v29   ;;  %1321 = vmatpush.bf16.msra.mxu2 %v3666_v27 }
  0x4f   : > { %675 = vmatmul.bf16.gmra.mxu0 %v582_v34 }
  0x55   : > { %388 = vperm.xlu1 %3776, %v278_v32   ;;  %383 = vperm.xlu0 %3775, %v277_v33  }
  0x56   : > { %393 = vperm.xlu2 %3777, %v279_v35  }
  0x5d   : > { %403 = vperm.xlu1 %3776, %v281_v36   ;;  %398 = vperm.xlu0 %3775, %v280_v37   ;;  %v561_v36 = vld [vmem:[%s4182_s6 + $0x60] sm:$0xff]  ;;  %v562_v37 = vld [vmem:[%s4182_s6 + $0x68] sm:$0xff] }
  0x5e   : > { %408 = vperm.xlu2 %3777, %v282_v38   ;;  %v3665_v38 = vld [vmem:[#allocation3 + $0xb0] sm:$0xff] }
  0x5f   : > { %680 = vmatmul.bf16.gmra.mxu0 %v583_v43  ;;  %1322 = vmatpush.bf16.msra.mxu2 %v3665_v38 }
  0x65   : > { %418 = vperm.xlu1 %3776, %v284_v41   ;;  %413 = vperm.xlu0 %3775, %v283_v42  }
  0x66   : > { %423 = vperm.xlu2 %3777, %v285_v44   ;;  %v587_v44 = vpack.c.bf16 %v562_v37, %v561_v36 }
  0x6d   : > { %433 = vperm.xlu1 %3776, %v287_v46   ;;  %428 = vperm.xlu0 %3775, %v286_v47   ;;  %v3664_v47 = vld [vmem:[#allocation3 + $0xa8] sm:$0xff] }
  0x6e   : > { %438 = vperm.xlu2 %3777, %v288_v48   ;;  %1323 = vmatpush.bf16.msra.mxu2 %v3664_v47 }
  0x6f   : > { %685 = vmatmul.bf16.gmra.mxu0 %v584_v53 }
  0x72   : > { %1324 = vmatpush.bf16.msra.mxu2 %v3663_v56 }
  0x75   : > { %448 = vperm.xlu1 %3776, %v290_v51   ;;  %443 = vperm.xlu0 %3775, %v289_v52  }
  0x76   : > { %1325 = vmatpush.bf16.msra.mxu2 %v3662_v2 }
  0x7f   : > { %690 = vmatmul.bf16.gmra.mxu0 %v585_v59 }
  0x80   : > { %v314_v62 = vpop.permute.xlu2 %313 }
  0x81   : > { %v456_v63 = vmul.f32 %v4215_v60, %v314_v62 }
  0x83   : > { %v489_v1 = vadd.f32 %v4218_v0, %v456_v63 }
  0x85   : > { %v521_v3 = vmax.f32 %v489_v1, 0.0 }
  0x87   : > { %v787_v4 = vpack.c.bf16 %v521_v3, %v521_v3 }
  0x88   : > { %v319_v6 = vpop.permute.xlu2 %318 }
  0x89   : > { %819 = vst [vmem:[#allocation2 + $0x20] sm:$0xf] %v787_v4  ;;  %v457_v7 = vmul.f32 %v4215_v60, %v319_v6 }
  0x8b   : > { %v490_v8 = vadd.f32 %v4218_v0, %v457_v7 }
  0x8d   : > { %v522_v12 = vmax.f32 %v490_v8, 0.0 }
  0x8f   : > { %v788_v14 = vpack.c.bf16 %v522_v12, %v522_v12  ;;  %695 = vmatmul.bf16.gmra.mxu0 %v586_v13  ;;  %v563_v12 = vld [vmem:[%s4182_s6 + $0x70] sm:$0xff]  ;;  %v564_v13 = vld [vmem:[%s4182_s6 + $0x78] sm:$0xff] }
  0x90   : > { %v334_v15 = vpop.permute.xlu2 %333 }
  0x91   : > { %820 = vst [vmem:[#allocation2 + $0x28] sm:$0xf] %v788_v14  ;;  %v460_v16 = vmul.f32 %v4215_v60, %v334_v15  ;;  %v3661_v14 = vld [vmem:[#allocation3 + $0x90] sm:$0xff] }
  0x92   : > { %1326 = vmatpush.bf16.msra.mxu2 %v3661_v14 }
  0x93   : > { %v493_v17 = vadd.f32 %v4218_v0, %v460_v16 }
  0x95   : > { %v525_v22 = vmax.f32 %v493_v17, 0.0 }
  0x97   : > { %v304_v18 = vpop.permute.xlu1 %303  ;;  %v294_v19 = vpop.permute.xlu0 %293  ;;  %v791_v25 = vpack.c.bf16 %v525_v22, %v525_v22  ;;  %v588_v22 = vpack.c.bf16 %v564_v13, %v563_v12 }
  0x98   : > { %v454_v20 = vmul.f32 %v4215_v60, %v304_v18  ;;  %v452_v21 = vmul.f32 %v4215_v60, %v294_v19  ;;  %v349_v26 = vpop.permute.xlu2 %348 }
  0x99   : > { %823 = vst [vmem:[#allocation2 + $0x40] sm:$0xf] %v791_v25  ;;  %v463_v30 = vmul.f32 %v4215_v60, %v349_v26  ;;  %v3660_v25 = vld [vmem:[#allocation3 + $0x88] sm:$0xff] }
  0x9a   : > { %v487_v23 = vadd.f32 %v4218_v0, %v454_v20  ;;  %v485_v24 = vadd.f32 %v4218_v0, %v452_v21  ;;  %1327 = vmatpush.bf16.msra.mxu2 %v3660_v25 }
  0x9b   : > { %v496_v33 = vadd.f32 %v4218_v0, %v463_v30 }
  0x9c   : > { %v519_v28 = vmax.f32 %v487_v23, 0.0  ;;  %v517_v29 = vmax.f32 %v485_v24, 0.0 }
  0x9d   : > { %v528_v41 = vmax.f32 %v496_v33, 0.0 }
  0x9e   : > { %v785_v31 = vpack.c.bf16 %v519_v28, %v519_v28  ;;  %v783_v32 = vpack.c.bf16 %v517_v29, %v517_v29 }
  0x9f   : > { %v309_v34 = vpop.permute.xlu1 %308  ;;  %v299_v35 = vpop.permute.xlu0 %298  ;;  %v794_v45 = vpack.c.bf16 %v528_v41, %v528_v41  ;;  %700 = vmatmul.bf16.gmra.mxu0 %v587_v44 }
  0xa0   : > { %817 = vst [vmem:[#allocation2 + $0x10] sm:$0xf] %v785_v31  ;;  %v455_v39 = vmul.f32 %v4215_v60, %v309_v34  ;;  %v453_v40 = vmul.f32 %v4215_v60, %v299_v35  ;;  %v364_v46 = vpop.permute.xlu2 %363  ;;  %v3659_v34 = vld [vmem:[#allocation3 + $0x80] sm:$0xff] }
  0xa1   : > { %815 = vst [vmem:[#allocation2] sm:$0xf] %v783_v32  ;;  %v466_v50 = vmul.f32 %v4215_v60, %v364_v46  ;;  %1328 = vmatpush.bf16.msra.mxu2 %v3659_v34 }
  0xa2   : > { %v488_v42 = vadd.f32 %v4218_v0, %v455_v39  ;;  %v486_v43 = vadd.f32 %v4218_v0, %v453_v40  ;;  %826 = vst [vmem:[#allocation2 + $0x58] sm:$0xf] %v794_v45 }
  0xa3   : > { %v499_v53 = vadd.f32 %v4218_v0, %v466_v50 }
  0xa4   : > { %v520_v48 = vmax.f32 %v488_v42, 0.0  ;;  %v518_v49 = vmax.f32 %v486_v43, 0.0 }
  0xa5   : > { %v531_v59 = vmax.f32 %v499_v53, 0.0  ;;  %v565_v53 = vld [vmem:[%s4182_s6 + $0x80] sm:$0xff] }
  0xa6   : > { %v786_v51 = vpack.c.bf16 %v520_v48, %v520_v48  ;;  %v784_v52 = vpack.c.bf16 %v518_v49, %v518_v49 }
  0xa7   : > { %v329_v54 = vpop.permute.xlu1 %328  ;;  %v324_v55 = vpop.permute.xlu0 %323  ;;  %v797_v63 = vpack.c.bf16 %v531_v59, %v531_v59  ;;  %v3264_v41 = vld [vmem:[#allocation2 + $0x10] sm:$0xf] }
  0xa8   : > { %818 = vst [vmem:[#allocation2 + $0x18] sm:$0xf] %v786_v51  ;;  %v459_v57 = vmul.f32 %v4215_v60, %v329_v54  ;;  %v458_v58 = vmul.f32 %v4215_v60, %v324_v55  ;;  %v379_v1 = vpop.permute.xlu2 %378  ;;  %v3256_v8 = vld [vmem:[#allocation2] sm:$0xf]  ;;  %v566_v54 = vld [vmem:[%s4182_s6 + $0x88] sm:$0xff] }
  0xa9   : > { %816 = vst [vmem:[#allocation2 + $0x8] sm:$0xf] %v784_v52  ;;  %v469_v5 = vmul.f32 %v4215_v60, %v379_v1 }
  0xaa   : > { %v492_v61 = vadd.f32 %v4218_v0, %v459_v57  ;;  %v491_v62 = vadd.f32 %v4218_v0, %v458_v58  ;;  %829 = vst [vmem:[#allocation2 + $0x70] sm:$0xf] %v797_v63  ;;  %v4265_v57 = vld [vmem:[#allocation6 + $0x2] ss:$0 sm:$0xff] }
  0xab   : > { %v502_v9 = vadd.f32 %v4218_v0, %v469_v5 }
  0xac   : > { %v524_v3 = vmax.f32 %v492_v61, 0.0  ;;  %v523_v4 = vmax.f32 %v491_v62, 0.0  ;;  %v589_v62 = vpack.c.bf16 %v566_v54, %v565_v53 }
  0xad   : > { %v534_v18 = vmax.f32 %v502_v9, 0.0 }
  0xae   : > { %v790_v6 = vpack.c.bf16 %v524_v3, %v524_v3  ;;  %v789_v7 = vpack.c.bf16 %v523_v4, %v523_v4 }
  0xaf   : > { %v344_v10 = vpop.permute.xlu1 %343  ;;  %v339_v11 = vpop.permute.xlu0 %338  ;;  %v800_v23 = vpack.c.bf16 %v534_v18, %v534_v18  ;;  %705 = vmatmul.bf16.gmra.mxu0 %v588_v22  ;;  %v3622_v45 = vld [vmem:[#allocation2 + $0x14] sm:$0xf0] }
  0xb0   : > { %822 = vst [vmem:[#allocation2 + $0x38] sm:$0xf] %v790_v6  ;;  %v462_v15 = vmul.f32 %v4215_v60, %v344_v10  ;;  %v461_v16 = vmul.f32 %v4215_v60, %v339_v11  ;;  %v3620_v17 = vld [vmem:[#allocation2 + $0x4] sm:$0xf0]  ;;  %v394_v24 = vpop.permute.xlu2 %393  ;;  %v3265_v52 = vor.u32 %v3622_v45, %v3264_v41 }
  0xb1   : > { %821 = vst [vmem:[#allocation2 + $0x30] sm:$0xf] %v789_v7  ;;  %v3257_v19 = vor.u32 %v3620_v17, %v3256_v8  ;;  %v472_v28 = vmul.f32 %v4215_v60, %v394_v24 }
  0xb2   : > { %v495_v20 = vadd.f32 %v4218_v0, %v462_v15  ;;  %v494_v21 = vadd.f32 %v4218_v0, %v461_v16  ;;  %832 = vst [vmem:[#allocation2 + $0x88] sm:$0xf] %v800_v23 }
  0xb3   : > { %1240 = vmatmul.bf16.vlgmr.msra.gmra.mxu1 %v3257_v19  ;;  %v505_v31 = vadd.f32 %v4218_v0, %v472_v28 }
  0xb4   : > { %v527_v26 = vmax.f32 %v495_v20, 0.0  ;;  %v526_v27 = vmax.f32 %v494_v21, 0.0  ;;  %v3272_v21 = vld [vmem:[#allocation2 + $0x20] sm:$0xf] }
  0xb5   : > { %v537_v37 = vmax.f32 %v505_v31, 0.0 }
  0xb6   : > { %v793_v29 = vpack.c.bf16 %v527_v26, %v527_v26  ;;  %v792_v30 = vpack.c.bf16 %v526_v27, %v526_v27  ;;  %v3624_v26 = vld [vmem:[#allocation2 + $0x24] sm:$0xf0] }
  0xb7   : > { %v359_v32 = vpop.permute.xlu1 %358  ;;  %v354_v33 = vpop.permute.xlu0 %353  ;;  %v803_v40 = vpack.c.bf16 %v537_v37, %v537_v37  ;;  %v3273_v34 = vor.u32 %v3624_v26, %v3272_v21  ;;  %v3682_v21 = vld [vmem:[#allocation3 + $0x138] sm:$0xff] }
  0xb8   : > { %825 = vst [vmem:[#allocation2 + $0x50] sm:$0xf] %v793_v29  ;;  %v465_v35 = vmul.f32 %v4215_v60, %v359_v32  ;;  %v464_v36 = vmul.f32 %v4215_v60, %v354_v33  ;;  %v409_v42 = vpop.permute.xlu2 %408  ;;  %1727 = vmatpush.bf16.msrb.mxu0 %v3682_v21  ;;  %v576_v21 = vld [vmem:[%s4182_s6 + $0xd8] sm:$0xff] }
  0xb9   : > { %824 = vst [vmem:[#allocation2 + $0x48] sm:$0xf] %v792_v30  ;;  %v475_v46 = vmul.f32 %v4215_v60, %v409_v42 }
  0xba   : > { %v498_v38 = vadd.f32 %v4218_v0, %v465_v35  ;;  %v497_v39 = vadd.f32 %v4218_v0, %v464_v36  ;;  %835 = vst [vmem:[#allocation2 + $0xa0] sm:$0xf] %v803_v40  ;;  %v567_v35 = vld [vmem:[%s4182_s6 + $0x90] sm:$0xff]  ;;  %v568_v36 = vld [vmem:[%s4182_s6 + $0x98] sm:$0xff] }
  0xbb   : > { %v508_v49 = vadd.f32 %v4218_v0, %v475_v46 }
  0xbc   : > { %v530_v43 = vmax.f32 %v498_v38, 0.0  ;;  %v529_v44 = vmax.f32 %v497_v39, 0.0  ;;  %v671_v1 = vpop.f32.mrf.mxu0 }
  0xbd   : > { %v540_v58 = vmax.f32 %v508_v49, 0.0  ;;  %v672_v5 = vadd.f32 %v4265_v57, %v671_v1 }
  0xbe   : > { %v796_v47 = vpack.c.bf16 %v530_v43, %v530_v43  ;;  %v795_v48 = vpack.c.bf16 %v529_v44, %v529_v44  ;;  %v590_v43 = vpack.c.bf16 %v568_v36, %v567_v35 }
  0xbf   : > { %v374_v50 = vpop.permute.xlu1 %373  ;;  %v369_v51 = vpop.permute.xlu0 %368  ;;  %v806_v63 = vpack.c.bf16 %v540_v58, %v540_v58  ;;  %v751_v9 = vmax.f32 %v672_v5, 0.0  ;;  %710 = vmatmul.bf16.gmra.mxu0 %v589_v62 }
  0xc0   : > { %828 = vst [vmem:[#allocation2 + $0x68] sm:$0xf] %v796_v47  ;;  %v468_v55 = vmul.f32 %v4215_v60, %v374_v50  ;;  %v467_v56 = vmul.f32 %v4215_v60, %v369_v51  ;;  %v424_v2 = vpop.permute.xlu2 %423 }
  0xc1   : > { %827 = vst [vmem:[#allocation2 + $0x60] sm:$0xf] %v795_v48  ;;  %v478_v6 = vmul.f32 %v4215_v60, %v424_v2  ;;  %v847_v13 = vpack.c.bf16 %v751_v9, %v751_v9  ;;  %v3626_v9 = vld [vmem:[#allocation2 + $0x34] sm:$0xf0] }
  0xc2   : > { %v501_v59 = vadd.f32 %v4218_v0, %v468_v55  ;;  %v500_v61 = vadd.f32 %v4218_v0, %v467_v56  ;;  %838 = vst [vmem:[#allocation2 + $0xb8] sm:$0xf] %v806_v63 }
  0xc3   : > { %1245 = vmatmul.bf16.gmra.mxu1 %v3265_v52  ;;  %v511_v10 = vadd.f32 %v4218_v0, %v478_v6  ;;  %879 = vst [vmem:[#allocation2 + $0x4] sm:$0xf] %v847_v13  ;;  %v570_v13 = vld [vmem:[%s4182_s6 + $0xa8] sm:$0xff] }
  0xc4   : > { %v533_v3 = vmax.f32 %v501_v59, 0.0  ;;  %v532_v4 = vmax.f32 %v500_v61, 0.0  ;;  %v673_v20 = vpop.f32.mrf.mxu0 }
  0xc5   : > { %v543_v16 = vmax.f32 %v511_v10, 0.0  ;;  %v674_v25 = vadd.f32 %v4265_v57, %v673_v20 }
  0xc6   : > { %v799_v7 = vpack.c.bf16 %v533_v3, %v533_v3  ;;  %v798_v8 = vpack.c.bf16 %v532_v4, %v532_v4 }
  0xc7   : > { %v389_v11 = vpop.permute.xlu1 %388  ;;  %v384_v12 = vpop.permute.xlu0 %383  ;;  %v809_v19 = vpack.c.bf16 %v543_v16, %v543_v16  ;;  %v752_v30 = vmax.f32 %v674_v25, 0.0 }
  0xc8   : > { %831 = vst [vmem:[#allocation2 + $0x80] sm:$0xf] %v799_v7  ;;  %v471_v14 = vmul.f32 %v4215_v60, %v389_v11  ;;  %v470_v15 = vmul.f32 %v4215_v60, %v384_v12  ;;  %v439_v22 = vpop.permute.xlu2 %438  ;;  %v569_v12 = vld [vmem:[%s4182_s6 + $0xa0] sm:$0xff] }
  0xc9   : > { %830 = vst [vmem:[#allocation2 + $0x78] sm:$0xf] %v798_v8  ;;  %v481_v27 = vmul.f32 %v4215_v60, %v439_v22  ;;  %v848_v37 = vpack.c.bf16 %v752_v30, %v752_v30  ;;  %v3280_v8 = vld [vmem:[#allocation2 + $0x30] sm:$0xf]  ;;  %v591_v20 = vpack.c.bf16 %v570_v13, %v569_v12 }
  0xca   : > { %v504_v17 = vadd.f32 %v4218_v0, %v471_v14  ;;  %v503_v18 = vadd.f32 %v4218_v0, %v470_v15  ;;  %841 = vst [vmem:[#allocation2 + $0xd0] sm:$0xf] %v809_v19  ;;  %v3619_v58 = vld [vmem:[#allocation2 + $0x4] sm:$0xf] }
  0xcb   : > { %v514_v31 = vadd.f32 %v4218_v0, %v481_v27  ;;  %880 = vst [vmem:[#allocation2 + $0xc] sm:$0xf] %v848_v37 }
  0xcc   : > { %v536_v23 = vmax.f32 %v504_v17, 0.0  ;;  %v535_v24 = vmax.f32 %v503_v18, 0.0  ;;  %v676_v45 = vpop.f32.mrf.mxu0  ;;  %v3281_v17 = vor.u32 %v3626_v9, %v3280_v8 }
  0xcd   : > { %v546_v40 = vmax.f32 %v514_v31, 0.0  ;;  %v677_v48 = vadd.f32 %v4265_v57, %v676_v45  ;;  %v3288_v45 = vld [vmem:[#allocation2 + $0x40] sm:$0xf] }
  0xce   : > { %v802_v28 = vpack.c.bf16 %v536_v23, %v536_v23  ;;  %v801_v29 = vpack.c.bf16 %v535_v24, %v535_v24 }
  0xcf   : > { %v404_v32 = vpop.permute.xlu1 %403  ;;  %v399_v33 = vpop.permute.xlu0 %398  ;;  %v812_v44 = vpack.c.bf16 %v546_v40, %v546_v40  ;;  %v753_v51 = vmax.f32 %v677_v48, 0.0  ;;  %715 = vmatmul.bf16.gmra.mxu0 %v590_v43  ;;  %v572_v48 = vld [vmem:[%s4182_s6 + $0xb8] sm:$0xff] }
  0xd0   : > { %834 = vst [vmem:[#allocation2 + $0x98] sm:$0xf] %v802_v28  ;;  %v474_v38 = vmul.f32 %v4215_v60, %v404_v32  ;;  %v473_v39 = vmul.f32 %v4215_v60, %v399_v33 }
  0xd1   : > { %833 = vst [vmem:[#allocation2 + $0x90] sm:$0xf] %v801_v29  ;;  %v849_v54 = vpack.c.bf16 %v753_v51, %v753_v51 }
  0xd2   : > { %v507_v41 = vadd.f32 %v4218_v0, %v474_v38  ;;  %v506_v42 = vadd.f32 %v4218_v0, %v473_v39  ;;  %844 = vst [vmem:[#allocation2 + $0xe8] sm:$0xf] %v812_v44  ;;  %v3258_v59 = vld [vmem:[#allocation2 + $0x8] sm:$0xf0] }
  0xd3   : > { %1250 = vmatmul.bf16.gmra.mxu1 %v3273_v34  ;;  %881 = vst [vmem:[#allocation2 + $0x14] sm:$0xf] %v849_v54  ;;  %v3261_v63 = vor.u32 %v3619_v58, %v3258_v59 }
  0xd4   : > { %v539_v46 = vmax.f32 %v507_v41, 0.0  ;;  %v538_v47 = vmax.f32 %v506_v42, 0.0  ;;  %v678_v1 = vpop.f32.mrf.mxu0 }
  0xd5   : > { %v679_v4 = vadd.f32 %v4265_v57, %v678_v1  ;;  %1329 = vmatmul.bf16.vlgmr.msra.gmra.mxu2 %v3261_v63  ;;  %v3296_v63 = vld [vmem:[#allocation2 + $0x50] sm:$0xf]  ;;  %v3630_v1 = vld [vmem:[#allocation2 + $0x54] sm:$0xf0] }
  0xd6   : > { %v805_v49 = vpack.c.bf16 %v539_v46, %v539_v46  ;;  %v804_v50 = vpack.c.bf16 %v538_v47, %v538_v47  ;;  %v3628_v46 = vld [vmem:[#allocation2 + $0x44] sm:$0xf0]  ;;  %v571_v47 = vld [vmem:[%s4182_s6 + $0xb0] sm:$0xff] }
  0xd7   : > { %v419_v52 = vpop.permute.xlu1 %418  ;;  %v414_v53 = vpop.permute.xlu0 %413  ;;  %v754_v7 = vmax.f32 %v679_v4, 0.0 }
  0xd8   : > { %837 = vst [vmem:[#allocation2 + $0xb0] sm:$0xf] %v805_v49  ;;  %v477_v55 = vmul.f32 %v4215_v60, %v419_v52  ;;  %v476_v56 = vmul.f32 %v4215_v60, %v414_v53 }
  0xd9   : > { %836 = vst [vmem:[#allocation2 + $0xa8] sm:$0xf] %v804_v50  ;;  %v850_v14 = vpack.c.bf16 %v754_v7, %v754_v7  ;;  %v3289_v50 = vor.u32 %v3628_v46, %v3288_v45  ;;  %v3681_v7 = vld [vmem:[#allocation3 + $0x130] sm:$0xff] }
  0xda   : > { %v510_v61 = vadd.f32 %v4218_v0, %v477_v55  ;;  %v509_v62 = vadd.f32 %v4218_v0, %v476_v56  ;;  %v3621_v34 = vld [vmem:[#allocation2 + $0x14] sm:$0xf]  ;;  %1728 = vmatpush.bf16.msrb.mxu0 %v3681_v7 }
  0xdb   : > { %882 = vst [vmem:[#allocation2 + $0x1c] sm:$0xf] %v850_v14 }
  0xdc   : > { %v542_v2 = vmax.f32 %v510_v61, 0.0  ;;  %v541_v3 = vmax.f32 %v509_v62, 0.0  ;;  %v681_v22 = vpop.f32.mrf.mxu0 }
  0xdd   : > { %v682_v25 = vadd.f32 %v4265_v57, %v681_v22 }
  0xde   : > { %v808_v5 = vpack.c.bf16 %v542_v2, %v542_v2  ;;  %v807_v6 = vpack.c.bf16 %v541_v3, %v541_v3  ;;  %v573_v2 = vld [vmem:[%s4182_s6 + $0xc0] sm:$0xff]  ;;  %v574_v3 = vld [vmem:[%s4182_s6 + $0xc8] sm:$0xff] }
  0xdf   : > { %v434_v10 = vpop.permute.xlu1 %433  ;;  %v429_v11 = vpop.permute.xlu0 %428  ;;  %v755_v28 = vmax.f32 %v682_v25, 0.0  ;;  %720 = vmatmul.bf16.gmra.mxu0 %v591_v20  ;;  %v575_v20 = vld [vmem:[%s4182_s6 + $0xd0] sm:$0xff] }
  0xe0   : > { %840 = vst [vmem:[#allocation2 + $0xc8] sm:$0xf] %v808_v5  ;;  %v480_v15 = vmul.f32 %v4215_v60, %v434_v10  ;;  %v479_v16 = vmul.f32 %v4215_v60, %v429_v11  ;;  %v3297_v5 = vor.u32 %v3630_v1, %v3296_v63 }
  0xe1   : > { %839 = vst [vmem:[#allocation2 + $0xc0] sm:$0xf] %v807_v6  ;;  %v851_v31 = vpack.c.bf16 %v755_v28, %v755_v28  ;;  %v593_v6 = vpack.c.bf16 %v574_v3, %v573_v2  ;;  %v3672_v2 = vld [vmem:[#allocation3 + $0xe8] sm:$0xff] }
  0xe2   : > { %v513_v18 = vadd.f32 %v4218_v0, %v480_v15  ;;  %v512_v19 = vadd.f32 %v4218_v0, %v479_v16  ;;  %v3266_v35 = vld [vmem:[#allocation2 + $0x18] sm:$0xf0] }
  0xe3   : > { %1255 = vmatmul.bf16.gmra.mxu1 %v3281_v17  ;;  %883 = vst [vmem:[#allocation2 + $0x24] sm:$0xf] %v851_v31  ;;  %v3269_v38 = vor.u32 %v3621_v34, %v3266_v35  ;;  %v3312_v35 = vld [vmem:[#allocation2 + $0x70] sm:$0xf] }
  0xe4   : > { %v545_v23 = vmax.f32 %v513_v18, 0.0  ;;  %v544_v24 = vmax.f32 %v512_v19, 0.0  ;;  %v683_v39 = vpop.f32.mrf.mxu0  ;;  %v3304_v18 = vld [vmem:[#allocation2 + $0x60] sm:$0xf]  ;;  %v3632_v19 = vld [vmem:[#allocation2 + $0x64] sm:$0xf0] }
  0xe5   : > { %v684_v42 = vadd.f32 %v4265_v57, %v683_v39  ;;  %1334 = vmatmul.bf16.gmra.mxu2 %v3269_v38  ;;  %v578_v38 = vld [vmem:[%s4182_s6 + $0xe8] sm:$0xff] }
  0xe6   : > { %v811_v26 = vpack.c.bf16 %v545_v23, %v545_v23  ;;  %v810_v27 = vpack.c.bf16 %v544_v24, %v544_v24  ;;  %v3305_v23 = vor.u32 %v3632_v19, %v3304_v18  ;;  %v594_v24 = vpack.c.bf16 %v576_v21, %v575_v20  ;;  %v3669_v19 = vld [vmem:[#allocation3 + $0xd0] sm:$0xff]  ;;  %v3679_v20 = vld [vmem:[#allocation3 + $0x120] sm:$0xff] }
  0xe7   : > { %v449_v29 = vpop.permute.xlu1 %448  ;;  %v444_v30 = vpop.permute.xlu0 %443 }
  0xe8   : > { %843 = vst [vmem:[#allocation2 + $0xe0] sm:$0xf] %v811_v26  ;;  %v483_v32 = vmul.f32 %v4215_v60, %v449_v29  ;;  %v482_v33 = vmul.f32 %v4215_v60, %v444_v30  ;;  %v756_v60 = vmax.f32 %v684_v42, 0.0  ;;  %v3680_v42 = vld [vmem:[#allocation3 + $0x128] sm:$0xff] }
  0xe9   : > { %842 = vst [vmem:[#allocation2 + $0xd8] sm:$0xf] %v810_v27  ;;  %1729 = vmatpush.bf16.msrb.mxu0 %v3680_v42 }
  0xea   : > { %v516_v36 = vadd.f32 %v4218_v0, %v483_v32  ;;  %v515_v37 = vadd.f32 %v4218_v0, %v482_v33  ;;  %v852_v49 = vpack.c.bf16 %v756_v60, %v756_v60  ;;  %v592_v0 = vpack.c.bf16 %v572_v48, %v571_v47  ;;  %v3623_v55 = vld [vmem:[#allocation2 + $0x24] sm:$0xf] }
  0xec   : > { %v548_v40 = vmax.f32 %v516_v36, 0.0  ;;  %v547_v41 = vmax.f32 %v515_v37, 0.0  ;;  %884 = vst [vmem:[#allocation2 + $0x2c] sm:$0xf] %v852_v49  ;;  %v686_v51 = vpop.f32.mrf.mxu0  ;;  %v3634_v36 = vld [vmem:[#allocation2 + $0x74] sm:$0xf0] }
  0xed   : > { %v687_v52 = vadd.f32 %v4265_v57, %v686_v51  ;;  %v577_v37 = vld [vmem:[%s4182_s6 + $0xe0] sm:$0xff]  ;;  %1730 = vmatpush.bf16.msrb.mxu0 %v3679_v20 }
  0xee   : > { %v814_v43 = vpack.c.bf16 %v548_v40, %v548_v40  ;;  %v813_v44 = vpack.c.bf16 %v547_v41, %v547_v41  ;;  %v3313_v40 = vor.u32 %v3634_v36, %v3312_v35  ;;  %v595_v41 = vpack.c.bf16 %v578_v38, %v577_v37  ;;  %v3640_v35 = vld [vmem:[#allocation2 + $0xa4] sm:$0xf0] }
  0xef   : > { %v757_v53 = vmax.f32 %v687_v52, 0.0  ;;  %725 = vmatmul.bf16.gmra.mxu0 %v592_v0  ;;  %v3674_v0 = vld [vmem:[#allocation3 + $0xf8] sm:$0xff]  ;;  %v3320_v52 = vld [vmem:[#allocation2 + $0x80] sm:$0xf] }
  0xf0   : > { %846 = vst [vmem:[#allocation2 + $0xf8] sm:$0xf] %v814_v43  ;;  %1541 = vmatpush.bf16.msra.mxu3 %v3674_v0 }
  0xf1   : > { %845 = vst [vmem:[#allocation2 + $0xf0] sm:$0xf] %v813_v44  ;;  %v853_v54 = vpack.c.bf16 %v757_v53, %v757_v53  ;;  %v3636_v53 = vld [vmem:[#allocation2 + $0x84] sm:$0xf0] }
  0xf3   : > { %1260 = vmatmul.bf16.gmra.mxu1 %v3289_v50  ;;  %v3274_v56 = vld [vmem:[#allocation2 + $0x28] sm:$0xf0]  ;;  %885 = vst [vmem:[#allocation2 + $0x34] sm:$0xf] %v853_v54  ;;  %v579_v54 = vld [vmem:[%s4182_s6 + $0xf0] sm:$0xff] }
  0xf4   : > { %v3277_v58 = vor.u32 %v3623_v55, %v3274_v56  ;;  %v688_v59 = vpop.f32.mrf.mxu0  ;;  %v580_v55 = vld [vmem:[%s4182_s6 + $0xf8] sm:$0xff] }
  0xf5   : > { %v689_v61 = vadd.f32 %v4265_v57, %v688_v59  ;;  %v3321_v59 = vor.u32 %v3636_v53, %v3320_v52 }
  0xf6   : > { %1339 = vmatmul.bf16.gmra.mxu2 %v3277_v58 }
  0xf7   : > { %v758_v62 = vmax.f32 %v689_v61, 0.0  ;;  %v3673_v61 = vld [vmem:[#allocation3 + $0xf0] sm:$0xff] }
  0xf8   : > { %1542 = vmatpush.bf16.msra.mxu3 %v3673_v61 }
  0xf9   : > { %v854_v4 = vpack.c.bf16 %v758_v62, %v758_v62  ;;  %v596_v62 = vpack.c.bf16 %v580_v55, %v579_v54  ;;  %v3678_v55 = vld [vmem:[#allocation3 + $0x118] sm:$0xff] }
  0xfa   : > { %v3625_v12 = vld [vmem:[#allocation2 + $0x34] sm:$0xf]  ;;  %1731 = vmatpush.bf16.msrb.mxu0 %v3678_v55 }
  0xfb   : > { %886 = vst [vmem:[#allocation2 + $0x3c] sm:$0xf] %v854_v4 }
  0xfc   : > { %v691_v8 = vpop.f32.mrf.mxu0  ;;  %1543 = vmatpush.bf16.msra.mxu3 %v3672_v2 }
  0xfd   : > { %v692_v9 = vadd.f32 %v4265_v57, %v691_v8  ;;  %v3671_v8 = vld [vmem:[#allocation3 + $0xe0] sm:$0xff] }
  0xff   : > { %v759_v10 = vmax.f32 %v692_v9, 0.0  ;;  %730 = vmatmul.bf16.gmra.mxu0 %v593_v6 }
 0x100   : > { %1544 = vmatpush.bf16.msra.mxu3 %v3671_v8 }
 0x101   : > { %v855_v11 = vpack.c.bf16 %v759_v10, %v759_v10 }
 0x102   : > { %v3282_v13 = vld [vmem:[#allocation2 + $0x38] sm:$0xf0] }
 0x103   : > { %1265 = vmatmul.bf16.gmra.mxu1 %v3297_v5  ;;  %887 = vst [vmem:[#allocation2 + $0x44] sm:$0xf] %v855_v11  ;;  %v3285_v14 = vor.u32 %v3625_v12, %v3282_v13  ;;  %v3670_v12 = vld [vmem:[#allocation3 + $0xd8] sm:$0xff] }
 0x104   : > { %v693_v15 = vpop.f32.mrf.mxu0  ;;  %1545 = vmatpush.bf16.msra.mxu3 %v3670_v12 }
 0x105   : > { %v694_v16 = vadd.f32 %v4265_v57, %v693_v15  ;;  %v3638_v15 = vld [vmem:[#allocation2 + $0x94] sm:$0xf0] }
 0x106   : > { %1344 = vmatmul.bf16.gmra.mxu2 %v3285_v14  ;;  %v3328_v14 = vld [vmem:[#allocation2 + $0x90] sm:$0xf] }
 0x107   : > { %v760_v17 = vmax.f32 %v694_v16, 0.0  ;;  %v3329_v18 = vor.u32 %v3638_v15, %v3328_v14  ;;  %v3352_v14 = vld [vmem:[#allocation2 + $0xc0] sm:$0xf]  ;;  %v3644_v15 = vld [vmem:[#allocation2 + $0xc4] sm:$0xf0] }
 0x108   : > { %1546 = vmatpush.bf16.msra.mxu3 %v3669_v19  ;;  %v3353_v20 = vor.u32 %v3644_v15, %v3352_v14  ;;  %v3689_v15 = vld [vmem:[#allocation3 + $0x170] sm:$0xff] }
 0x109   : > { %v856_v22 = vpack.c.bf16 %v760_v17, %v760_v17 }
 0x10a   : > { %v3627_v29 = vld [vmem:[#allocation2 + $0x44] sm:$0xf] }
 0x10b   : > { %888 = vst [vmem:[#allocation2 + $0x4c] sm:$0xf] %v856_v22 }
 0x10c   : > { %v696_v25 = vpop.f32.mrf.mxu0 }
 0x10d   : > { %v697_v26 = vadd.f32 %v4265_v57, %v696_v25 }
 0x10f   : > { %v761_v27 = vmax.f32 %v697_v26, 0.0  ;;  %735 = vmatmul.bf16.gmra.mxu0 %v594_v24 }
 0x111   : > { %v857_v28 = vpack.c.bf16 %v761_v27, %v761_v27 }
 0x112   : > { %v3290_v30 = vld [vmem:[#allocation2 + $0x48] sm:$0xf0] }
 0x113   : > { %1270 = vmatmul.bf16.gmra.mxu1 %v3305_v23  ;;  %889 = vst [vmem:[#allocation2 + $0x54] sm:$0xf] %v857_v28  ;;  %v3293_v31 = vor.u32 %v3627_v29, %v3290_v30  ;;  %v3668_v23 = vld [vmem:[#allocation3 + $0xc8] sm:$0xff]  ;;  %v3667_v29 = vld [vmem:[#allocation3 + $0xc0] sm:$0xff] }
 0x114   : > { %v698_v32 = vpop.f32.mrf.mxu0  ;;  %1547 = vmatpush.bf16.msra.mxu3 %v3668_v23 }
 0x115   : > { %v699_v33 = vadd.f32 %v4265_v57, %v698_v32 }
 0x116   : > { %1349 = vmatmul.bf16.gmra.mxu2 %v3293_v31 }
 0x117   : > { %v762_v34 = vmax.f32 %v699_v33, 0.0 }
 0x118   : > { %1548 = vmatpush.bf16.msra.mxu3 %v3667_v29 }
 0x119   : > { %v858_v39 = vpack.c.bf16 %v762_v34, %v762_v34  ;;  %v3336_v34 = vld [vmem:[#allocation2 + $0xa0] sm:$0xf] }
 0x11a   : > { %v3629_v46 = vld [vmem:[#allocation2 + $0x54] sm:$0xf]  ;;  %v3337_v38 = vor.u32 %v3640_v35, %v3336_v34 }
 0x11b   : > { %890 = vst [vmem:[#allocation2 + $0x5c] sm:$0xf] %v858_v39 }
 0x11c   : > { %v701_v43 = vpop.f32.mrf.mxu0 }
 0x11d   : > { %v702_v44 = vadd.f32 %v4265_v57, %v701_v43 }
 0x11f   : > { %v763_v60 = vmax.f32 %v702_v44, 0.0  ;;  %740 = vmatmul.bf16.gmra.mxu0 %v595_v41 }
 0x121   : > { %v859_v45 = vpack.c.bf16 %v763_v60, %v763_v60 }
 0x122   : > { %v3298_v47 = vld [vmem:[#allocation2 + $0x58] sm:$0xf0] }
 0x123   : > { %1275 = vmatmul.bf16.gmra.mxu1 %v3313_v40  ;;  %891 = vst [vmem:[#allocation2 + $0x64] sm:$0xf] %v859_v45  ;;  %v3301_v48 = vor.u32 %v3629_v46, %v3298_v47 }
 0x124   : > { %v703_v49 = vpop.f32.mrf.mxu0 }
 0x125   : > { %v704_v50 = vadd.f32 %v4265_v57, %v703_v49  ;;  %v3344_v49 = vld [vmem:[#allocation2 + $0xb0] sm:$0xf] }
 0x126   : > { %1354 = vmatmul.bf16.gmra.mxu2 %v3301_v48 }
 0x127   : > { %v764_v51 = vmax.f32 %v704_v50, 0.0  ;;  %v3642_v50 = vld [vmem:[#allocation2 + $0xb4] sm:$0xf0] }
 0x128   : > { %v3345_v54 = vor.u32 %v3642_v50, %v3344_v49 }
 0x129   : > { %v860_v56 = vpack.c.bf16 %v764_v51, %v764_v51  ;;  %v4339_v51 = vld [vmem:[#allocation6 + $0x3] ss:$0 sm:$0xff] }
 0x12a   : > { %v3631_v6 = vld [vmem:[#allocation2 + $0x64] sm:$0xf] }
 0x12b   : > { %892 = vst [vmem:[#allocation2 + $0x6c] sm:$0xf] %v860_v56 }
 0x12c   : > { %v706_v63 = vpop.f32.mrf.mxu0 }
 0x12d   : > { %v707_v1 = vadd.f32 %v4265_v57, %v706_v63 }
 0x12f   : > { %v765_v3 = vmax.f32 %v707_v1, 0.0  ;;  %745 = vmatmul.bf16.gmra.mxu0 %v596_v62 }
 0x130   : > { %v4321_v58 = vpop.f32.mrf.mxu1 }
 0x131   : > { %v861_v4 = vpack.c.bf16 %v765_v3, %v765_v3 }
 0x132   : > { %v3306_v7 = vld [vmem:[#allocation2 + $0x68] sm:$0xf0] }
 0x133   : > { %1280 = vmatmul.bf16.gmra.mxu1 %v3321_v59  ;;  %893 = vst [vmem:[#allocation2 + $0x74] sm:$0xf] %v861_v4  ;;  %v3309_v9 = vor.u32 %v3631_v6, %v3306_v7  ;;  %v1242_v59 = vadd.f32 %v4339_v51, %v4321_v58 }
 0x134   : > { %v708_v10 = vpop.f32.mrf.mxu0 }
 0x135   : > { %v709_v11 = vadd.f32 %v4265_v57, %v708_v10 }
 0x136   : > { %1359 = vmatmul.bf16.gmra.mxu2 %v3309_v9 }
 0x137   : > { %v766_v13 = vmax.f32 %v709_v11, 0.0 }
 0x138   : > { %v4324_v5 = vpop.f32.mrf.mxu1 }
 0x139   : > { %v862_v16 = vpack.c.bf16 %v766_v13, %v766_v13  ;;  %v1244_v62 = vadd.f32 %v4339_v51, %v4324_v5 }
 0x13a   : > { %v3633_v27 = vld [vmem:[#allocation2 + $0x74] sm:$0xf] }
 0x13b   : > { %894 = vst [vmem:[#allocation2 + $0x7c] sm:$0xf] %v862_v16 }
 0x13c   : > { %v711_v21 = vpop.f32.mrf.mxu0 }
 0x13d   : > { %v712_v22 = vadd.f32 %v4265_v57, %v711_v21  ;;  %v3690_v21 = vld [vmem:[#allocation3 + $0x178] sm:$0xff] }
 0x13e   : > { %1979 = vmatpush.bf16.msrb.mxu1 %v3690_v21 }
 0x13f   : > { %v767_v24 = vmax.f32 %v712_v22, 0.0 }
 0x140   : > { %v4327_v17 = vpop.f32.mrf.mxu1 }
 0x141   : > { %v863_v25 = vpack.c.bf16 %v767_v24, %v767_v24  ;;  %v1247_v23 = vadd.f32 %v4339_v51, %v4327_v17 }
 0x142   : > { %v3314_v28 = vld [vmem:[#allocation2 + $0x78] sm:$0xf0]  ;;  %1980 = vmatpush.bf16.msrb.mxu1 %v3689_v15 }
 0x143   : > { %1285 = vmatmul.bf16.gmra.mxu1 %v3329_v18  ;;  %895 = vst [vmem:[#allocation2 + $0x84] sm:$0xf] %v863_v25  ;;  %v3317_v30 = vor.u32 %v3633_v27, %v3314_v28 }
 0x144   : > { %v713_v31 = vpop.f32.mrf.mxu0 }
 0x145   : > { %v714_v32 = vadd.f32 %v4265_v57, %v713_v31 }
 0x146   : > { %1364 = vmatmul.bf16.gmra.mxu2 %v3317_v30 }
 0x147   : > { %v768_v33 = vmax.f32 %v714_v32, 0.0 }
 0x148   : > { %v4330_v26 = vpop.f32.mrf.mxu1 }
 0x149   : > { %v864_v36 = vpack.c.bf16 %v768_v33, %v768_v33  ;;  %v1249_v25 = vadd.f32 %v4339_v51, %v4330_v26 }
 0x14a   : > { %v3635_v44 = vld [vmem:[#allocation2 + $0x84] sm:$0xf] }
 0x14b   : > { %896 = vst [vmem:[#allocation2 + $0x8c] sm:$0xf] %v864_v36 }
 0x14c   : > { %v716_v39 = vpop.f32.mrf.mxu0 }
 0x14d   : > { %v717_v40 = vadd.f32 %v4265_v57, %v716_v39 }
 0x14f   : > { %v769_v41 = vmax.f32 %v717_v40, 0.0 }
 0x150   : > { %v4333_v37 = vpop.f32.mrf.mxu1 }
 0x151   : > { %v865_v42 = vpack.c.bf16 %v769_v41, %v769_v41  ;;  %v3360_v41 = vld [vmem:[#allocation2 + $0xd0] sm:$0xf]  ;;  %v1252_v49 = vadd.f32 %v4339_v51, %v4333_v37 }
 0x152   : > { %v3322_v60 = vld [vmem:[#allocation2 + $0x88] sm:$0xf0] }
 0x153   : > { %1290 = vmatmul.bf16.gmra.mxu1 %v3337_v38  ;;  %897 = vst [vmem:[#allocation2 + $0x94] sm:$0xf] %v865_v42  ;;  %v3325_v45 = vor.u32 %v3635_v44, %v3322_v60  ;;  %v3646_v42 = vld [vmem:[#allocation2 + $0xd4] sm:$0xf0] }
 0x154   : > { %v718_v46 = vpop.f32.mrf.mxu0 }
 0x155   : > { %v719_v47 = vadd.f32 %v4265_v57, %v718_v46  ;;  %v3361_v46 = vor.u32 %v3646_v42, %v3360_v41  ;;  %v3650_v41 = vld [vmem:[#allocation2 + $0xf4] sm:$0xf0] }
 0x156   : > { %1369 = vmatmul.bf16.gmra.mxu2 %v3325_v45 }
 0x157   : > { %v770_v48 = vmax.f32 %v719_v47, 0.0  ;;  %v3677_v47 = vld [vmem:[#allocation3 + $0x110] sm:$0xff] }
 0x158   : > { %v4336_v43 = vpop.f32.mrf.mxu1  ;;  %v1330_v0 = vpop.f32.mrf.mxu2  ;;  %1732 = vmatpush.bf16.msrb.mxu0 %v3677_v47  ;;  %v3676_v47 = vld [vmem:[#allocation3 + $0x108] sm:$0xff] }
 0x159   : > { %v866_v52 = vpack.c.bf16 %v770_v48, %v770_v48  ;;  %v4348_v63 = vadd.f32 %v1330_v0, %v1242_v59  ;;  %v1254_v0 = vadd.f32 %v4339_v51, %v4336_v43 }
 0x15a   : > { %v3637_v7 = vld [vmem:[#allocation2 + $0x94] sm:$0xf] }
 0x15b   : > { %898 = vst [vmem:[#allocation2 + $0x9c] sm:$0xf] %v866_v52  ;;  %v1410_v9 = vmax.f32 %v4348_v63, 0.0 }
 0x15c   : > { %v721_v56 = vpop.f32.mrf.mxu0  ;;  %1733 = vmatpush.bf16.msrb.mxu0 %v3676_v47 }
 0x15d   : > { %v722_v61 = vadd.f32 %v4265_v57, %v721_v56 }
 0x15f   : > { %v771_v1 = vmax.f32 %v722_v61, 0.0 }
 0x160   : > { %v4341_v53 = vpop.f32.mrf.mxu1  ;;  %v1332_v2 = vpop.f32.mrf.mxu2 }
 0x161   : > { %v867_v3 = vpack.c.bf16 %v771_v1, %v771_v1  ;;  %v4352_v6 = vadd.f32 %v1332_v2, %v1244_v62 }
 0x162   : > { %v3330_v8 = vld [vmem:[#allocation2 + $0x98] sm:$0xf0] }
 0x163   : > { %1295 = vmatmul.bf16.gmra.mxu1 %v3345_v54  ;;  %899 = vst [vmem:[#allocation2 + $0xa4] sm:$0xf] %v867_v3  ;;  %v1411_v58 = vmax.f32 %v4352_v6, 0.0  ;;  %v3333_v10 = vor.u32 %v3637_v7, %v3330_v8 }
 0x164   : > { %v723_v11 = vpop.f32.mrf.mxu0 }
 0x165   : > { %v724_v5 = vadd.f32 %v4265_v57, %v723_v11  ;;  %v1476_v12 = vpack.c.bf16 %v1411_v58, %v1410_v9  ;;  %v3368_v11 = vld [vmem:[#allocation2 + $0xe0] sm:$0xf] }
 0x166   : > { %1374 = vmatmul.bf16.gmra.mxu2 %v3333_v10 }
 0x167   : > { %v772_v13 = vmax.f32 %v724_v5, 0.0  ;;  %1549 = vmatmul.bf16.vlgmr.msra.gmra.mxu3 %v1476_v12  ;;  %v3648_v5 = vld [vmem:[#allocation2 + $0xe4] sm:$0xf0] }
 0x168   : > { %v4350_v4 = vpop.f32.mrf.mxu1  ;;  %v1335_v16 = vpop.f32.mrf.mxu2  ;;  %v3369_v14 = vor.u32 %v3648_v5, %v3368_v11 }
 0x169   : > { %v868_v18 = vpack.c.bf16 %v772_v13, %v772_v13  ;;  %v4368_v27 = vadd.f32 %v1335_v16, %v1247_v23 }
 0x16a   : > { %v3639_v33 = vld [vmem:[#allocation2 + $0xa4] sm:$0xf] }
 0x16b   : > { %900 = vst [vmem:[#allocation2 + $0xac] sm:$0xf] %v868_v18  ;;  %v1412_v35 = vmax.f32 %v4368_v27, 0.0  ;;  %v1257_v18 = vadd.f32 %v4339_v51, %v4341_v53 }
 0x16c   : > { %v726_v22 = vpop.f32.mrf.mxu0 }
 0x16d   : > { %v727_v24 = vadd.f32 %v4265_v57, %v726_v22  ;;  %v1259_v22 = vadd.f32 %v4339_v51, %v4350_v4 }
 0x16f   : > { %v773_v28 = vmax.f32 %v727_v24, 0.0 }
 0x170   : > { %v4361_v19 = vpop.f32.mrf.mxu1  ;;  %v1337_v29 = vpop.f32.mrf.mxu2 }
 0x171   : > { %v869_v30 = vpack.c.bf16 %v773_v28, %v773_v28  ;;  %v4372_v32 = vadd.f32 %v1337_v29, %v1249_v25 }
 0x172   : > { %v3338_v34 = vld [vmem:[#allocation2 + $0xa8] sm:$0xf0] }
 0x173   : > { %1300 = vmatmul.bf16.gmra.mxu1 %v3353_v20  ;;  %901 = vst [vmem:[#allocation2 + $0xb4] sm:$0xf] %v869_v30  ;;  %v1413_v17 = vmax.f32 %v4372_v32, 0.0  ;;  %v3341_v36 = vor.u32 %v3639_v33, %v3338_v34 }
 0x174   : > { %v728_v38 = vpop.f32.mrf.mxu0 }
 0x175   : > { %v729_v26 = vadd.f32 %v4265_v57, %v728_v38  ;;  %v1477_v39 = vpack.c.bf16 %v1413_v17, %v1412_v35 }
 0x176   : > { %1379 = vmatmul.bf16.gmra.mxu2 %v3341_v36 }
 0x177   : > { %v774_v40 = vmax.f32 %v729_v26, 0.0  ;;  %1554 = vmatmul.bf16.gmra.mxu3 %v1477_v39 }
 0x178   : > { %v4370_v31 = vpop.f32.mrf.mxu1 }
 0x179   : > { %v1340_v44 = vpop.f32.mrf.mxu2  ;;  %v870_v60 = vpack.c.bf16 %v774_v40, %v774_v40  ;;  %v3376_v40 = vld [vmem:[#allocation2 + $0xf0] sm:$0xf] }
 0x17a   : > { %v4388_v52 = vadd.f32 %v1340_v44, %v1252_v49  ;;  %v3641_v61 = vld [vmem:[#allocation2 + $0xb4] sm:$0xf]  ;;  %v1262_v49 = vadd.f32 %v4339_v51, %v4361_v19 }
 0x17b   : > { %902 = vst [vmem:[#allocation2 + $0xbc] sm:$0xf] %v870_v60 }
 0x17c   : > { %v731_v48 = vpop.f32.mrf.mxu0  ;;  %v1414_v1 = vmax.f32 %v4388_v52, 0.0 }
 0x17d   : > { %v732_v50 = vadd.f32 %v4265_v57, %v731_v48 }
 0x17f   : > { %v775_v54 = vmax.f32 %v732_v50, 0.0 }
 0x180   : > { %v4381_v45 = vpop.f32.mrf.mxu1 }
 0x181   : > { %v1342_v55 = vpop.f32.mrf.mxu2  ;;  %v871_v56 = vpack.c.bf16 %v775_v54, %v775_v54 }
 0x182   : > { %v4390_v59 = vadd.f32 %v1342_v55, %v1254_v0  ;;  %v3346_v62 = vld [vmem:[#allocation2 + $0xb8] sm:$0xf0]  ;;  %v1264_v0 = vadd.f32 %v4339_v51, %v4370_v31 }
 0x183   : > { %1305 = vmatmul.bf16.gmra.mxu1 %v3361_v46  ;;  %903 = vst [vmem:[#allocation2 + $0xc4] sm:$0xf] %v871_v56  ;;  %v3349_v2 = vor.u32 %v3641_v61, %v3346_v62  ;;  %v3377_v46 = vor.u32 %v3650_v41, %v3376_v40 }
 0x184   : > { %v1415_v37 = vmax.f32 %v4390_v59, 0.0  ;;  %v733_v7 = vpop.f32.mrf.mxu0 }
 0x185   : > { %v734_v43 = vadd.f32 %v4265_v57, %v733_v7 }
 0x186   : > { %1384 = vmatmul.bf16.gmra.mxu2 %v3349_v2  ;;  %v1478_v8 = vpack.c.bf16 %v1415_v37, %v1414_v1 }
 0x187   : > { %v776_v10 = vmax.f32 %v734_v43, 0.0 }
 0x188   : > { %v4394_v3 = vpop.f32.mrf.mxu1  ;;  %1559 = vmatmul.bf16.gmra.mxu3 %v1478_v8 }
 0x189   : > { %v1345_v12 = vpop.f32.mrf.mxu2  ;;  %v872_v13 = vpack.c.bf16 %v776_v10, %v776_v10 }
 0x18a   : > { %v4408_v23 = vadd.f32 %v1345_v12, %v1257_v18  ;;  %v3643_v30 = vld [vmem:[#allocation2 + $0xc4] sm:$0xf] }
 0x18b   : > { %904 = vst [vmem:[#allocation2 + $0xcc] sm:$0xf] %v872_v13  ;;  %v3688_v13 = vld [vmem:[#allocation3 + $0x168] sm:$0xff] }
 0x18c   : > { %v736_v16 = vpop.f32.mrf.mxu0  ;;  %v1416_v34 = vmax.f32 %v4408_v23, 0.0  ;;  %1981 = vmatpush.bf16.msrb.mxu1 %v3688_v13 }
 0x18d   : > { %v737_v20 = vadd.f32 %v4265_v57, %v736_v16 }
 0x18f   : > { %v777_v24 = vmax.f32 %v737_v20, 0.0  ;;  %v1267_v20 = vadd.f32 %v4339_v51, %v4381_v45 }
 0x190   : > { %v4404_v21 = vpop.f32.mrf.mxu1 }
 0x191   : > { %v1347_v25 = vpop.f32.mrf.mxu2  ;;  %v873_v28 = vpack.c.bf16 %v777_v24, %v777_v24  ;;  %v1269_v24 = vadd.f32 %v4339_v51, %v4394_v3 }
 0x192   : > { %v4410_v29 = vadd.f32 %v1347_v25, %v1259_v22  ;;  %v3354_v33 = vld [vmem:[#allocation2 + $0xc8] sm:$0xf0] }
 0x193   : > { %1310 = vmatmul.bf16.gmra.mxu1 %v3369_v14  ;;  %905 = vst [vmem:[#allocation2 + $0xd4] sm:$0xf] %v873_v28  ;;  %v3357_v36 = vor.u32 %v3643_v30, %v3354_v33 }
 0x194   : > { %v1417_v53 = vmax.f32 %v4410_v29, 0.0  ;;  %v738_v38 = vpop.f32.mrf.mxu0 }
 0x195   : > { %v739_v26 = vadd.f32 %v4265_v57, %v738_v38 }
 0x196   : > { %1389 = vmatmul.bf16.gmra.mxu2 %v3357_v36  ;;  %v1479_v4 = vpack.c.bf16 %v1417_v53, %v1416_v34 }
 0x197   : > { %v778_v39 = vmax.f32 %v739_v26, 0.0 }
 0x198   : > { %1564 = vmatmul.bf16.gmra.mxu3 %v1479_v4  ;;  %v4419_v42 = vpop.f32.mrf.mxu1 }
 0x199   : > { %v1350_v44 = vpop.f32.mrf.mxu2  ;;  %v874_v60 = vpack.c.bf16 %v778_v39, %v778_v39 }
 0x19a   : > { %v4426_v54 = vadd.f32 %v1350_v44, %v1262_v49  ;;  %v3645_v7 = vld [vmem:[#allocation2 + $0xd4] sm:$0xf]  ;;  %v1272_v49 = vadd.f32 %v4339_v51, %v4404_v21 }
 0x19b   : > { %906 = vst [vmem:[#allocation2 + $0xdc] sm:$0xf] %v874_v60 }
 0x19c   : > { %v741_v48 = vpop.f32.mrf.mxu0  ;;  %v1418_v8 = vmax.f32 %v4426_v54, 0.0 }
 0x19d   : > { %v742_v50 = vadd.f32 %v4265_v57, %v741_v48  ;;  %v3675_v48 = vld [vmem:[#allocation3 + $0x100] sm:$0xff] }
 0x19e   : > { %1734 = vmatpush.bf16.msrb.mxu0 %v3675_v48 }
 0x19f   : > { %v779_v55 = vmax.f32 %v742_v50, 0.0 }
 0x1a0   : > { %v4430_v2 = vpop.f32.mrf.mxu1 }
 0x1a1   : > { %v1352_v56 = vpop.f32.mrf.mxu2  ;;  %v875_v61 = vpack.c.bf16 %v779_v55, %v779_v55 }
 0x1a2   : > { %v4428_v62 = vadd.f32 %v1352_v56, %v1264_v0  ;;  %v3362_v43 = vld [vmem:[#allocation2 + $0xd8] sm:$0xf0] }
 0x1a3   : > { %1315 = vmatmul.bf16.gmra.mxu1 %v3377_v46  ;;  %907 = vst [vmem:[#allocation2 + $0xe4] sm:$0xf] %v875_v61  ;;  %v3365_v10 = vor.u32 %v3645_v7, %v3362_v43 }
 0x1a4   : > { %v1419_v19 = vmax.f32 %v4428_v62, 0.0  ;;  %v743_v11 = vpop.f32.mrf.mxu0 }
 0x1a5   : > { %v744_v31 = vadd.f32 %v4265_v57, %v743_v11 }
 0x1a6   : > { %1394 = vmatmul.bf16.gmra.mxu2 %v3365_v10  ;;  %v1480_v5 = vpack.c.bf16 %v1419_v19, %v1418_v8 }
 0x1a7   : > { %v780_v12 = vmax.f32 %v744_v31, 0.0 }
 0x1a8   : > { %1569 = vmatmul.bf16.gmra.mxu3 %v1480_v5  ;;  %v1278_v16 = vpop.f32.mrf.mxu1 }
 0x1a9   : > { %v1355_v14 = vpop.f32.mrf.mxu2  ;;  %v876_v15 = vpack.c.bf16 %v780_v12, %v780_v12  ;;  %v1277_v12 = vadd.f32 %v4339_v51, %v4430_v2  ;;  %v1279_v13 = vadd.f32 %v4339_v51, %v1278_v16 }
 0x1aa   : > { %v4444_v25 = vadd.f32 %v1355_v14, %v1267_v20  ;;  %v3647_v38 = vld [vmem:[#allocation2 + $0xe4] sm:$0xf] }
 0x1ab   : > { %908 = vst [vmem:[#allocation2 + $0xec] sm:$0xf] %v876_v15 }
 0x1ac   : > { %v746_v18 = vpop.f32.mrf.mxu0  ;;  %v1420_v4 = vmax.f32 %v4444_v25, 0.0 }
 0x1ad   : > { %v747_v22 = vadd.f32 %v4265_v57, %v746_v18 }
 0x1af   : > { %v781_v28 = vmax.f32 %v747_v22, 0.0 }
 0x1b0   : > { %v1281_v44 = vpop.f32.mrf.mxu1 }
 0x1b1   : > { %v1357_v30 = vpop.f32.mrf.mxu2  ;;  %v877_v33 = vpack.c.bf16 %v781_v28, %v781_v28  ;;  %v1282_v2 = vadd.f32 %v4339_v51, %v1281_v44 }
 0x1b2   : > { %v4446_v36 = vadd.f32 %v1357_v30, %v1269_v24  ;;  %v3370_v26 = vld [vmem:[#allocation2 + $0xe8] sm:$0xf0] }
 0x1b3   : > { %909 = vst [vmem:[#allocation2 + $0xf4] sm:$0xf] %v877_v33  ;;  %v3373_v45 = vor.u32 %v3647_v38, %v3370_v26 }
 0x1b4   : > { %v1421_v39 = vmax.f32 %v4446_v36, 0.0  ;;  %v748_v40 = vpop.f32.mrf.mxu0 }
 0x1b5   : > { %v749_v41 = vadd.f32 %v4265_v57, %v748_v40  ;;  %v1274_v57 = vadd.f32 %v4339_v51, %v4419_v42  ;;  %v3687_v42 = vld [vmem:[#allocation3 + $0x160] sm:$0xff] }
 0x1b6   : > { %1399 = vmatmul.bf16.gmra.mxu2 %v3373_v45  ;;  %v1481_v3 = vpack.c.bf16 %v1421_v39, %v1420_v4  ;;  %1982 = vmatpush.bf16.msrb.mxu1 %v3687_v42 }
 0x1b7   : > { %v782_v60 = vmax.f32 %v749_v41, 0.0 }
 0x1b8   : > { %1574 = vmatmul.bf16.gmra.mxu3 %v1481_v3  ;;  %v1283_v0 = vpop.f32.mrf.mxu1 }
 0x1b9   : > { %v1360_v46 = vpop.f32.mrf.mxu2  ;;  %v878_v47 = vpack.c.bf16 %v782_v60, %v782_v60  ;;  %v1284_v33 = vadd.f32 %v4339_v51, %v1283_v0  ;;  %v3686_v60 = vld [vmem:[#allocation3 + $0x158] sm:$0xff] }
 0x1ba   : > { %v4459_v50 = vadd.f32 %v1360_v46, %v1272_v49  ;;  %v3649_v61 = vld [vmem:[#allocation2 + $0xf4] sm:$0xf]  ;;  %1983 = vmatpush.bf16.msrb.mxu1 %v3686_v60  ;;  %v4495_v49 = vld [vmem:[#allocation6 + $0x4] ss:$0 sm:$0xff] }
 0x1bb   : > { %910 = vst [vmem:[#allocation2 + $0xfc] sm:$0xf] %v878_v47 }
 0x1bc   : > { %v1422_v43 = vmax.f32 %v4459_v50, 0.0 }
 0x1c0   : > { %v1286_v5 = vpop.f32.mrf.mxu1 }
 0x1c1   : > { %v1362_v55 = vpop.f32.mrf.mxu2  ;;  %v1287_v48 = vadd.f32 %v4339_v51, %v1286_v5 }
 0x1c2   : > { %v4461_v56 = vadd.f32 %v1362_v55, %v1274_v57  ;;  %v3378_v7 = vld [vmem:[#allocation2 + $0xf8] sm:$0xf0] }
 0x1c3   : > { %v3381_v11 = vor.u32 %v3649_v61, %v3378_v7 }
 0x1c4   : > { %v1423_v10 = vmax.f32 %v4461_v56, 0.0 }
 0x1c6   : > { %1404 = vmatmul.bf16.gmra.mxu2 %v3381_v11  ;;  %v1482_v21 = vpack.c.bf16 %v1423_v10, %v1422_v43 }
 0x1c8   : > { %1579 = vmatmul.bf16.gmra.mxu3 %v1482_v21  ;;  %v1288_v24 = vpop.f32.mrf.mxu1 }
 0x1c9   : > { %v1365_v31 = vpop.f32.mrf.mxu2  ;;  %v1289_v57 = vadd.f32 %v4339_v51, %v1288_v24  ;;  %v3698_v24 = vld [vmem:[#allocation3 + $0x1b8] sm:$0xff] }
 0x1ca   : > { %v4472_v14 = vadd.f32 %v1365_v31, %v1277_v12  ;;  %2165 = vmatpush.bf16.msrb.mxu2 %v3698_v24 }
 0x1cc   : > { %v5346_v20 = vmax.f32 %v4472_v14, 0.0 }
 0x1d0   : > { %v1291_v16 = vpop.f32.mrf.mxu1 }
 0x1d1   : > { %v1367_v15 = vpop.f32.mrf.mxu2 }
 0x1d2   : > { %v4474_v18 = vadd.f32 %v1367_v15, %v1279_v13 }
 0x1d4   : > { %v5343_v22 = vmax.f32 %v4474_v18, 0.0 }
 0x1d6   : > { %v1483_v28 = vpack.c.bf16 %v5343_v22, %v5346_v20 }
 0x1d8   : > { %1584 = vmatmul.bf16.gmra.mxu3 %v1483_v28  ;;  %v1293_v44 = vpop.f32.mrf.mxu1 }
 0x1d9   : > { %v1370_v30 = vpop.f32.mrf.mxu2 }
 0x1da   : > { %v4484_v38 = vadd.f32 %v1370_v30, %v1282_v2 }
 0x1dc   : > { %v5342_v40 = vmax.f32 %v4484_v38, 0.0 }
 0x1e0   : > { %v1296_v11 = vpop.f32.mrf.mxu1 }
 0x1e1   : > { %v1372_v26 = vpop.f32.mrf.mxu2 }
 0x1e2   : > { %v4486_v45 = vadd.f32 %v1372_v26, %v1284_v33  ;;  %v1292_v26 = vadd.f32 %v4339_v51, %v1291_v16 }
 0x1e4   : > { %v5339_v41 = vmax.f32 %v4486_v45, 0.0 }
 0x1e6   : > { %v1484_v3 = vpack.c.bf16 %v5339_v41, %v5342_v40 }
 0x1e8   : > { %1589 = vmatmul.bf16.gmra.mxu3 %v1484_v3  ;;  %v1298_v33 = vpop.f32.mrf.mxu1  ;;  %v1294_v3 = vadd.f32 %v4339_v51, %v1293_v44 }
 0x1e9   : > { %v1375_v46 = vpop.f32.mrf.mxu2 }
 0x1ea   : > { %v1550_v47 = vpop.f32.mrf.mxu3  ;;  %v4498_v0 = vadd.f32 %v1375_v46, %v1287_v48 }
 0x1eb   : > { %v1551_v61 = vadd.f32 %v4495_v49, %v1550_v47 }
 0x1ec   : > { %v5336_v42 = vmax.f32 %v4498_v0, 0.0 }
 0x1ed   : > { %v1630_v5 = vmax.f32 %v1551_v61, 0.0 }
 0x1f0   : > { %v1301_v44 = vpop.f32.mrf.mxu1 }
 0x1f1   : > { %v1377_v55 = vpop.f32.mrf.mxu2 }
 0x1f2   : > { %v4501_v7 = vadd.f32 %v1377_v55, %v1289_v57  ;;  %v1552_v21 = vpop.f32.mrf.mxu3 }
 0x1f3   : > { %v1553_v12 = vadd.f32 %v4495_v49, %v1552_v21 }
 0x1f4   : > { %v5335_v31 = vmax.f32 %v4501_v7, 0.0 }
 0x1f5   : > { %v1631_v13 = vmax.f32 %v1553_v12, 0.0 }
 0x1f6   : > { %v1485_v15 = vpack.c.bf16 %v5335_v31, %v5336_v42 }
 0x1f7   : > { %v1662_v28 = vpack.c.bf16 %v1631_v13, %v1630_v5 }
 0x1f8   : > { %1594 = vmatmul.bf16.gmra.mxu3 %v1485_v15  ;;  %v3685_v15 = vld [vmem:[#allocation3 + $0x150] sm:$0xff] }
 0x1f9   : > { %v1380_v30 = vpop.f32.mrf.mxu2  ;;  %1735 = vmatmul.bf16.vlgmr.msrb.gmra.mxu0 %v1662_v28  ;;  %1984 = vmatpush.bf16.msrb.mxu1 %v3685_v15 }
 0x1fa   : > { %v1555_v2 = vpop.f32.mrf.mxu3  ;;  %v4512_v60 = vadd.f32 %v1380_v30, %v1292_v26  ;;  %v1297_v30 = vadd.f32 %v4339_v51, %v1296_v11 }
 0x1fb   : > { %v1556_v47 = vadd.f32 %v4495_v49, %v1555_v2  ;;  %v1299_v2 = vadd.f32 %v4339_v51, %v1298_v33  ;;  %v3697_v33 = vld [vmem:[#allocation3 + $0x1b0] sm:$0xff] }
 0x1fc   : > { %v5332_v55 = vmax.f32 %v4512_v60, 0.0  ;;  %2166 = vmatpush.bf16.msrb.mxu2 %v3697_v33 }
 0x1fd   : > { %v1632_v12 = vmax.f32 %v1556_v47, 0.0 }
 0x201   : > { %v1382_v46 = vpop.f32.mrf.mxu2 }
 0x202   : > { %v4515_v48 = vadd.f32 %v1382_v46, %v1294_v3  ;;  %v1557_v57 = vpop.f32.mrf.mxu3  ;;  %v1303_v3 = vpop.f32.mrf.mxu1 }
 0x203   : > { %v1558_v21 = vadd.f32 %v4495_v49, %v1557_v57 }
 0x204   : > { %v5331_v61 = vmax.f32 %v4515_v48, 0.0 }
 0x205   : > { %v1633_v5 = vmax.f32 %v1558_v21, 0.0 }
 0x206   : > { %v1486_v16 = vpack.c.bf16 %v5331_v61, %v5332_v55  ;;  %v1304_v61 = vadd.f32 %v4339_v51, %v1303_v3 }
 0x207   : > { %v1663_v13 = vpack.c.bf16 %v1633_v5, %v1632_v12 }
 0x208   : > { %1599 = vmatmul.bf16.gmra.mxu3 %v1486_v16 }
 0x209   : > { %v1385_v24 = vpop.f32.mrf.mxu2  ;;  %1740 = vmatmul.bf16.gmra.mxu0 %v1663_v13 }
 0x20a   : > { %v4526_v26 = vadd.f32 %v1385_v24, %v1297_v30  ;;  %v1306_v30 = vpop.f32.mrf.mxu1 }
 0x20b   : > { %v1560_v28 = vpop.f32.mrf.mxu3 }
 0x20c   : > { %v1561_v47 = vadd.f32 %v4495_v49, %v1560_v28  ;;  %v5334_v12 = vmax.f32 %v4526_v26, 0.0 }
 0x20e   : > { %v1634_v13 = vmax.f32 %v1561_v47, 0.0 }
 0x211   : > { %v1387_v46 = vpop.f32.mrf.mxu2 }
 0x212   : > { %v4529_v57 = vadd.f32 %v1387_v46, %v1299_v2  ;;  %v1302_v46 = vadd.f32 %v4339_v51, %v1301_v44  ;;  %v1308_v33 = vpop.f32.mrf.mxu1 }
 0x213   : > { %v1562_v21 = vpop.f32.mrf.mxu3 }
 0x214   : > { %v5333_v5 = vmax.f32 %v4529_v57, 0.0  ;;  %v1563_v16 = vadd.f32 %v4495_v49, %v1562_v21 }
 0x216   : > { %v1635_v15 = vmax.f32 %v1563_v16, 0.0  ;;  %v1487_v11 = vpack.c.bf16 %v5333_v5, %v5334_v12 }
 0x218   : > { %1604 = vmatmul.bf16.gmra.mxu3 %v1487_v11  ;;  %v1664_v24 = vpack.c.bf16 %v1635_v15, %v1634_v13 }
 0x219   : > { %v1390_v28 = vpop.f32.mrf.mxu2 }
 0x21a   : > { %1745 = vmatmul.bf16.gmra.mxu0 %v1664_v24  ;;  %v4540_v21 = vadd.f32 %v1390_v28, %v1302_v46  ;;  %v3684_v28 = vld [vmem:[#allocation3 + $0x148] sm:$0xff]  ;;  %v1307_v46 = vadd.f32 %v4339_v51, %v1306_v30 }
 0x21b   : > { %v1565_v2 = vpop.f32.mrf.mxu3  ;;  %1985 = vmatpush.bf16.msrb.mxu1 %v3684_v28 }
 0x21c   : > { %v1566_v16 = vadd.f32 %v4495_v49, %v1565_v2  ;;  %v5338_v11 = vmax.f32 %v4540_v21, 0.0 }
 0x21e   : > { %v1636_v24 = vmax.f32 %v1566_v16, 0.0 }
 0x221   : > { %v1392_v47 = vpop.f32.mrf.mxu2 }
 0x222   : > { %v4543_v55 = vadd.f32 %v1392_v47, %v1304_v61  ;;  %v1311_v47 = vpop.f32.mrf.mxu1 }
 0x223   : > { %v1567_v5 = vpop.f32.mrf.mxu3 }
 0x224   : > { %v5337_v13 = vmax.f32 %v4543_v55, 0.0  ;;  %v1568_v15 = vadd.f32 %v4495_v49, %v1567_v5  ;;  %v1309_v5 = vadd.f32 %v4339_v51, %v1308_v33  ;;  %v3696_v33 = vld [vmem:[#allocation3 + $0x1a8] sm:$0xff] }
 0x225   : > { %2167 = vmatpush.bf16.msrb.mxu2 %v3696_v33 }
 0x226   : > { %v1637_v12 = vmax.f32 %v1568_v15, 0.0  ;;  %v1488_v44 = vpack.c.bf16 %v5337_v13, %v5338_v11 }
 0x228   : > { %1609 = vmatmul.bf16.gmra.mxu3 %v1488_v44  ;;  %v1665_v3 = vpack.c.bf16 %v1637_v12, %v1636_v24 }
 0x229   : > { %v1395_v61 = vpop.f32.mrf.mxu2 }
 0x22a   : > { %1750 = vmatmul.bf16.gmra.mxu0 %v1665_v3  ;;  %v4554_v31 = vadd.f32 %v1395_v61, %v1307_v46 }
 0x22b   : > { %v1570_v2 = vpop.f32.mrf.mxu3 }
 0x22c   : > { %v1571_v15 = vadd.f32 %v4495_v49, %v1570_v2  ;;  %v5341_v12 = vmax.f32 %v4554_v31, 0.0  ;;  %v1313_v2 = vpop.f32.mrf.mxu1 }
 0x22d   : > { %v1314_v11 = vadd.f32 %v4339_v51, %v1313_v2  ;;  %v3683_v2 = vld [vmem:[#allocation3 + $0x140] sm:$0xff] }
 0x22e   : > { %v1638_v3 = vmax.f32 %v1571_v15, 0.0  ;;  %1986 = vmatpush.bf16.msrb.mxu1 %v3683_v2 }
 0x231   : > { %v1397_v16 = vpop.f32.mrf.mxu2 }
 0x232   : > { %v4557_v42 = vadd.f32 %v1397_v16, %v1309_v5  ;;  %v1312_v16 = vadd.f32 %v4339_v51, %v1311_v47 }
 0x233   : > { %v1572_v13 = vpop.f32.mrf.mxu3 }
 0x234   : > { %v5340_v24 = vmax.f32 %v4557_v42, 0.0  ;;  %v1573_v44 = vadd.f32 %v4495_v49, %v1572_v13 }
 0x236   : > { %v1639_v28 = vmax.f32 %v1573_v44, 0.0  ;;  %v1489_v30 = vpack.c.bf16 %v5340_v24, %v5341_v12  ;;  %v1316_v24 = vpop.f32.mrf.mxu1 }
 0x238   : > { %1614 = vmatmul.bf16.gmra.mxu3 %v1489_v30  ;;  %v1666_v61 = vpack.c.bf16 %v1639_v28, %v1638_v3 }
 0x239   : > { %v1400_v46 = vpop.f32.mrf.mxu2 }
 0x23a   : > { %1755 = vmatmul.bf16.gmra.mxu0 %v1666_v61  ;;  %v4568_v13 = vadd.f32 %v1400_v46, %v1312_v16 }
 0x23b   : > { %v1575_v5 = vpop.f32.mrf.mxu3 }
 0x23c   : > { %v1576_v44 = vadd.f32 %v4495_v49, %v1575_v5  ;;  %v5345_v3 = vmax.f32 %v4568_v13, 0.0 }
 0x23e   : > { %v1640_v33 = vmax.f32 %v1576_v44, 0.0  ;;  %v1318_v16 = vpop.f32.mrf.mxu1 }
 0x23f   : > { %v1319_v40 = vadd.f32 %v4339_v51, %v1318_v16 }
 0x241   : > { %v1402_v15 = vpop.f32.mrf.mxu2 }
 0x242   : > { %v4571_v41 = vadd.f32 %v1402_v15, %v1314_v11  ;;  %v1317_v15 = vadd.f32 %v4339_v51, %v1316_v24  ;;  %v3695_v24 = vld [vmem:[#allocation3 + $0x1a0] sm:$0xff] }
 0x243   : > { %v1577_v12 = vpop.f32.mrf.mxu3  ;;  %2168 = vmatpush.bf16.msrb.mxu2 %v3695_v24 }
 0x244   : > { %v5344_v28 = vmax.f32 %v4571_v41, 0.0  ;;  %v1578_v30 = vadd.f32 %v4495_v49, %v1577_v12 }
 0x246   : > { %v1641_v61 = vmax.f32 %v1578_v30, 0.0  ;;  %v1490_v47 = vpack.c.bf16 %v5344_v28, %v5345_v3 }
 0x248   : > { %1619 = vmatmul.bf16.gmra.mxu3 %v1490_v47  ;;  %v1667_v46 = vpack.c.bf16 %v1641_v61, %v1640_v33 }
 0x249   : > { %v1405_v11 = vpop.f32.mrf.mxu2 }
 0x24a   : > { %1760 = vmatmul.bf16.gmra.mxu0 %v1667_v46  ;;  %v4582_v12 = vadd.f32 %v1405_v11, %v1317_v15 }
 0x24b   : > { %v1580_v5 = vpop.f32.mrf.mxu3 }
 0x24c   : > { %v1581_v30 = vadd.f32 %v4495_v49, %v1580_v5  ;;  %v1440_v47 = vmax.f32 %v4582_v12, 0.0 }
 0x24e   : > { %v1642_v2 = vmax.f32 %v1581_v30, 0.0 }
 0x251   : > { %v1407_v44 = vpop.f32.mrf.mxu2 }
 0x252   : > { %v4585_v22 = vadd.f32 %v1407_v44, %v1319_v40 }
 0x253   : > { %v1582_v28 = vpop.f32.mrf.mxu3 }
 0x254   : > { %v5347_v33 = vmax.f32 %v4585_v22, 0.0  ;;  %v1583_v61 = vadd.f32 %v4495_v49, %v1582_v28 }
 0x256   : > { %v1643_v46 = vmax.f32 %v1583_v61, 0.0  ;;  %v1491_v51 = vpack.c.bf16 %v5347_v33, %v1440_v47 }
 0x258   : > { %1624 = vmatmul.bf16.gmra.mxu3 %v1491_v51  ;;  %v1668_v11 = vpack.c.bf16 %v1643_v46, %v1642_v2  ;;  %v3694_v46 = vld [vmem:[#allocation3 + $0x198] sm:$0xff] }
 0x259   : > { %2169 = vmatpush.bf16.msrb.mxu2 %v3694_v46 }
 0x25a   : > { %1765 = vmatmul.bf16.gmra.mxu0 %v1668_v11  ;;  %v4598_v11 = vld [vmem:[#allocation6 + $0x5] ss:$0 sm:$0xff] }
 0x25b   : > { %v1585_v40 = vpop.f32.mrf.mxu3 }
 0x25c   : > { %v1586_v5 = vadd.f32 %v4495_v49, %v1585_v40 }
 0x25e   : > { %v1644_v44 = vmax.f32 %v1586_v5, 0.0 }
 0x263   : > { %v1587_v16 = vpop.f32.mrf.mxu3 }
 0x264   : > { %v1588_v15 = vadd.f32 %v4495_v49, %v1587_v16 }
 0x266   : > { %v1645_v28 = vmax.f32 %v1588_v15, 0.0 }
 0x268   : > { %v1669_v30 = vpack.c.bf16 %v1645_v28, %v1644_v44 }
 0x26a   : > { %1770 = vmatmul.bf16.gmra.mxu0 %v1669_v30 }
 0x26b   : > { %v1590_v61 = vpop.f32.mrf.mxu3 }
 0x26c   : > { %v1591_v3 = vadd.f32 %v4495_v49, %v1590_v61 }
 0x26e   : > { %v1646_v51 = vmax.f32 %v1591_v3, 0.0 }
 0x273   : > { %v1592_v20 = vpop.f32.mrf.mxu3 }
 0x274   : > { %v1593_v33 = vadd.f32 %v4495_v49, %v1592_v20 }
 0x276   : > { %v1647_v2 = vmax.f32 %v1593_v33, 0.0  ;;  %v1736_v24 = vpop.f32.mrf.mxu0 }
 0x277   : > { %v1737_v5 = vadd.f32 %v4598_v11, %v1736_v24 }
 0x278   : > { %v1670_v40 = vpack.c.bf16 %v1647_v2, %v1646_v51 }
 0x279   : > { %v4603_v44 = vadd.f32 %v1737_v5, %v1410_v9 }
 0x27a   : > { %1775 = vmatmul.bf16.gmra.mxu0 %v1670_v40  ;;  %v3706_v40 = vld [vmem:[#allocation3 + $0x1f8] sm:$0xff] }
 0x27b   : > { %v1595_v16 = vpop.f32.mrf.mxu3  ;;  %v1848_v30 = vmax.f32 %v4603_v44, 0.0  ;;  %2400 = vmatpush.bf16.msrb.mxu3 %v3706_v40 }
 0x27c   : > { %v1596_v20 = vadd.f32 %v4495_v49, %v1595_v16 }
 0x27e   : > { %v1738_v15 = vpop.f32.mrf.mxu0  ;;  %v1648_v2 = vmax.f32 %v1596_v20, 0.0 }
 0x27f   : > { %v1739_v28 = vadd.f32 %v4598_v11, %v1738_v15 }
 0x281   : > { %v4609_v3 = vadd.f32 %v1739_v28, %v1411_v58 }
 0x283   : > { %v1597_v33 = vpop.f32.mrf.mxu3  ;;  %v1849_v61 = vmax.f32 %v4609_v3, 0.0 }
 0x284   : > { %v1598_v51 = vadd.f32 %v4495_v49, %v1597_v33 }
 0x285   : > { %v1914_v63 = vpack.c.bf16 %v1849_v61, %v1848_v30 }
 0x286   : > { %v1649_v9 = vmax.f32 %v1598_v51, 0.0  ;;  %v1741_v46 = vpop.f32.mrf.mxu0 }
 0x287   : > { %1987 = vmatmul.bf16.vlgmr.msrb.gmra.mxu1 %v1914_v63  ;;  %v1742_v58 = vadd.f32 %v4598_v11, %v1741_v46 }
 0x288   : > { %v1671_v24 = vpack.c.bf16 %v1649_v9, %v1648_v2 }
 0x289   : > { %v4621_v5 = vadd.f32 %v1742_v58, %v1412_v35  ;;  %v3693_v35 = vld [vmem:[#allocation3 + $0x190] sm:$0xff] }
 0x28a   : > { %1780 = vmatmul.bf16.gmra.mxu0 %v1671_v24  ;;  %2170 = vmatpush.bf16.msrb.mxu2 %v3693_v35 }
 0x28b   : > { %v1600_v6 = vpop.f32.mrf.mxu3  ;;  %v1850_v51 = vmax.f32 %v4621_v5, 0.0 }
 0x28c   : > { %v1601_v28 = vadd.f32 %v4495_v49, %v1600_v6 }
 0x28e   : > { %v1743_v16 = vpop.f32.mrf.mxu0  ;;  %v1650_v9 = vmax.f32 %v1601_v28, 0.0 }
 0x28f   : > { %v1744_v15 = vadd.f32 %v4598_v11, %v1743_v16 }
 0x291   : > { %v4627_v20 = vadd.f32 %v1744_v15, %v1413_v17 }
 0x293   : > { %v1602_v33 = vpop.f32.mrf.mxu3  ;;  %v1851_v2 = vmax.f32 %v4627_v20, 0.0 }
 0x294   : > { %v1603_v63 = vadd.f32 %v4495_v49, %v1602_v33 }
 0x295   : > { %v1915_v27 = vpack.c.bf16 %v1851_v2, %v1850_v51 }
 0x296   : > { %v1651_v46 = vmax.f32 %v1603_v63, 0.0 }
 0x297   : > { %v1746_v24 = vpop.f32.mrf.mxu0  ;;  %1992 = vmatmul.bf16.gmra.mxu1 %v1915_v27 }
 0x298   : > { %v1672_v32 = vpack.c.bf16 %v1651_v46, %v1650_v9  ;;  %v1747_v6 = vadd.f32 %v4598_v11, %v1746_v24 }
 0x29a   : > { %1785 = vmatmul.bf16.gmra.mxu0 %v1672_v32  ;;  %v4639_v40 = vadd.f32 %v1747_v6, %v1414_v1  ;;  %v3705_v32 = vld [vmem:[#allocation3 + $0x1f0] sm:$0xff] }
 0x29b   : > { %v1605_v17 = vpop.f32.mrf.mxu3  ;;  %2401 = vmatpush.bf16.msrb.mxu3 %v3705_v32 }
 0x29c   : > { %v1606_v15 = vadd.f32 %v4495_v49, %v1605_v17  ;;  %v1852_v63 = vmax.f32 %v4639_v40, 0.0 }
 0x29e   : > { %v1652_v27 = vmax.f32 %v1606_v15, 0.0 }
 0x29f   : > { %v1748_v58 = vpop.f32.mrf.mxu0 }
 0x2a0   : > { %v1749_v16 = vadd.f32 %v4598_v11, %v1748_v58 }
 0x2a2   : > { %v4645_v28 = vadd.f32 %v1749_v16, %v1415_v37 }
 0x2a3   : > { %v1607_v33 = vpop.f32.mrf.mxu3 }
 0x2a4   : > { %v1853_v9 = vmax.f32 %v4645_v28, 0.0  ;;  %v1608_v46 = vadd.f32 %v4495_v49, %v1607_v33 }
 0x2a6   : > { %v1653_v35 = vmax.f32 %v1608_v46, 0.0  ;;  %v1916_v52 = vpack.c.bf16 %v1853_v9, %v1852_v63 }
 0x2a7   : > { %v1751_v1 = vpop.f32.mrf.mxu0 }
 0x2a8   : > { %1997 = vmatmul.bf16.gmra.mxu1 %v1916_v52  ;;  %v1673_v24 = vpack.c.bf16 %v1653_v35, %v1652_v27  ;;  %v1752_v37 = vadd.f32 %v4598_v11, %v1751_v1 }
 0x2aa   : > { %1790 = vmatmul.bf16.gmra.mxu0 %v1673_v24  ;;  %v4657_v6 = vadd.f32 %v1752_v37, %v1416_v34  ;;  %v3692_v34 = vld [vmem:[#allocation3 + $0x188] sm:$0xff] }
 0x2ab   : > { %v1610_v59 = vpop.f32.mrf.mxu3  ;;  %2171 = vmatpush.bf16.msrb.mxu2 %v3692_v34 }
 0x2ac   : > { %v1611_v16 = vadd.f32 %v4495_v49, %v1610_v59  ;;  %v1854_v46 = vmax.f32 %v4657_v6, 0.0 }
 0x2ae   : > { %v1654_v52 = vmax.f32 %v1611_v16, 0.0 }
 0x2af   : > { %v1753_v17 = vpop.f32.mrf.mxu0 }
 0x2b0   : > { %v1754_v58 = vadd.f32 %v4598_v11, %v1753_v17 }
 0x2b2   : > { %v4663_v15 = vadd.f32 %v1754_v58, %v1417_v53 }
 0x2b3   : > { %v1612_v33 = vpop.f32.mrf.mxu3 }
 0x2b4   : > { %v1855_v27 = vmax.f32 %v4663_v15, 0.0  ;;  %v1613_v35 = vadd.f32 %v4495_v49, %v1612_v33 }
 0x2b6   : > { %v1655_v1 = vmax.f32 %v1613_v35, 0.0  ;;  %v1917_v23 = vpack.c.bf16 %v1855_v27, %v1854_v46 }
 0x2b7   : > { %v1756_v24 = vpop.f32.mrf.mxu0 }
 0x2b8   : > { %2002 = vmatmul.bf16.gmra.mxu1 %v1917_v23  ;;  %v1674_v29 = vpack.c.bf16 %v1655_v1, %v1654_v52  ;;  %v1757_v59 = vadd.f32 %v4598_v11, %v1756_v24 }
 0x2ba   : > { %1795 = vmatmul.bf16.gmra.mxu0 %v1674_v29  ;;  %v4675_v32 = vadd.f32 %v1757_v59, %v1418_v8  ;;  %v3704_v29 = vld [vmem:[#allocation3 + $0x1e8] sm:$0xff] }
 0x2bb   : > { %v1615_v53 = vpop.f32.mrf.mxu3  ;;  %2402 = vmatpush.bf16.msrb.mxu3 %v3704_v29 }
 0x2bc   : > { %v1616_v58 = vadd.f32 %v4495_v49, %v1615_v53  ;;  %v1856_v35 = vmax.f32 %v4675_v32, 0.0 }
 0x2be   : > { %v1656_v23 = vmax.f32 %v1616_v58, 0.0 }
 0x2bf   : > { %v1758_v37 = vpop.f32.mrf.mxu0 }
 0x2c0   : > { %v1759_v17 = vadd.f32 %v4598_v11, %v1758_v37 }
 0x2c2   : > { %v4681_v16 = vadd.f32 %v1759_v17, %v1419_v19 }
 0x2c3   : > { %v1617_v33 = vpop.f32.mrf.mxu3 }
 0x2c4   : > { %v1857_v52 = vmax.f32 %v4681_v16, 0.0  ;;  %v1618_v1 = vadd.f32 %v4495_v49, %v1617_v33 }
 0x2c6   : > { %v1657_v34 = vmax.f32 %v1618_v1, 0.0  ;;  %v1918_v54 = vpack.c.bf16 %v1857_v52, %v1856_v35 }
 0x2c7   : > { %v1761_v8 = vpop.f32.mrf.mxu0 }
 0x2c8   : > { %2007 = vmatmul.bf16.gmra.mxu1 %v1918_v54  ;;  %v1675_v24 = vpack.c.bf16 %v1657_v34, %v1656_v23  ;;  %v1762_v19 = vadd.f32 %v4598_v11, %v1761_v8  ;;  %v3691_v54 = vld [vmem:[#allocation3 + $0x180] sm:$0xff] }
 0x2c9   : > { %2172 = vmatpush.bf16.msrb.mxu2 %v3691_v54 }
 0x2ca   : > { %1800 = vmatmul.bf16.gmra.mxu0 %v1675_v24  ;;  %v4693_v59 = vadd.f32 %v1762_v19, %v1420_v4 }
 0x2cb   : > { %v1620_v62 = vpop.f32.mrf.mxu3 }
 0x2cc   : > { %v1621_v17 = vadd.f32 %v4495_v49, %v1620_v62  ;;  %v1858_v1 = vmax.f32 %v4693_v59, 0.0 }
 0x2ce   : > { %v1658_v8 = vmax.f32 %v1621_v17, 0.0 }
 0x2cf   : > { %v1763_v53 = vpop.f32.mrf.mxu0 }
 0x2d0   : > { %v1764_v37 = vadd.f32 %v4598_v11, %v1763_v53 }
 0x2d2   : > { %v4699_v58 = vadd.f32 %v1764_v37, %v1421_v39 }
 0x2d3   : > { %v1622_v33 = vpop.f32.mrf.mxu3 }
 0x2d4   : > { %v1859_v23 = vmax.f32 %v4699_v58, 0.0  ;;  %v1623_v34 = vadd.f32 %v4495_v49, %v1622_v33 }
 0x2d6   : > { %v1659_v25 = vmax.f32 %v1623_v34, 0.0  ;;  %v1919_v4 = vpack.c.bf16 %v1859_v23, %v1858_v1 }
 0x2d7   : > { %v1766_v24 = vpop.f32.mrf.mxu0 }
 0x2d8   : > { %2012 = vmatmul.bf16.gmra.mxu1 %v1919_v4  ;;  %v1676_v36 = vpack.c.bf16 %v1659_v25, %v1658_v8  ;;  %v1767_v62 = vadd.f32 %v4598_v11, %v1766_v24 }
 0x2da   : > { %1805 = vmatmul.bf16.gmra.mxu0 %v1676_v36  ;;  %v4711_v29 = vadd.f32 %v1767_v62, %v1422_v43 }
 0x2db   : > { %v1625_v39 = vpop.f32.mrf.mxu3 }
 0x2dc   : > { %v1626_v37 = vadd.f32 %v4495_v49, %v1625_v39  ;;  %v1860_v34 = vmax.f32 %v4711_v29, 0.0  ;;  %v5369_v39 = vmax.f32 %v4472_v14, 0.0 }
 0x2de   : > { %v1660_v25 = vmax.f32 %v1626_v37, 0.0 }
 0x2df   : > { %v1768_v19 = vpop.f32.mrf.mxu0 }
 0x2e0   : > { %v1769_v53 = vadd.f32 %v4598_v11, %v1768_v19  ;;  %v5370_v19 = vmax.f32 %v4474_v18, 0.0 }
 0x2e2   : > { %v4717_v17 = vadd.f32 %v1769_v53, %v1423_v10  ;;  %v3703_v10 = vld [vmem:[#allocation3 + $0x1e0] sm:$0xff] }
 0x2e3   : > { %v1627_v33 = vpop.f32.mrf.mxu3  ;;  %2403 = vmatpush.bf16.msrb.mxu3 %v3703_v10 }
 0x2e4   : > { %v5352_v54 = vmax.f32 %v4717_v17, 0.0  ;;  %v1628_v8 = vadd.f32 %v4495_v49, %v1627_v33 }
 0x2e6   : > { %v1661_v4 = vmax.f32 %v1628_v8, 0.0  ;;  %v1920_v50 = vpack.c.bf16 %v5352_v54, %v1860_v34 }
 0x2e7   : > { %v1771_v43 = vpop.f32.mrf.mxu0 }
 0x2e8   : > { %2017 = vmatmul.bf16.gmra.mxu1 %v1920_v50  ;;  %v1677_v24 = vpack.c.bf16 %v1661_v4, %v1660_v25  ;;  %v1772_v56 = vadd.f32 %v4598_v11, %v1771_v43  ;;  %v5371_v50 = vmax.f32 %v4484_v38, 0.0  ;;  %v4758_v38 = vld [vmem:[#allocation6 + $0x6] ss:$0 sm:$0xff] }
 0x2ea   : > { %1810 = vmatmul.bf16.gmra.mxu0 %v1677_v24  ;;  %v4729_v62 = vadd.f32 %v1772_v56, %v5369_v39  ;;  %v5372_v24 = vmax.f32 %v4486_v45, 0.0 }
 0x2ec   : > { %v5351_v37 = vmax.f32 %v4729_v62, 0.0 }
 0x2ef   : > { %v1773_v36 = vpop.f32.mrf.mxu0 }
 0x2f0   : > { %v1774_v49 = vadd.f32 %v4598_v11, %v1773_v36 }
 0x2f2   : > { %v4734_v53 = vadd.f32 %v1774_v49, %v5370_v19 }
 0x2f4   : > { %v5348_v33 = vmax.f32 %v4734_v53, 0.0 }
 0x2f6   : > { %v1921_v8 = vpack.c.bf16 %v5348_v33, %v5351_v37 }
 0x2f7   : > { %v1776_v25 = vpop.f32.mrf.mxu0 }
 0x2f8   : > { %2022 = vmatmul.bf16.gmra.mxu1 %v1921_v8  ;;  %v1777_v14 = vadd.f32 %v4598_v11, %v1776_v25  ;;  %v3702_v25 = vld [vmem:[#allocation3 + $0x1d8] sm:$0xff] }
 0x2f9   : > { %2404 = vmatpush.bf16.msrb.mxu3 %v3702_v25 }
 0x2fa   : > { %v4745_v43 = vadd.f32 %v1777_v14, %v5371_v50 }
 0x2fc   : > { %v5350_v10 = vmax.f32 %v4745_v43, 0.0 }
 0x2ff   : > { %v1778_v4 = vpop.f32.mrf.mxu0 }
 0x300   : > { %v1779_v18 = vadd.f32 %v4598_v11, %v1778_v4 }
 0x302   : > { %v4750_v56 = vadd.f32 %v1779_v18, %v5372_v24  ;;  %v5373_v24 = vmax.f32 %v4498_v0, 0.0 }
 0x304   : > { %v5349_v36 = vmax.f32 %v4750_v56, 0.0  ;;  %v1988_v39 = vpop.f32.mrf.mxu1 }
 0x305   : > { %v1989_v8 = vadd.f32 %v4758_v38, %v1988_v39 }
 0x306   : > { %v1922_v49 = vpack.c.bf16 %v5349_v36, %v5350_v10 }
 0x307   : > { %v1781_v19 = vpop.f32.mrf.mxu0  ;;  %v2068_v18 = vmax.f32 %v1989_v8, 0.0 }
 0x308   : > { %2027 = vmatmul.bf16.gmra.mxu1 %v1922_v49  ;;  %v1782_v45 = vadd.f32 %v4598_v11, %v1781_v19  ;;  %v5374_v49 = vmax.f32 %v4501_v7, 0.0 }
 0x30a   : > { %v4765_v33 = vadd.f32 %v1782_v45, %v5373_v24 }
 0x30c   : > { %v1990_v14 = vpop.f32.mrf.mxu1  ;;  %v5356_v19 = vmax.f32 %v4765_v33, 0.0 }
 0x30d   : > { %v1991_v4 = vadd.f32 %v4758_v38, %v1990_v14 }
 0x30f   : > { %v1783_v50 = vpop.f32.mrf.mxu0  ;;  %v2069_v36 = vmax.f32 %v1991_v4, 0.0 }
 0x310   : > { %v1784_v10 = vadd.f32 %v4598_v11, %v1783_v50  ;;  %v5375_v50 = vmax.f32 %v4512_v60, 0.0 }
 0x311   : > { %v2100_v37 = vpack.c.bf16 %v2069_v36, %v2068_v18 }
 0x312   : > { %v4770_v39 = vadd.f32 %v1784_v10, %v5374_v49  ;;  %v5376_v49 = vmax.f32 %v4515_v48, 0.0 }
 0x313   : > { %2173 = vmatmul.bf16.vlgmr.msrb.gmra.mxu2 %v2100_v37 }
 0x314   : > { %v5353_v54 = vmax.f32 %v4770_v39, 0.0  ;;  %v1993_v25 = vpop.f32.mrf.mxu1 }
 0x315   : > { %v1994_v45 = vadd.f32 %v4758_v38, %v1993_v25 }
 0x316   : > { %v1923_v0 = vpack.c.bf16 %v5353_v54, %v5356_v19 }
 0x317   : > { %v1786_v8 = vpop.f32.mrf.mxu0  ;;  %v2070_v4 = vmax.f32 %v1994_v45, 0.0 }
 0x318   : > { %2032 = vmatmul.bf16.gmra.mxu1 %v1923_v0  ;;  %v1787_v36 = vadd.f32 %v4598_v11, %v1786_v8 }
 0x31a   : > { %v4783_v37 = vadd.f32 %v1787_v36, %v5375_v50 }
 0x31c   : > { %v1995_v7 = vpop.f32.mrf.mxu1  ;;  %v5355_v25 = vmax.f32 %v4783_v37, 0.0 }
 0x31d   : > { %v1996_v10 = vadd.f32 %v4758_v38, %v1995_v7 }
 0x31f   : > { %v1788_v14 = vpop.f32.mrf.mxu0  ;;  %v2071_v18 = vmax.f32 %v1996_v10, 0.0  ;;  %v3701_v10 = vld [vmem:[#allocation3 + $0x1d0] sm:$0xff] }
 0x320   : > { %v1789_v24 = vadd.f32 %v4598_v11, %v1788_v14  ;;  %2405 = vmatpush.bf16.msrb.mxu3 %v3701_v10 }
 0x321   : > { %v2101_v0 = vpack.c.bf16 %v2071_v18, %v2070_v4 }
 0x322   : > { %v4788_v54 = vadd.f32 %v1789_v24, %v5376_v49  ;;  %v5377_v24 = vmax.f32 %v4526_v26, 0.0 }
 0x323   : > { %2178 = vmatmul.bf16.gmra.mxu2 %v2101_v0 }
 0x324   : > { %v5354_v8 = vmax.f32 %v4788_v54, 0.0 }
 0x325   : > { %v1998_v7 = vpop.f32.mrf.mxu1 }
 0x326   : > { %v1924_v60 = vpack.c.bf16 %v5354_v8, %v5355_v25  ;;  %v1999_v36 = vadd.f32 %v4758_v38, %v1998_v7 }
 0x327   : > { %v1791_v45 = vpop.f32.mrf.mxu0 }
 0x328   : > { %2037 = vmatmul.bf16.gmra.mxu1 %v1924_v60  ;;  %v1792_v48 = vadd.f32 %v4598_v11, %v1791_v45  ;;  %v2072_v18 = vmax.f32 %v1999_v36, 0.0  ;;  %v5378_v60 = vmax.f32 %v4529_v57, 0.0 }
 0x32a   : > { %v4801_v49 = vadd.f32 %v1792_v48, %v5377_v24 }
 0x32c   : > { %v5360_v45 = vmax.f32 %v4801_v49, 0.0 }
 0x32d   : > { %v2000_v14 = vpop.f32.mrf.mxu1 }
 0x32e   : > { %v2001_v4 = vadd.f32 %v4758_v38, %v2000_v14 }
 0x32f   : > { %v1793_v50 = vpop.f32.mrf.mxu0 }
 0x330   : > { %v2073_v0 = vmax.f32 %v2001_v4, 0.0  ;;  %v1794_v8 = vadd.f32 %v4598_v11, %v1793_v50 }
 0x332   : > { %v4806_v25 = vadd.f32 %v1794_v8, %v5378_v60  ;;  %v2102_v7 = vpack.c.bf16 %v2073_v0, %v2072_v18  ;;  %v5379_v18 = vmax.f32 %v4540_v21, 0.0 }
 0x334   : > { %v5357_v19 = vmax.f32 %v4806_v25, 0.0  ;;  %2183 = vmatmul.bf16.gmra.mxu2 %v2102_v7  ;;  %v5380_v7 = vmax.f32 %v4543_v55, 0.0 }
 0x335   : > { %v2003_v10 = vpop.f32.mrf.mxu1 }
 0x336   : > { %v1925_v26 = vpack.c.bf16 %v5357_v19, %v5360_v45  ;;  %v2004_v48 = vadd.f32 %v4758_v38, %v2003_v10 }
 0x337   : > { %v1796_v36 = vpop.f32.mrf.mxu0 }
 0x338   : > { %2042 = vmatmul.bf16.gmra.mxu1 %v1925_v26  ;;  %v1797_v57 = vadd.f32 %v4598_v11, %v1796_v36  ;;  %v2074_v50 = vmax.f32 %v2004_v48, 0.0 }
 0x33a   : > { %v4819_v24 = vadd.f32 %v1797_v57, %v5379_v18 }
 0x33c   : > { %v5359_v10 = vmax.f32 %v4819_v24, 0.0 }
 0x33d   : > { %v2005_v8 = vpop.f32.mrf.mxu1 }
 0x33e   : > { %v2006_v14 = vadd.f32 %v4758_v38, %v2005_v8 }
 0x33f   : > { %v1798_v4 = vpop.f32.mrf.mxu0 }
 0x340   : > { %v2075_v0 = vmax.f32 %v2006_v14, 0.0  ;;  %v1799_v60 = vadd.f32 %v4598_v11, %v1798_v4  ;;  %v3700_v14 = vld [vmem:[#allocation3 + $0x1c8] sm:$0xff] }
 0x341   : > { %2406 = vmatpush.bf16.msrb.mxu3 %v3700_v14 }
 0x342   : > { %v4824_v19 = vadd.f32 %v1799_v60, %v5380_v7  ;;  %v2103_v26 = vpack.c.bf16 %v2075_v0, %v2074_v50  ;;  %v5381_v60 = vmax.f32 %v4554_v31, 0.0 }
 0x344   : > { %v5358_v36 = vmax.f32 %v4824_v19, 0.0  ;;  %2188 = vmatmul.bf16.gmra.mxu2 %v2103_v26 }
 0x345   : > { %v2008_v8 = vpop.f32.mrf.mxu1 }
 0x346   : > { %v1926_v21 = vpack.c.bf16 %v5358_v36, %v5359_v10  ;;  %v2009_v57 = vadd.f32 %v4758_v38, %v2008_v8 }
 0x347   : > { %v1801_v48 = vpop.f32.mrf.mxu0 }
 0x348   : > { %2047 = vmatmul.bf16.gmra.mxu1 %v1926_v21  ;;  %v1802_v55 = vadd.f32 %v4598_v11, %v1801_v48  ;;  %v2076_v0 = vmax.f32 %v2009_v57, 0.0  ;;  %v5382_v21 = vmax.f32 %v4557_v42, 0.0 }
 0x34a   : > { %v4837_v7 = vadd.f32 %v1802_v55, %v5381_v60 }
 0x34c   : > { %v1874_v48 = vmax.f32 %v4837_v7, 0.0 }
 0x34d   : > { %v2010_v4 = vpop.f32.mrf.mxu1 }
 0x34e   : > { %v2011_v50 = vadd.f32 %v4758_v38, %v2010_v4 }
 0x34f   : > { %v1803_v18 = vpop.f32.mrf.mxu0 }
 0x350   : > { %v2077_v26 = vmax.f32 %v2011_v50, 0.0  ;;  %v1804_v36 = vadd.f32 %v4598_v11, %v1803_v18 }
 0x352   : > { %v2104_v10 = vpack.c.bf16 %v2077_v26, %v2076_v0  ;;  %v4842_v8 = vadd.f32 %v1804_v36, %v5382_v21  ;;  %v5383_v0 = vmax.f32 %v4568_v13, 0.0 }
 0x354   : > { %v5361_v45 = vmax.f32 %v4842_v8, 0.0  ;;  %2193 = vmatmul.bf16.gmra.mxu2 %v2104_v10 }
 0x355   : > { %v2013_v14 = vpop.f32.mrf.mxu1 }
 0x356   : > { %v1927_v31 = vpack.c.bf16 %v5361_v45, %v1874_v48  ;;  %v2014_v55 = vadd.f32 %v4758_v38, %v2013_v14  ;;  %v5384_v45 = vmax.f32 %v4571_v41, 0.0 }
 0x357   : > { %v1806_v57 = vpop.f32.mrf.mxu0 }
 0x358   : > { %2052 = vmatmul.bf16.gmra.mxu1 %v1927_v31  ;;  %v1807_v4 = vadd.f32 %v4598_v11, %v1806_v57  ;;  %v2078_v18 = vmax.f32 %v2014_v55, 0.0 }
 0x35a   : > { %v4855_v10 = vadd.f32 %v1807_v4, %v5383_v0  ;;  %v3699_v4 = vld [vmem:[#allocation3 + $0x1c0] sm:$0xff] }
 0x35b   : > { %2407 = vmatpush.bf16.msrb.mxu3 %v3699_v4 }
 0x35c   : > { %v5363_v14 = vmax.f32 %v4855_v10, 0.0 }
 0x35d   : > { %v2015_v42 = vpop.f32.mrf.mxu1 }
 0x35e   : > { %v2016_v36 = vadd.f32 %v4758_v38, %v2015_v42 }
 0x35f   : > { %v1808_v50 = vpop.f32.mrf.mxu0 }
 0x360   : > { %v2079_v60 = vmax.f32 %v2016_v36, 0.0  ;;  %v1809_v26 = vadd.f32 %v4598_v11, %v1808_v50 }
 0x362   : > { %v2105_v21 = vpack.c.bf16 %v2079_v60, %v2078_v18  ;;  %v4860_v31 = vadd.f32 %v1809_v26, %v5384_v45 }
 0x364   : > { %v5362_v57 = vmax.f32 %v4860_v31, 0.0  ;;  %2198 = vmatmul.bf16.gmra.mxu2 %v2105_v21 }
 0x365   : > { %v2018_v42 = vpop.f32.mrf.mxu1 }
 0x366   : > { %v1928_v13 = vpack.c.bf16 %v5362_v57, %v5363_v14  ;;  %v2019_v36 = vadd.f32 %v4758_v38, %v2018_v42 }
 0x367   : > { %v1811_v55 = vpop.f32.mrf.mxu0 }
 0x368   : > { %2057 = vmatmul.bf16.gmra.mxu1 %v1928_v13  ;;  %v1812_v41 = vadd.f32 %v4598_v11, %v1811_v55  ;;  %v2080_v0 = vmax.f32 %v2019_v36, 0.0  ;;  %v5385_v13 = vmax.f32 %v4585_v22, 0.0 }
 0x36a   : > { %v4873_v60 = vadd.f32 %v1812_v41, %v1440_v47 }
 0x36c   : > { %v5365_v42 = vmax.f32 %v4873_v60, 0.0 }
 0x36d   : > { %v2020_v45 = vpop.f32.mrf.mxu1 }
 0x36e   : > { %v2021_v50 = vadd.f32 %v4758_v38, %v2020_v45 }
 0x36f   : > { %v1813_v18 = vpop.f32.mrf.mxu0 }
 0x370   : > { %v2081_v26 = vmax.f32 %v2021_v50, 0.0  ;;  %v1814_v21 = vadd.f32 %v4598_v11, %v1813_v18 }
 0x372   : > { %v2106_v57 = vpack.c.bf16 %v2081_v26, %v2080_v0  ;;  %v4878_v4 = vadd.f32 %v1814_v21, %v5385_v13 }
 0x374   : > { %v5364_v55 = vmax.f32 %v4878_v4, 0.0  ;;  %2203 = vmatmul.bf16.gmra.mxu2 %v2106_v57 }
 0x375   : > { %v2023_v45 = vpop.f32.mrf.mxu1 }
 0x376   : > { %v1929_v12 = vpack.c.bf16 %v5364_v55, %v5365_v42  ;;  %v2024_v47 = vadd.f32 %v4758_v38, %v2023_v45  ;;  %v4890_v45 = vld [vmem:[#allocation6 + $0x7] ss:$0 sm:$0xff] }
 0x378   : > { %2062 = vmatmul.bf16.gmra.mxu1 %v1929_v12  ;;  %v2082_v22 = vmax.f32 %v2024_v47, 0.0 }
 0x37d   : > { %v2025_v11 = vpop.f32.mrf.mxu1 }
 0x37e   : > { %v2026_v36 = vadd.f32 %v4758_v38, %v2025_v11 }
 0x380   : > { %v2083_v41 = vmax.f32 %v2026_v36, 0.0 }
 0x382   : > { %v2107_v50 = vpack.c.bf16 %v2083_v41, %v2082_v22 }
 0x384   : > { %2208 = vmatmul.bf16.gmra.mxu2 %v2107_v50 }
 0x385   : > { %v2028_v18 = vpop.f32.mrf.mxu1 }
 0x386   : > { %v2029_v0 = vadd.f32 %v4758_v38, %v2028_v18 }
 0x388   : > { %v2084_v21 = vmax.f32 %v2029_v0, 0.0 }
 0x38d   : > { %v2030_v57 = vpop.f32.mrf.mxu1 }
 0x38e   : > { %v2031_v26 = vadd.f32 %v4758_v38, %v2030_v57 }
 0x390   : > { %v2085_v13 = vmax.f32 %v2031_v26, 0.0 }
 0x392   : > { %v2108_v14 = vpack.c.bf16 %v2085_v13, %v2084_v21 }
 0x394   : > { %2213 = vmatmul.bf16.gmra.mxu2 %v2108_v14 }
 0x395   : > { %v2033_v12 = vpop.f32.mrf.mxu1 }
 0x396   : > { %v2174_v55 = vpop.f32.mrf.mxu2  ;;  %v2034_v11 = vadd.f32 %v4758_v38, %v2033_v12 }
 0x397   : > { %v2175_v47 = vadd.f32 %v4890_v45, %v2174_v55 }
 0x398   : > { %v2086_v50 = vmax.f32 %v2034_v11, 0.0 }
 0x399   : > { %v2254_v18 = vadd.f32 %v2175_v47, %v1848_v30 }
 0x39b   : > { %v2286_v21 = vmax.f32 %v2254_v18, 0.0 }
 0x39d   : > { %v2035_v36 = vpop.f32.mrf.mxu1 }
 0x39e   : > { %v2036_v22 = vadd.f32 %v4758_v38, %v2035_v36  ;;  %v2176_v41 = vpop.f32.mrf.mxu2 }
 0x39f   : > { %v2177_v57 = vadd.f32 %v4890_v45, %v2176_v41 }
 0x3a0   : > { %v2087_v0 = vmax.f32 %v2036_v22, 0.0 }
 0x3a1   : > { %v2255_v26 = vadd.f32 %v2177_v57, %v1849_v61 }
 0x3a2   : > { %v2109_v14 = vpack.c.bf16 %v2087_v0, %v2086_v50 }
 0x3a3   : > { %v2287_v13 = vmax.f32 %v2255_v26, 0.0 }
 0x3a4   : > { %2218 = vmatmul.bf16.gmra.mxu2 %v2109_v14 }
 0x3a5   : > { %v2038_v12 = vpop.f32.mrf.mxu1  ;;  %v2319_v55 = vpack.c.bf16 %v2287_v13, %v2286_v21 }
 0x3a6   : > { %v2179_v42 = vpop.f32.mrf.mxu2  ;;  %v2039_v36 = vadd.f32 %v4758_v38, %v2038_v12 }
 0x3a7   : > { %2408 = vmatmul.bf16.vlgmr.msrb.gmra.mxu3 %v2319_v55  ;;  %v2180_v11 = vadd.f32 %v4890_v45, %v2179_v42 }
 0x3a8   : > { %v2088_v22 = vmax.f32 %v2039_v36, 0.0 }
 0x3a9   : > { %v2256_v3 = vadd.f32 %v2180_v11, %v1850_v51 }
 0x3ab   : > { %v2288_v0 = vmax.f32 %v2256_v3, 0.0 }
 0x3ad   : > { %v2040_v44 = vpop.f32.mrf.mxu1 }
 0x3ae   : > { %v2041_v30 = vadd.f32 %v4758_v38, %v2040_v44  ;;  %v2181_v47 = vpop.f32.mrf.mxu2 }
 0x3af   : > { %v2182_v41 = vadd.f32 %v4890_v45, %v2181_v47 }
 0x3b0   : > { %v2089_v61 = vmax.f32 %v2041_v30, 0.0 }
 0x3b1   : > { %v2257_v18 = vadd.f32 %v2182_v41, %v1851_v2 }
 0x3b2   : > { %v2110_v50 = vpack.c.bf16 %v2089_v61, %v2088_v22 }
 0x3b3   : > { %v2289_v57 = vmax.f32 %v2257_v18, 0.0 }
 0x3b4   : > { %2223 = vmatmul.bf16.gmra.mxu2 %v2110_v50 }
 0x3b5   : > { %v2043_v14 = vpop.f32.mrf.mxu1  ;;  %v2320_v42 = vpack.c.bf16 %v2289_v57, %v2288_v0 }
 0x3b6   : > { %v2044_v21 = vadd.f32 %v4758_v38, %v2043_v14 }
 0x3b7   : > { %v2184_v26 = vpop.f32.mrf.mxu2  ;;  %2413 = vmatmul.bf16.gmra.mxu3 %v2320_v42 }
 0x3b8   : > { %v2185_v13 = vadd.f32 %v4890_v45, %v2184_v26  ;;  %v2090_v55 = vmax.f32 %v2044_v21, 0.0 }
 0x3ba   : > { %v2258_v20 = vadd.f32 %v2185_v13, %v1852_v63 }
 0x3bc   : > { %v2290_v30 = vmax.f32 %v2258_v20, 0.0 }
 0x3bd   : > { %v2045_v5 = vpop.f32.mrf.mxu1 }
 0x3be   : > { %v2046_v51 = vadd.f32 %v4758_v38, %v2045_v5 }
 0x3bf   : > { %v2186_v12 = vpop.f32.mrf.mxu2 }
 0x3c0   : > { %v2091_v2 = vmax.f32 %v2046_v51, 0.0  ;;  %v2187_v36 = vadd.f32 %v4890_v45, %v2186_v12 }
 0x3c2   : > { %v2111_v11 = vpack.c.bf16 %v2091_v2, %v2090_v55  ;;  %v2259_v44 = vadd.f32 %v2187_v36, %v1853_v9 }
 0x3c4   : > { %v2291_v47 = vmax.f32 %v2259_v44, 0.0  ;;  %2228 = vmatmul.bf16.gmra.mxu2 %v2111_v11 }
 0x3c5   : > { %v2048_v22 = vpop.f32.mrf.mxu1 }
 0x3c6   : > { %v2321_v3 = vpack.c.bf16 %v2291_v47, %v2290_v30  ;;  %v2049_v41 = vadd.f32 %v4758_v38, %v2048_v22 }
 0x3c7   : > { %v2189_v61 = vpop.f32.mrf.mxu2 }
 0x3c8   : > { %2418 = vmatmul.bf16.gmra.mxu3 %v2321_v3  ;;  %v2190_v50 = vadd.f32 %v4890_v45, %v2189_v61  ;;  %v2092_v0 = vmax.f32 %v2049_v41, 0.0 }
 0x3ca   : > { %v2260_v28 = vadd.f32 %v2190_v50, %v1854_v46 }
 0x3cc   : > { %v2292_v26 = vmax.f32 %v2260_v28, 0.0 }
 0x3cd   : > { %v2050_v40 = vpop.f32.mrf.mxu1 }
 0x3ce   : > { %v2051_v63 = vadd.f32 %v4758_v38, %v2050_v40 }
 0x3cf   : > { %v2191_v18 = vpop.f32.mrf.mxu2 }
 0x3d0   : > { %v2093_v9 = vmax.f32 %v2051_v63, 0.0  ;;  %v2192_v57 = vadd.f32 %v4890_v45, %v2191_v18 }
 0x3d2   : > { %v2112_v14 = vpack.c.bf16 %v2093_v9, %v2092_v0  ;;  %v2261_v42 = vadd.f32 %v2192_v57, %v1855_v27 }
 0x3d4   : > { %v2293_v21 = vmax.f32 %v2261_v42, 0.0  ;;  %2233 = vmatmul.bf16.gmra.mxu2 %v2112_v14 }
 0x3d5   : > { %v2053_v13 = vpop.f32.mrf.mxu1 }
 0x3d6   : > { %v2322_v5 = vpack.c.bf16 %v2293_v21, %v2292_v26  ;;  %v2054_v12 = vadd.f32 %v4758_v38, %v2053_v13 }
 0x3d7   : > { %v2194_v51 = vpop.f32.mrf.mxu2 }
 0x3d8   : > { %2423 = vmatmul.bf16.gmra.mxu3 %v2322_v5  ;;  %v2195_v55 = vadd.f32 %v4890_v45, %v2194_v51  ;;  %v2094_v2 = vmax.f32 %v2054_v12, 0.0 }
 0x3da   : > { %v2262_v15 = vadd.f32 %v2195_v55, %v1856_v35 }
 0x3dc   : > { %v2294_v30 = vmax.f32 %v2262_v15, 0.0 }
 0x3dd   : > { %v2055_v6 = vpop.f32.mrf.mxu1 }
 0x3de   : > { %v2056_v46 = vadd.f32 %v4758_v38, %v2055_v6  ;;  %v5386_v6 = vmax.f32 %v4717_v17, 0.0 }
 0x3df   : > { %v2196_v20 = vpop.f32.mrf.mxu2 }
 0x3e0   : > { %v2095_v27 = vmax.f32 %v2056_v46, 0.0  ;;  %v2197_v36 = vadd.f32 %v4890_v45, %v2196_v20 }
 0x3e2   : > { %v2113_v11 = vpack.c.bf16 %v2095_v27, %v2094_v2  ;;  %v2263_v44 = vadd.f32 %v2197_v36, %v1857_v52 }
 0x3e4   : > { %v2295_v47 = vmax.f32 %v2263_v44, 0.0  ;;  %2238 = vmatmul.bf16.gmra.mxu2 %v2113_v11  ;;  %v5387_v11 = vmax.f32 %v4729_v62, 0.0  ;;  %v5388_v44 = vmax.f32 %v4734_v53, 0.0  ;;  %v5390_v62 = vmax.f32 %v4750_v56, 0.0 }
 0x3e5   : > { %v2058_v22 = vpop.f32.mrf.mxu1 }
 0x3e6   : > { %v2323_v3 = vpack.c.bf16 %v2295_v47, %v2294_v30  ;;  %v2059_v41 = vadd.f32 %v4758_v38, %v2058_v22 }
 0x3e7   : > { %v2199_v61 = vpop.f32.mrf.mxu2 }
 0x3e8   : > { %2428 = vmatmul.bf16.gmra.mxu3 %v2323_v3  ;;  %v2200_v50 = vadd.f32 %v4890_v45, %v2199_v61  ;;  %v2096_v63 = vmax.f32 %v2059_v41, 0.0 }
 0x3ea   : > { %v2264_v16 = vadd.f32 %v2200_v50, %v1858_v1  ;;  %v5389_v50 = vmax.f32 %v4745_v43, 0.0 }
 0x3ec   : > { %v2296_v9 = vmax.f32 %v2264_v16, 0.0 }
 0x3ed   : > { %v2060_v32 = vpop.f32.mrf.mxu1 }
 0x3ee   : > { %v2061_v35 = vadd.f32 %v4758_v38, %v2060_v32 }
 0x3ef   : > { %v2201_v40 = vpop.f32.mrf.mxu2 }
 0x3f0   : > { %v2097_v52 = vmax.f32 %v2061_v35, 0.0  ;;  %v2202_v18 = vadd.f32 %v4890_v45, %v2201_v40 }
 0x3f2   : > { %v2114_v0 = vpack.c.bf16 %v2097_v52, %v2096_v63  ;;  %v2265_v28 = vadd.f32 %v2202_v18, %v1859_v23  ;;  %v4960_v18 = vld [vmem:[#allocation6 + $0x8] ss:$0 sm:$0xff] }
 0x3f4   : > { %v2297_v57 = vmax.f32 %v2265_v28, 0.0  ;;  %2243 = vmatmul.bf16.gmra.mxu2 %v2114_v0 }
 0x3f5   : > { %v2063_v14 = vpop.f32.mrf.mxu1 }
 0x3f6   : > { %v2324_v42 = vpack.c.bf16 %v2297_v57, %v2296_v9  ;;  %v2064_v21 = vadd.f32 %v4758_v38, %v2063_v14  ;;  %v5391_v14 = vmax.f32 %v4765_v33, 0.0 }
 0x3f7   : > { %v2204_v26 = vpop.f32.mrf.mxu2 }
 0x3f8   : > { %2433 = vmatmul.bf16.gmra.mxu3 %v2324_v42  ;;  %v2205_v13 = vadd.f32 %v4890_v45, %v2204_v26  ;;  %v2098_v51 = vmax.f32 %v2064_v21, 0.0 }
 0x3fa   : > { %v2266_v58 = vadd.f32 %v2205_v13, %v1860_v34  ;;  %v5392_v13 = vmax.f32 %v4770_v39, 0.0 }
 0x3fc   : > { %v2298_v20 = vmax.f32 %v2266_v58, 0.0 }
 0x3fd   : > { %v2065_v59 = vpop.f32.mrf.mxu1 }
 0x3fe   : > { %v2066_v1 = vadd.f32 %v4758_v38, %v2065_v59 }
 0x3ff   : > { %v2206_v5 = vpop.f32.mrf.mxu2 }
 0x400   : > { %v2099_v23 = vmax.f32 %v2066_v1, 0.0  ;;  %v2207_v12 = vadd.f32 %v4890_v45, %v2206_v5 }
 0x402   : > { %v2115_v55 = vpack.c.bf16 %v2099_v23, %v2098_v51  ;;  %v2267_v46 = vadd.f32 %v2207_v12, %v5386_v6 }
 0x404   : > { %v2299_v2 = vmax.f32 %v2267_v46, 0.0  ;;  %2248 = vmatmul.bf16.gmra.mxu2 %v2115_v55 }
 0x406   : > { %v2325_v15 = vpack.c.bf16 %v2299_v2, %v2298_v20 }
 0x407   : > { %v2209_v27 = vpop.f32.mrf.mxu2 }
 0x408   : > { %2438 = vmatmul.bf16.gmra.mxu3 %v2325_v15  ;;  %v2210_v38 = vadd.f32 %v4890_v45, %v2209_v27 }
 0x40a   : > { %v2268_v29 = vadd.f32 %v2210_v38, %v5387_v11 }
 0x40c   : > { %v2300_v47 = vmax.f32 %v2268_v29, 0.0 }
 0x40f   : > { %v2211_v36 = vpop.f32.mrf.mxu2 }
 0x410   : > { %v2212_v34 = vadd.f32 %v4890_v45, %v2211_v36 }
 0x412   : > { %v2269_v30 = vadd.f32 %v2212_v34, %v5388_v44 }
 0x414   : > { %v2301_v17 = vmax.f32 %v2269_v30, 0.0  ;;  %v5393_v30 = vmax.f32 %v4783_v37, 0.0 }
 0x416   : > { %v2326_v22 = vpack.c.bf16 %v2301_v17, %v2300_v47 }
 0x417   : > { %v2214_v3 = vpop.f32.mrf.mxu2 }
 0x418   : > { %2443 = vmatmul.bf16.gmra.mxu3 %v2326_v22  ;;  %v2215_v61 = vadd.f32 %v4890_v45, %v2214_v3  ;;  %v5394_v3 = vmax.f32 %v4788_v54, 0.0 }
 0x41a   : > { %v2270_v32 = vadd.f32 %v2215_v61, %v5389_v50 }
 0x41c   : > { %v2302_v63 = vmax.f32 %v2270_v32, 0.0 }
 0x41f   : > { %v2216_v41 = vpop.f32.mrf.mxu2 }
 0x420   : > { %v2217_v35 = vadd.f32 %v4890_v45, %v2216_v41 }
 0x422   : > { %v2271_v40 = vadd.f32 %v2217_v35, %v5390_v62 }
 0x424   : > { %v2303_v16 = vmax.f32 %v2271_v40, 0.0 }
 0x426   : > { %v2327_v53 = vpack.c.bf16 %v2303_v16, %v2302_v63 }
 0x427   : > { %v2219_v52 = vpop.f32.mrf.mxu2 }
 0x428   : > { %2448 = vmatmul.bf16.gmra.mxu3 %v2327_v53  ;;  %v2220_v28 = vadd.f32 %v4890_v45, %v2219_v52 }
 0x42a   : > { %v2409_v0 = vpop.f32.mrf.mxu3  ;;  %v2272_v42 = vadd.f32 %v2220_v28, %v5391_v14 }
 0x42b   : > { %v2410_v9 = vadd.f32 %v4960_v18, %v2409_v0 }
 0x42c   : > { %v2304_v5 = vmax.f32 %v2272_v42, 0.0 }
 0x42d   : > { %v2585_v57 = vand.u32 2147483647, %v2410_v9  ;;  %v2489_v37 = vmax.f32 %v2410_v9, 0.0  ;;  %vm2521_vm1 = vcmp.ne.f32.partialorder %v2410_v9, %v2410_v9 }
 0x42f   : > { %v2221_v43 = vpop.f32.mrf.mxu2  ;;  %v2617_v26 = vsub.f32 0.0, %v2585_v57 }
 0x430   : > { %v2222_v56 = vadd.f32 %v4890_v45, %v2221_v43 }
 0x431   : > { %v2649_v21 = vmul.f32 1.442695, %v2617_v26 }
 0x432   : > { %v2273_v59 = vadd.f32 %v2222_v56, %v5392_v13  ;;  %v2411_v1 = vpop.f32.mrf.mxu3 }
 0x433   : > { %3787 = vpow2.f32 %v2649_v21  ;;  %v4970_v58 = vadd.f32 %v4960_v18, %v2411_v1 }
 0x434   : > { %v2305_v51 = vmax.f32 %v2273_v59, 0.0 }
 0x435   : > { %v2586_v23 = vand.u32 2147483647, %v4970_v58  ;;  %vm2522_vm3 = vcmp.ne.f32.partialorder %v4970_v58, %v4970_v58 }
 0x436   : > { %v2328_v12 = vpack.c.bf16 %v2305_v51, %v2304_v5 }
 0x437   : > { %v2224_v55 = vpop.f32.mrf.mxu2  ;;  %v2618_v33 = vsub.f32 0.0, %v2586_v23 }
 0x438   : > { %2453 = vmatmul.bf16.gmra.mxu3 %v2328_v12  ;;  %v2225_v27 = vadd.f32 %v4890_v45, %v2224_v55 }
 0x439   : > { %v3788_v6 = vpop.eup %3787  ;;  %v2651_v46 = vmul.f32 1.442695, %v2618_v33 }
 0x43a   : > { %v2713_v20 = vadd.f32 1.0, %v3788_v6  ;;  %v2716_v2 = vmul.f32 -0.5, %v3788_v6  ;;  %v2414_v39 = vpop.f32.mrf.mxu3  ;;  %v2719_v44 = vand.u32 2147483647, %v3788_v6  ;;  %v2274_v47 = vadd.f32 %v2225_v27, %v5393_v30 }
 0x43b   : > { %3789 = vpow2.f32 %v2651_v46  ;;  %v4974_v15 = vadd.f32 %v4960_v18, %v2414_v39  ;;  %v5396_v30 = vmax.f32 %v4806_v25, 0.0 }
 0x43c   : > { %3791 = vlog2.f32 %v2713_v20  ;;  %v2717_v36 = vadd.f32 1.0, %v2716_v2  ;;  %vm2720_vm0 = vcmp.lt.f32.partialorder %v2719_v44, 0.0004427343  ;;  %v2306_v53 = vmax.f32 %v2274_v47, 0.0 }
 0x43d   : > { %v2587_v38 = vand.u32 2147483647, %v4974_v15  ;;  %vm2523_vm5 = vcmp.ne.f32.partialorder %v4974_v15, %v4974_v15 }
 0x43e   : > { %v2718_v50 = vmul.f32 %v3788_v6, %v2717_v36 }
 0x43f   : > { %v2226_v11 = vpop.f32.mrf.mxu2  ;;  %v2619_v29 = vsub.f32 0.0, %v2587_v38 }
 0x440   : > { %v2227_v34 = vadd.f32 %v4890_v45, %v2226_v11  ;;  %v5395_v11 = vmax.f32 %v4801_v49, 0.0  ;;  %v2491_v49 = vmax.f32 %v4974_v15, 0.0 }
 0x441   : > { %v3790_v17 = vpop.eup %3789  ;;  %v2653_v22 = vmul.f32 1.442695, %v2619_v29 }
 0x442   : > { %v2275_v61 = vadd.f32 %v2227_v34, %v5394_v3  ;;  %v3792_v41 = vpop.eup %3791  ;;  %v2722_v32 = vadd.f32 1.0, %v3790_v17  ;;  %v2725_v35 = vmul.f32 -0.5, %v3790_v17  ;;  %v2416_v62 = vpop.f32.mrf.mxu3  ;;  %v2728_v26 = vand.u32 2147483647, %v3790_v17 }
 0x443   : > { %v2715_v40 = vmul.f32 0.6931472, %v3792_v41  ;;  %3793 = vpow2.f32 %v2653_v22  ;;  %v4987_v16 = vadd.f32 %v4960_v18, %v2416_v62 }
 0x444   : > { %v2307_v63 = vmax.f32 %v2275_v61, 0.0  ;;  %3795 = vlog2.f32 %v2722_v32  ;;  %v2726_v43 = vadd.f32 1.0, %v2725_v35  ;;  %vm2729_vm2 = vcmp.lt.f32.partialorder %v2728_v26, 0.0004427343 }
 0x445   : > { %v2721_v52 = vsel %vm2720_vm0, %v2718_v50, %v2715_v40  ;;  %v2588_v54 = vand.u32 2147483647, %v4987_v16  ;;  %vm2524_vm7 = vcmp.ne.f32.partialorder %v4987_v16, %v4987_v16 }
 0x446   : > { %v3001_v0 = vadd.f32 %v2721_v52, %v2489_v37  ;;  %v2329_v57 = vpack.c.bf16 %v2307_v63, %v2306_v53  ;;  %v2727_v23 = vmul.f32 %v3790_v17, %v2726_v43 }
 0x447   : > { %v2229_v28 = vpop.f32.mrf.mxu2  ;;  %v2620_v14 = vsub.f32 0.0, %v2588_v54 }
 0x448   : > { %v3033_v42 = vsel %vm2521_vm1, %v2410_v9, %v3001_v0  ;;  %2458 = vmatmul.bf16.gmra.mxu3 %v2329_v57  ;;  %v2490_v9 = vmax.f32 %v4970_v58, 0.0  ;;  %v2230_v55 = vadd.f32 %v4890_v45, %v2229_v28 }
 0x449   : > { %v3794_v56 = vpop.eup %3793  ;;  %3065 = vst [vmem:[%s4990_s9] sm:$0xff] %v3033_v42  ;;  %v2655_v21 = vmul.f32 1.442695, %v2620_v14 }
 0x44a   : > { %v3796_v13 = vpop.eup %3795  ;;  %v2731_v59 = vadd.f32 1.0, %v3794_v56  ;;  %v2734_v1 = vmul.f32 -0.5, %v3794_v56  ;;  %v2737_v36 = vand.u32 2147483647, %v3794_v56  ;;  %v2276_v29 = vadd.f32 %v2230_v55, %v5395_v11 }
 0x44b   : > { %v2419_v5 = vpop.f32.mrf.mxu3  ;;  %v2724_v51 = vmul.f32 0.6931472, %v3796_v13  ;;  %3797 = vpow2.f32 %v2655_v21 }
 0x44c   : > { %v4994_v12 = vadd.f32 %v4960_v18, %v2419_v5  ;;  %3799 = vlog2.f32 %v2731_v59  ;;  %v2735_v20 = vadd.f32 1.0, %v2734_v1  ;;  %vm2738_vm4 = vcmp.lt.f32.partialorder %v2737_v36, 0.0004427343 }
 0x44d   : > { %v2730_v33 = vsel %vm2729_vm2, %v2727_v23, %v2724_v51  ;;  %v2308_v35 = vmax.f32 %v2276_v29, 0.0  ;;  %v2492_v59 = vmax.f32 %v4987_v16, 0.0 }
 0x44e   : > { %v2589_v6 = vand.u32 2147483647, %v4994_v12  ;;  %v3002_v46 = vadd.f32 %v2730_v33, %v2490_v9  ;;  %v2736_v22 = vmul.f32 %v3794_v56, %v2735_v20  ;;  %v5397_v20 = vmax.f32 %v4819_v24, 0.0 }
 0x44f   : > { %v2231_v2 = vpop.f32.mrf.mxu2  ;;  %v2493_v24 = vmax.f32 %v4994_v12, 0.0  ;;  %vm2525_vm9 = vcmp.ne.f32.partialorder %v4994_v12, %v4994_v12 }
 0x450   : > { %v2621_v39 = vsub.f32 0.0, %v2589_v6  ;;  %v2232_v27 = vadd.f32 %v4890_v45, %v2231_v2  ;;  %v3034_v38 = vsel %vm2522_vm3, %v4970_v58, %v3002_v46 }
 0x451   : > { %v3798_v34 = vpop.eup %3797  ;;  %3066 = vst [vmem:[%s4990_s9 + $0x8] sm:$0xff] %v3034_v38  ;;  %v5398_v38 = vmax.f32 %v4824_v19, 0.0 }
 0x452   : > { %v2657_v44 = vmul.f32 1.442695, %v2621_v39  ;;  %v2277_v47 = vadd.f32 %v2232_v27, %v5396_v30  ;;  %v3800_v17 = vpop.eup %3799  ;;  %v2740_v3 = vadd.f32 1.0, %v3798_v34  ;;  %v2743_v61 = vmul.f32 -0.5, %v3798_v34 }
 0x453   : > { %v2421_v41 = vpop.f32.mrf.mxu3  ;;  %v2733_v50 = vmul.f32 0.6931472, %v3800_v17  ;;  %v2746_v0 = vand.u32 2147483647, %v3798_v34 }
 0x454   : > { %3801 = vpow2.f32 %v2657_v44  ;;  %v2309_v32 = vmax.f32 %v2277_v47, 0.0  ;;  %v5009_v58 = vadd.f32 %v4960_v18, %v2421_v41  ;;  %v2744_v53 = vadd.f32 1.0, %v2743_v61 }
 0x455   : > { %3803 = vlog2.f32 %v2740_v3  ;;  %v2739_v62 = vsel %vm2738_vm4, %v2736_v22, %v2733_v50  ;;  %vm2747_vm6 = vcmp.lt.f32.partialorder %v2746_v0, 0.0004427343 }
 0x456   : > { %v2590_v25 = vand.u32 2147483647, %v5009_v58  ;;  %v3003_v40 = vadd.f32 %v2739_v62, %v2491_v49  ;;  %v2330_v37 = vpack.c.bf16 %v2309_v32, %v2308_v35  ;;  %v2745_v21 = vmul.f32 %v3798_v34, %v2744_v53 }
 0x457   : > { %v2234_v63 = vpop.f32.mrf.mxu2  ;;  %vm2526_vm11 = vcmp.ne.f32.partialorder %v5009_v58, %v5009_v58 }
 0x458   : > { %v2622_v52 = vsub.f32 0.0, %v2590_v25  ;;  %v3035_v54 = vsel %vm2523_vm5, %v4974_v15, %v3003_v40  ;;  %2463 = vmatmul.bf16.gmra.mxu3 %v2330_v37  ;;  %v2235_v15 = vadd.f32 %v4890_v45, %v2234_v63 }
 0x459   : > { %3067 = vst [vmem:[%s4990_s9 + $0x10] sm:$0xff] %v3035_v54 }
 0x45a   : > { %v3802_v28 = vpop.eup %3801  ;;  %v2659_v57 = vmul.f32 1.442695, %v2622_v52  ;;  %v2278_v2 = vadd.f32 %v2235_v15, %v5397_v20 }
 0x45b   : > { %v3804_v43 = vpop.eup %3803  ;;  %v2749_v14 = vadd.f32 1.0, %v3802_v28  ;;  %v2752_v42 = vmul.f32 -0.5, %v3802_v28  ;;  %v2424_v26 = vpop.f32.mrf.mxu3  ;;  %v2755_v46 = vand.u32 2147483647, %v3802_v28 }
 0x45c   : > { %v2742_v56 = vmul.f32 0.6931472, %v3804_v43  ;;  %3805 = vpow2.f32 %v2659_v57  ;;  %v5018_v13 = vadd.f32 %v4960_v18, %v2424_v26  ;;  %v2310_v22 = vmax.f32 %v2278_v2, 0.0 }
 0x45d   : > { %3807 = vlog2.f32 %v2749_v14  ;;  %v2753_v23 = vadd.f32 1.0, %v2752_v42  ;;  %vm2756_vm8 = vcmp.lt.f32.partialorder %v2755_v46, 0.0004427343  ;;  %v2494_v57 = vmax.f32 %v5009_v58, 0.0 }
 0x45e   : > { %v2748_v1 = vsel %vm2747_vm6, %v2745_v21, %v2742_v56  ;;  %v2591_v5 = vand.u32 2147483647, %v5018_v13  ;;  %v2495_v7 = vmax.f32 %v5018_v13, 0.0  ;;  %vm2527_vm13 = vcmp.ne.f32.partialorder %v5018_v13, %v5018_v13 }
 0x45f   : > { %v3004_v51 = vadd.f32 %v2748_v1, %v2492_v59  ;;  %v2236_v9 = vpop.f32.mrf.mxu2  ;;  %v2754_v29 = vmul.f32 %v3802_v28, %v2753_v23 }
 0x460   : > { %v2623_v55 = vsub.f32 0.0, %v2591_v5  ;;  %v2237_v33 = vadd.f32 %v4890_v45, %v2236_v9  ;;  %v5399_v9 = vmax.f32 %v4842_v8, 0.0 }
 0x461   : > { %v3036_v6 = vsel %vm2524_vm7, %v4987_v16, %v3004_v51 }
 0x462   : > { %v3806_v39 = vpop.eup %3805  ;;  %3068 = vst [vmem:[%s4990_s9 + $0x18] sm:$0xff] %v3036_v6  ;;  %v2661_v27 = vmul.f32 1.442695, %v2623_v55  ;;  %v2279_v36 = vadd.f32 %v2237_v33, %v5398_v38 }
 0x463   : > { %v3808_v11 = vpop.eup %3807  ;;  %v2758_v34 = vadd.f32 1.0, %v3806_v39  ;;  %v2761_v44 = vmul.f32 -0.5, %v3806_v39  ;;  %v2426_v30 = vpop.f32.mrf.mxu3  ;;  %v2764_v62 = vand.u32 2147483647, %v3806_v39 }
 0x464   : > { %v2751_v47 = vmul.f32 0.6931472, %v3808_v11  ;;  %3809 = vpow2.f32 %v2661_v27  ;;  %v2311_v17 = vmax.f32 %v2279_v36, 0.0  ;;  %v5033_v16 = vadd.f32 %v4960_v18, %v2426_v30 }
 0x465   : > { %3811 = vlog2.f32 %v2758_v34  ;;  %v2762_v32 = vadd.f32 1.0, %v2761_v44  ;;  %vm2765_vm10 = vcmp.lt.f32.partialorder %v2764_v62, 0.0004427343 }
 0x466   : > { %v2757_v3 = vsel %vm2756_vm8, %v2754_v29, %v2751_v47  ;;  %v2592_v19 = vand.u32 2147483647, %v5033_v16  ;;  %v2331_v50 = vpack.c.bf16 %v2311_v17, %v2310_v22  ;;  %vm2528_vm15 = vcmp.ne.f32.partialorder %v5033_v16, %v5033_v16 }
 0x467   : > { %v3005_v61 = vadd.f32 %v2757_v3, %v2493_v24  ;;  %v2239_v41 = vpop.f32.mrf.mxu2  ;;  %v2763_v0 = vmul.f32 %v3806_v39, %v2762_v32 }
 0x468   : > { %v2624_v49 = vsub.f32 0.0, %v2592_v19  ;;  %2468 = vmatmul.bf16.gmra.mxu3 %v2331_v50 }
 0x469   : > { %v3037_v35 = vsel %vm2525_vm9, %v4994_v12, %v3005_v61  ;;  %v2240_v12 = vadd.f32 %v4890_v45, %v2239_v41 }
 0x46a   : > { %v3810_v25 = vpop.eup %3809  ;;  %3069 = vst [vmem:[%s4990_s9 + $0x20] sm:$0xff] %v3037_v35  ;;  %v2663_v40 = vmul.f32 1.442695, %v2624_v49  ;;  %v2496_v49 = vmax.f32 %v5033_v16, 0.0 }
 0x46b   : > { %v3812_v63 = vpop.eup %3811  ;;  %v2767_v37 = vadd.f32 1.0, %v3810_v25  ;;  %v2770_v53 = vmul.f32 -0.5, %v3810_v25  ;;  %v2429_v52 = vpop.f32.mrf.mxu3  ;;  %v2773_v1 = vand.u32 2147483647, %v3810_v25  ;;  %v2280_v5 = vadd.f32 %v2240_v12, %v1874_v48 }
 0x46c   : > { %v2760_v54 = vmul.f32 0.6931472, %v3812_v63  ;;  %3813 = vpow2.f32 %v2663_v40  ;;  %v5042_v28 = vadd.f32 %v4960_v18, %v2429_v52 }
 0x46d   : > { %3815 = vlog2.f32 %v2767_v37  ;;  %v2771_v26 = vadd.f32 1.0, %v2770_v53  ;;  %vm2774_vm12 = vcmp.lt.f32.partialorder %v2773_v1, 0.0004427343  ;;  %v2312_v48 = vmax.f32 %v2280_v5, 0.0 }
 0x46e   : > { %v2766_v43 = vsel %vm2765_vm10, %v2763_v0, %v2760_v54  ;;  %v2593_v14 = vand.u32 2147483647, %v5042_v28  ;;  %v5400_v0 = vmax.f32 %v4855_v10, 0.0  ;;  %v2497_v10 = vmax.f32 %v5042_v28, 0.0 }
 0x46f   : > { %v3006_v42 = vadd.f32 %v2766_v43, %v2494_v57  ;;  %v2241_v56 = vpop.f32.mrf.mxu2  ;;  %v2772_v6 = vmul.f32 %v3810_v25, %v2771_v26  ;;  %vm2529_vm1 = vcmp.ne.f32.partialorder %v5042_v28, %v5042_v28 }
 0x470   : > { %v2625_v21 = vsub.f32 0.0, %v2593_v14  ;;  %v2242_v59 = vadd.f32 %v4890_v45, %v2241_v56  ;;  %v5401_v14 = vmax.f32 %v4860_v31, 0.0 }
 0x471   : > { %v3038_v15 = vsel %vm2526_vm11, %v5009_v58, %v3006_v42 }
 0x472   : > { %v3814_v51 = vpop.eup %3813  ;;  %3070 = vst [vmem:[%s4990_s9 + $0x28] sm:$0xff] %v3038_v15  ;;  %v2665_v23 = vmul.f32 1.442695, %v2625_v21  ;;  %v2281_v55 = vadd.f32 %v2242_v59, %v5399_v9 }
 0x473   : > { %v3816_v33 = vpop.eup %3815  ;;  %v2776_v46 = vadd.f32 1.0, %v3814_v51  ;;  %v2779_v20 = vmul.f32 -0.5, %v3814_v51  ;;  %v2431_v2 = vpop.f32.mrf.mxu3  ;;  %v2782_v47 = vand.u32 2147483647, %v3814_v51 }
 0x474   : > { %v2769_v39 = vmul.f32 0.6931472, %v3816_v33  ;;  %3817 = vpow2.f32 %v2665_v23  ;;  %v2313_v27 = vmax.f32 %v2281_v55, 0.0  ;;  %v5057_v58 = vadd.f32 %v4960_v18, %v2431_v2 }
 0x475   : > { %3819 = vlog2.f32 %v2776_v46  ;;  %v2780_v34 = vadd.f32 1.0, %v2779_v20  ;;  %vm2783_vm14 = vcmp.lt.f32.partialorder %v2782_v47, 0.0004427343 }
 0x476   : > { %v2775_v38 = vsel %vm2774_vm12, %v2772_v6, %v2769_v39  ;;  %v2594_v8 = vand.u32 2147483647, %v5057_v58  ;;  %v2332_v29 = vpack.c.bf16 %v2313_v27, %v2312_v48  ;;  %vm2530_vm3 = vcmp.ne.f32.partialorder %v5057_v58, %v5057_v58 }
 0x477   : > { %v3007_v36 = vadd.f32 %v2775_v38, %v2495_v7  ;;  %v2244_v11 = vpop.f32.mrf.mxu2  ;;  %v2781_v50 = vmul.f32 %v3814_v51, %v2780_v34  ;;  %v2498_v34 = vmax.f32 %v5057_v58, 0.0 }
 0x478   : > { %v2626_v44 = vsub.f32 0.0, %v2594_v8  ;;  %2473 = vmatmul.bf16.gmra.mxu3 %v2332_v29 }
 0x479   : > { %v3039_v30 = vsel %vm2527_vm13, %v5018_v13, %v3007_v36  ;;  %v2245_v13 = vadd.f32 %v4890_v45, %v2244_v11 }
 0x47a   : > { %v3818_v17 = vpop.eup %3817  ;;  %3071 = vst [vmem:[%s4990_s9 + $0x30] sm:$0xff] %v3039_v30  ;;  %v2667_v24 = vmul.f32 1.442695, %v2626_v44 }
 0x47b   : > { %v3820_v22 = vpop.eup %3819  ;;  %v2785_v3 = vadd.f32 1.0, %v3818_v17  ;;  %v2788_v19 = vmul.f32 -0.5, %v3818_v17  ;;  %v2434_v61 = vpop.f32.mrf.mxu3  ;;  %v2791_v54 = vand.u32 2147483647, %v3818_v17  ;;  %v2282_v57 = vadd.f32 %v2245_v13, %v5400_v0 }
 0x47c   : > { %v2778_v41 = vmul.f32 0.6931472, %v3820_v22  ;;  %3821 = vpow2.f32 %v2667_v24  ;;  %v5066_v32 = vadd.f32 %v4960_v18, %v2434_v61 }
 0x47d   : > { %3823 = vlog2.f32 %v2785_v3  ;;  %v2789_v40 = vadd.f32 1.0, %v2788_v19  ;;  %vm2792_vm0 = vcmp.lt.f32.partialorder %v2791_v54, 0.0004427343  ;;  %v2314_v51 = vmax.f32 %v2282_v57, 0.0 }
 0x47e   : > { %v2784_v35 = vsel %vm2783_vm14, %v2781_v50, %v2778_v41  ;;  %v2595_v62 = vand.u32 2147483647, %v5066_v32  ;;  %v5402_v41 = vmax.f32 %v4873_v60, 0.0  ;;  %v2499_v60 = vmax.f32 %v5066_v32, 0.0 }
 0x47f   : > { %v3008_v25 = vadd.f32 %v2784_v35, %v2496_v49  ;;  %v2246_v63 = vpop.f32.mrf.mxu2  ;;  %v2790_v56 = vmul.f32 %v3818_v17, %v2789_v40  ;;  %v5403_v35 = vmax.f32 %v4878_v4, 0.0  ;;  %vm2531_vm5 = vcmp.ne.f32.partialorder %v5066_v32, %v5066_v32 }
 0x480   : > { %v2627_v37 = vsub.f32 0.0, %v2595_v62  ;;  %v2247_v53 = vadd.f32 %v4890_v45, %v2246_v63 }
 0x481   : > { %v3040_v52 = vsel %vm2528_vm15, %v5033_v16, %v3008_v25 }
 0x482   : > { %v3822_v12 = vpop.eup %3821  ;;  %3072 = vst [vmem:[%s4990_s9 + $0x38] sm:$0xff] %v3040_v52  ;;  %v2669_v43 = vmul.f32 1.442695, %v2627_v37  ;;  %v2283_v42 = vadd.f32 %v2247_v53, %v5401_v14 }
 0x483   : > { %v3824_v26 = vpop.eup %3823  ;;  %v2794_v21 = vadd.f32 1.0, %v3822_v12  ;;  %v2797_v59 = vmul.f32 -0.5, %v3822_v12  ;;  %v2436_v15 = vpop.f32.mrf.mxu3  ;;  %v2800_v2 = vand.u32 2147483647, %v3822_v12 }
 0x484   : > { %v2787_v1 = vmul.f32 0.6931472, %v3824_v26  ;;  %3825 = vpow2.f32 %v2669_v43  ;;  %v2315_v5 = vmax.f32 %v2283_v42, 0.0  ;;  %v5081_v16 = vadd.f32 %v4960_v18, %v2436_v15 }
 0x485   : > { %3827 = vlog2.f32 %v2794_v21  ;;  %v2798_v6 = vadd.f32 1.0, %v2797_v59  ;;  %vm2801_vm2 = vcmp.lt.f32.partialorder %v2800_v2, 0.0004427343 }
 0x486   : > { %v2793_v23 = vsel %vm2792_vm0, %v2790_v56, %v2787_v1  ;;  %v2596_v31 = vand.u32 2147483647, %v5081_v16  ;;  %v2333_v33 = vpack.c.bf16 %v2315_v5, %v2314_v51  ;;  %vm2532_vm7 = vcmp.ne.f32.partialorder %v5081_v16, %v5081_v16 }
 0x487   : > { %v3009_v9 = vadd.f32 %v2793_v23, %v2497_v10  ;;  %v2249_v55 = vpop.f32.mrf.mxu2  ;;  %v2799_v11 = vmul.f32 %v3822_v12, %v2798_v6 }
 0x488   : > { %v2628_v46 = vsub.f32 0.0, %v2596_v31  ;;  %2478 = vmatmul.bf16.gmra.mxu3 %v2333_v33  ;;  %v2500_v31 = vmax.f32 %v5081_v16, 0.0 }
 0x489   : > { %v3041_v20 = vsel %vm2529_vm1, %v5042_v28, %v3009_v9  ;;  %v2250_v28 = vadd.f32 %v4890_v45, %v2249_v55 }
 0x48a   : > { %v3826_v39 = vpop.eup %3825  ;;  %3073 = vst [vmem:[%s4990_s9 + $0x40] sm:$0xff] %v3041_v20  ;;  %v2671_v27 = vmul.f32 1.442695, %v2628_v46 }
 0x48b   : > { %v3828_v7 = vpop.eup %3827  ;;  %v2803_v48 = vadd.f32 1.0, %v3826_v39  ;;  %v2806_v38 = vmul.f32 -0.5, %v3826_v39  ;;  %v2439_v8 = vpop.f32.mrf.mxu3  ;;  %v2809_v61 = vand.u32 2147483647, %v3826_v39  ;;  %v2284_v50 = vadd.f32 %v2250_v28, %v5402_v41 }
 0x48c   : > { %v2796_v36 = vmul.f32 0.6931472, %v3828_v7  ;;  %3829 = vpow2.f32 %v2671_v27  ;;  %v5090_v29 = vadd.f32 %v4960_v18, %v2439_v8 }
 0x48d   : > { %3831 = vlog2.f32 %v2803_v48  ;;  %v2807_v17 = vadd.f32 1.0, %v2806_v38  ;;  %vm2810_vm4 = vcmp.lt.f32.partialorder %v2809_v61, 0.0004427343  ;;  %v2316_v54 = vmax.f32 %v2284_v50, 0.0 }
 0x48e   : > { %v2802_v44 = vsel %vm2801_vm2, %v2799_v11, %v2796_v36  ;;  %v2597_v30 = vand.u32 2147483647, %v5090_v29  ;;  %vm2533_vm9 = vcmp.ne.f32.partialorder %v5090_v29, %v5090_v29 }
 0x48f   : > { %v3010_v47 = vadd.f32 %v2802_v44, %v2498_v34  ;;  %v2251_v24 = vpop.f32.mrf.mxu2  ;;  %v2808_v40 = vmul.f32 %v3826_v39, %v2807_v17  ;;  %v2501_v34 = vmax.f32 %v5090_v29, 0.0 }
 0x490   : > { %v2629_v22 = vsub.f32 0.0, %v2597_v30  ;;  %v2252_v3 = vadd.f32 %v4890_v45, %v2251_v24 }
 0x491   : > { %v3042_v19 = vsel %vm2530_vm3, %v5057_v58, %v3010_v47 }
 0x492   : > { %v3830_v49 = vpop.eup %3829  ;;  %3074 = vst [vmem:[%s4990_s9 + $0x48] sm:$0xff] %v3042_v19  ;;  %v2673_v13 = vmul.f32 1.442695, %v2629_v22  ;;  %v2285_v62 = vadd.f32 %v2252_v3, %v5403_v35 }
 0x493   : > { %v3832_v25 = vpop.eup %3831  ;;  %v2812_v63 = vadd.f32 1.0, %v3830_v49  ;;  %v2815_v37 = vmul.f32 -0.5, %v3830_v49  ;;  %v2441_v53 = vpop.f32.mrf.mxu3  ;;  %v2818_v26 = vand.u32 2147483647, %v3830_v49 }
 0x494   : > { %v2805_v52 = vmul.f32 0.6931472, %v3832_v25  ;;  %3833 = vpow2.f32 %v2673_v13  ;;  %v2317_v45 = vmax.f32 %v2285_v62, 0.0  ;;  %v5105_v58 = vadd.f32 %v4960_v18, %v2441_v53 }
 0x495   : > { %3835 = vlog2.f32 %v2812_v63  ;;  %v2816_v43 = vadd.f32 1.0, %v2815_v37  ;;  %vm2819_vm6 = vcmp.lt.f32.partialorder %v2818_v26, 0.0004427343 }
 0x496   : > { %v2811_v0 = vsel %vm2810_vm4, %v2808_v40, %v2805_v52  ;;  %v2598_v4 = vand.u32 2147483647, %v5105_v58  ;;  %v2334_v12 = vpack.c.bf16 %v2317_v45, %v2316_v54  ;;  %v2502_v62 = vmax.f32 %v5105_v58, 0.0 }
 0x497   : > { %v3011_v57 = vadd.f32 %v2811_v0, %v2499_v60  ;;  %v2817_v51 = vmul.f32 %v3830_v49, %v2816_v43  ;;  %vm2534_vm11 = vcmp.ne.f32.partialorder %v5105_v58, %v5105_v58 }
 0x498   : > { %v2630_v14 = vsub.f32 0.0, %v2598_v4  ;;  %2483 = vmatmul.bf16.gmra.mxu3 %v2334_v12 }
 0x499   : > { %v3043_v42 = vsel %vm2531_vm5, %v5066_v32, %v3011_v57 }
 0x49a   : > { %v3834_v56 = vpop.eup %3833  ;;  %3075 = vst [vmem:[%s4990_s9 + $0x50] sm:$0xff] %v3043_v42  ;;  %v2675_v21 = vmul.f32 1.442695, %v2630_v14 }
 0x49b   : > { %v3836_v59 = vpop.eup %3835  ;;  %v2821_v15 = vadd.f32 1.0, %v3834_v56  ;;  %v2824_v1 = vmul.f32 -0.5, %v3834_v56  ;;  %v2444_v5 = vpop.f32.mrf.mxu3  ;;  %v2827_v20 = vand.u32 2147483647, %v3834_v56 }
 0x49c   : > { %v2814_v10 = vmul.f32 0.6931472, %v3836_v59  ;;  %3837 = vpow2.f32 %v2675_v21  ;;  %v5114_v23 = vadd.f32 %v4960_v18, %v2444_v5 }
 0x49d   : > { %3839 = vlog2.f32 %v2821_v15  ;;  %v2825_v33 = vadd.f32 1.0, %v2824_v1  ;;  %vm2828_vm8 = vcmp.lt.f32.partialorder %v2827_v20, 0.0004427343 }
 0x49e   : > { %v2820_v32 = vsel %vm2819_vm6, %v2817_v51, %v2814_v10  ;;  %v2599_v9 = vand.u32 2147483647, %v5114_v23  ;;  %v2503_v42 = vmax.f32 %v5114_v23, 0.0  ;;  %vm2535_vm13 = vcmp.ne.f32.partialorder %v5114_v23, %v5114_v23 }
 0x49f   : > { %v3012_v55 = vadd.f32 %v2820_v32, %v2500_v31  ;;  %v2826_v7 = vmul.f32 %v3834_v56, %v2825_v33 }
 0x4a0   : > { %v2631_v6 = vsub.f32 0.0, %v2599_v9 }
 0x4a1   : > { %v3044_v46 = vsel %vm2532_vm7, %v5081_v16, %v3012_v55 }
 0x4a2   : > { %v3838_v2 = vpop.eup %3837  ;;  %3076 = vst [vmem:[%s4990_s9 + $0x58] sm:$0xff] %v3044_v46  ;;  %v2677_v39 = vmul.f32 1.442695, %v2631_v6 }
 0x4a3   : > { %v3840_v27 = vpop.eup %3839  ;;  %v2830_v48 = vadd.f32 1.0, %v3838_v2  ;;  %v2446_v38 = vpop.f32.mrf.mxu3  ;;  %v2833_v36 = vmul.f32 -0.5, %v3838_v2  ;;  %v2836_v24 = vand.u32 2147483647, %v3838_v2 }
 0x4a4   : > { %v2823_v8 = vmul.f32 0.6931472, %v3840_v27  ;;  %3841 = vpow2.f32 %v2677_v39  ;;  %v5123_v11 = vadd.f32 %v4960_v18, %v2446_v38 }
 0x4a5   : > { %3843 = vlog2.f32 %v2830_v48  ;;  %v2834_v30 = vadd.f32 1.0, %v2833_v36  ;;  %vm2837_vm10 = vcmp.lt.f32.partialorder %v2836_v24, 0.0004427343 }
 0x4a6   : > { %v2829_v16 = vsel %vm2828_vm8, %v2826_v7, %v2823_v8  ;;  %v2600_v28 = vand.u32 2147483647, %v5123_v11  ;;  %v2504_v46 = vmax.f32 %v5123_v11, 0.0  ;;  %vm2536_vm15 = vcmp.ne.f32.partialorder %v5123_v11, %v5123_v11 }
 0x4a7   : > { %v3013_v44 = vadd.f32 %v2829_v16, %v2501_v34  ;;  %v2835_v13 = vmul.f32 %v3838_v2, %v2834_v30 }
 0x4a8   : > { %v2632_v47 = vsub.f32 0.0, %v2600_v28 }
 0x4a9   : > { %v3045_v17 = vsel %vm2533_vm9, %v5090_v29, %v3013_v44 }
 0x4aa   : > { %v3842_v22 = vpop.eup %3841  ;;  %3077 = vst [vmem:[%s4990_s9 + $0x60] sm:$0xff] %v3045_v17  ;;  %v2679_v3 = vmul.f32 1.442695, %v2632_v47 }
 0x4ab   : > { %v3844_v19 = vpop.eup %3843  ;;  %v2839_v61 = vadd.f32 1.0, %v3842_v22  ;;  %v2842_v41 = vmul.f32 -0.5, %v3842_v22  ;;  %v2449_v50 = vpop.f32.mrf.mxu3  ;;  %v2845_v52 = vand.u32 2147483647, %v3842_v22 }
 0x4ac   : > { %v2832_v49 = vmul.f32 0.6931472, %v3844_v19  ;;  %3845 = vpow2.f32 %v2679_v3  ;;  %v5132_v35 = vadd.f32 %v4960_v18, %v2449_v50 }
 0x4ad   : > { %3847 = vlog2.f32 %v2839_v61  ;;  %v2843_v63 = vadd.f32 1.0, %v2842_v41  ;;  %vm2846_vm12 = vcmp.lt.f32.partialorder %v2845_v52, 0.0004427343 }
 0x4ae   : > { %v2838_v29 = vsel %vm2837_vm10, %v2835_v13, %v2832_v49  ;;  %v2601_v25 = vand.u32 2147483647, %v5132_v35  ;;  %v2505_v17 = vmax.f32 %v5132_v35, 0.0  ;;  %vm2537_vm1 = vcmp.ne.f32.partialorder %v5132_v35, %v5132_v35 }
 0x4af   : > { %v3014_v40 = vadd.f32 %v2838_v29, %v2502_v62  ;;  %v2844_v0 = vmul.f32 %v3842_v22, %v2843_v63 }
 0x4b0   : > { %v2633_v37 = vsub.f32 0.0, %v2601_v25 }
 0x4b1   : > { %v3046_v53 = vsel %vm2534_vm11, %v5105_v58, %v3014_v40 }
 0x4b2   : > { %v3846_v45 = vpop.eup %3845  ;;  %3078 = vst [vmem:[%s4990_s9 + $0x68] sm:$0xff] %v3046_v53  ;;  %v2681_v60 = vmul.f32 1.442695, %v2633_v37 }
 0x4b3   : > { %v3848_v54 = vpop.eup %3847  ;;  %v2848_v4 = vadd.f32 1.0, %v3846_v45  ;;  %v2451_v57 = vpop.f32.mrf.mxu3  ;;  %v2851_v43 = vmul.f32 -0.5, %v3846_v45  ;;  %v2854_v1 = vand.u32 2147483647, %v3846_v45 }
 0x4b4   : > { %v2841_v12 = vmul.f32 0.6931472, %v3848_v54  ;;  %3849 = vpow2.f32 %v2681_v60  ;;  %v5141_v14 = vadd.f32 %v4960_v18, %v2451_v57 }
 0x4b5   : > { %3851 = vlog2.f32 %v2848_v4  ;;  %v2852_v21 = vadd.f32 1.0, %v2851_v43  ;;  %vm2855_vm14 = vcmp.lt.f32.partialorder %v2854_v1, 0.0004427343 }
 0x4b6   : > { %v2847_v58 = vsel %vm2846_vm12, %v2844_v0, %v2841_v12  ;;  %v2602_v26 = vand.u32 2147483647, %v5141_v14  ;;  %v2506_v37 = vmax.f32 %v5141_v14, 0.0  ;;  %vm2538_vm3 = vcmp.ne.f32.partialorder %v5141_v14, %v5141_v14 }
 0x4b7   : > { %v3015_v56 = vadd.f32 %v2847_v58, %v2503_v42  ;;  %v2853_v33 = vmul.f32 %v3846_v45, %v2852_v21 }
 0x4b8   : > { %v2634_v59 = vsub.f32 0.0, %v2602_v26 }
 0x4b9   : > { %v3047_v15 = vsel %vm2535_vm13, %v5114_v23, %v3015_v56 }
 0x4ba   : > { %v3850_v5 = vpop.eup %3849  ;;  %3079 = vst [vmem:[%s4990_s9 + $0x70] sm:$0xff] %v3047_v15  ;;  %v2683_v10 = vmul.f32 1.442695, %v2634_v59 }
 0x4bb   : > { %v3852_v51 = vpop.eup %3851  ;;  %v2857_v31 = vadd.f32 1.0, %v3850_v5  ;;  %v2860_v32 = vmul.f32 -0.5, %v3850_v5  ;;  %v2454_v9 = vpop.f32.mrf.mxu3  ;;  %v2863_v48 = vand.u32 2147483647, %v3850_v5 }
 0x4bc   : > { %v2850_v55 = vmul.f32 0.6931472, %v3852_v51  ;;  %3853 = vpow2.f32 %v2683_v10  ;;  %v5150_v6 = vadd.f32 %v4960_v18, %v2454_v9 }
 0x4bd   : > { %3855 = vlog2.f32 %v2857_v31  ;;  %v2861_v39 = vadd.f32 1.0, %v2860_v32  ;;  %vm2864_vm0 = vcmp.lt.f32.partialorder %v2863_v48, 0.0004427343 }
 0x4be   : > { %v2856_v23 = vsel %vm2855_vm14, %v2853_v33, %v2850_v55  ;;  %v2603_v20 = vand.u32 2147483647, %v5150_v6  ;;  %v2507_v59 = vmax.f32 %v5150_v6, 0.0  ;;  %vm2539_vm5 = vcmp.ne.f32.partialorder %v5150_v6, %v5150_v6 }
 0x4bf   : > { %v3016_v2 = vadd.f32 %v2856_v23, %v2504_v46  ;;  %v2862_v34 = vmul.f32 %v3850_v5, %v2861_v39  ;;  %v5186_v39 = vld [vmem:[#allocation6 + $0x8] ss:$0 sm:$0xff] }
 0x4c0   : > { %v2635_v27 = vsub.f32 0.0, %v2603_v20 }
 0x4c1   : > { %v3048_v7 = vsel %vm2536_vm15, %v5123_v11, %v3016_v2 }
 0x4c2   : > { %v3854_v38 = vpop.eup %3853  ;;  %3080 = vst [vmem:[%s4990_s9 + $0x78] sm:$0xff] %v3048_v7  ;;  %v2685_v8 = vmul.f32 1.442695, %v2635_v27 }
 0x4c3   : > { %v3856_v36 = vpop.eup %3855  ;;  %v2866_v16 = vadd.f32 1.0, %v3854_v38  ;;  %v2456_v28 = vpop.f32.mrf.mxu3  ;;  %v2869_v30 = vmul.f32 -0.5, %v3854_v38  ;;  %v2872_v41 = vand.u32 2147483647, %v3854_v38 }
 0x4c4   : > { %v2859_v44 = vmul.f32 0.6931472, %v3856_v36  ;;  %3857 = vpow2.f32 %v2685_v8  ;;  %v5159_v47 = vadd.f32 %v4960_v18, %v2456_v28 }
 0x4c5   : > { %3859 = vlog2.f32 %v2866_v16  ;;  %v2870_v3 = vadd.f32 1.0, %v2869_v30  ;;  %vm2873_vm2 = vcmp.lt.f32.partialorder %v2872_v41, 0.0004427343 }
 0x4c6   : > { %v2865_v11 = vsel %vm2864_vm0, %v2862_v34, %v2859_v44  ;;  %v2604_v24 = vand.u32 2147483647, %v5159_v47  ;;  %v2508_v20 = vmax.f32 %v5159_v47, 0.0  ;;  %vm2540_vm7 = vcmp.ne.f32.partialorder %v5159_v47, %v5159_v47 }
 0x4c7   : > { %v3017_v22 = vadd.f32 %v2865_v11, %v2505_v17  ;;  %v2871_v25 = vmul.f32 %v3854_v38, %v2870_v3 }
 0x4c8   : > { %v2636_v19 = vsub.f32 0.0, %v2604_v24 }
 0x4c9   : > { %v3049_v61 = vsel %vm2537_vm1, %v5132_v35, %v3017_v22 }
 0x4ca   : > { %v3858_v50 = vpop.eup %3857  ;;  %3081 = vst [vmem:[%s4990_s9 + $0x80] sm:$0xff] %v3049_v61  ;;  %v2687_v49 = vmul.f32 1.442695, %v2636_v19 }
 0x4cb   : > { %v3860_v13 = vpop.eup %3859  ;;  %v2875_v62 = vadd.f32 1.0, %v3858_v50  ;;  %v2878_v40 = vmul.f32 -0.5, %v3858_v50  ;;  %v2459_v63 = vpop.f32.mrf.mxu3  ;;  %v2881_v0 = vand.u32 2147483647, %v3858_v50 }
 0x4cc   : > { %v2868_v29 = vmul.f32 0.6931472, %v3860_v13  ;;  %3861 = vpow2.f32 %v2687_v49  ;;  %v5169_v53 = vadd.f32 %v4960_v18, %v2459_v63 }
 0x4cd   : > { %3863 = vlog2.f32 %v2875_v62  ;;  %v2879_v45 = vadd.f32 1.0, %v2878_v40  ;;  %vm2882_vm4 = vcmp.lt.f32.partialorder %v2881_v0, 0.0004427343 }
 0x4ce   : > { %v2874_v35 = vsel %vm2873_vm2, %v2871_v25, %v2868_v29  ;;  %v2605_v60 = vand.u32 2147483647, %v5169_v53  ;;  %v2509_v61 = vmax.f32 %v5169_v53, 0.0  ;;  %vm2541_vm9 = vcmp.ne.f32.partialorder %v5169_v53, %v5169_v53 }
 0x4cf   : > { %v3018_v52 = vadd.f32 %v2874_v35, %v2506_v37  ;;  %v2880_v58 = vmul.f32 %v3858_v50, %v2879_v45 }
 0x4d0   : > { %v2637_v57 = vsub.f32 0.0, %v2605_v60 }
 0x4d1   : > { %v3050_v54 = vsel %vm2538_vm3, %v5141_v14, %v3018_v52 }
 0x4d2   : > { %v3862_v4 = vpop.eup %3861  ;;  %3082 = vst [vmem:[%s4990_s9 + $0x88] sm:$0xff] %v3050_v54  ;;  %v2689_v56 = vmul.f32 1.442695, %v2637_v57 }
 0x4d3   : > { %v3864_v12 = vpop.eup %3863  ;;  %v2884_v43 = vadd.f32 1.0, %v3862_v4  ;;  %v2887_v26 = vmul.f32 -0.5, %v3862_v4  ;;  %v2461_v21 = vpop.f32.mrf.mxu3  ;;  %v2890_v31 = vand.u32 2147483647, %v3862_v4 }
 0x4d4   : > { %v2877_v42 = vmul.f32 0.6931472, %v3864_v12  ;;  %v5178_v15 = vadd.f32 %v4960_v18, %v2461_v21 }
 0x4d5   : > { %3865 = vlog2.f32 %v2884_v43  ;;  %v2888_v5 = vadd.f32 1.0, %v2887_v26  ;;  %vm2891_vm6 = vcmp.lt.f32.partialorder %v2890_v31, 0.0004427343 }
 0x4d6   : > { %v2883_v14 = vsel %vm2882_vm4, %v2880_v58, %v2877_v42  ;;  %3867 = vpow2.f32 %v2689_v56  ;;  %v2606_v10 = vand.u32 2147483647, %v5178_v15  ;;  %v2510_v0 = vmax.f32 %v5178_v15, 0.0 }
 0x4d7   : > { %v3019_v1 = vadd.f32 %v2883_v14, %v2507_v59  ;;  %v2889_v46 = vmul.f32 %v3862_v4, %v2888_v5  ;;  %vm2542_vm11 = vcmp.ne.f32.partialorder %v5178_v15, %v5178_v15 }
 0x4d8   : > { %v2638_v32 = vsub.f32 0.0, %v2606_v10 }
 0x4d9   : > { %v3051_v51 = vsel %vm2539_vm5, %v5150_v6, %v3019_v1 }
 0x4da   : > { %3083 = vst [vmem:[%s4990_s9 + $0x90] sm:$0xff] %v3051_v51  ;;  %v2691_v18 = vmul.f32 1.442695, %v2638_v32 }
 0x4db   : > { %v3866_v9 = vpop.eup %3865  ;;  %v2464_v23 = vpop.f32.mrf.mxu3 }
 0x4dc   : > { %v3868_v55 = vpop.eup %3867  ;;  %v2886_v33 = vmul.f32 0.6931472, %v3866_v9  ;;  %v5189_v27 = vadd.f32 %v5186_v39, %v2464_v23  ;;  %3869 = vpow2.f32 %v2691_v18 }
 0x4dd   : > { %v2893_v2 = vadd.f32 1.0, %v3868_v55  ;;  %v2896_v7 = vmul.f32 -0.5, %v3868_v55  ;;  %v2899_v16 = vand.u32 2147483647, %v3868_v55 }
 0x4de   : > { %v2892_v6 = vsel %vm2891_vm6, %v2889_v46, %v2886_v33  ;;  %v2607_v38 = vand.u32 2147483647, %v5189_v27  ;;  %v2511_v31 = vmax.f32 %v5189_v27, 0.0  ;;  %vm2543_vm13 = vcmp.ne.f32.partialorder %v5189_v27, %v5189_v27 }
 0x4df   : > { %v3020_v48 = vadd.f32 %v2892_v6, %v2508_v20  ;;  %3871 = vlog2.f32 %v2893_v2  ;;  %v2897_v36 = vadd.f32 1.0, %v2896_v7  ;;  %vm2900_vm8 = vcmp.lt.f32.partialorder %v2899_v16, 0.0004427343 }
 0x4e0   : > { %v2639_v34 = vsub.f32 0.0, %v2607_v38 }
 0x4e1   : > { %v3052_v8 = vsel %vm2540_vm7, %v5159_v47, %v3020_v48  ;;  %v2898_v3 = vmul.f32 %v3868_v55, %v2897_v36 }
 0x4e2   : > { %3084 = vst [vmem:[%s4990_s9 + $0x98] sm:$0xff] %v3052_v8  ;;  %v3870_v28 = vpop.eup %3869  ;;  %v2693_v44 = vmul.f32 1.442695, %v2639_v34 }
 0x4e3   : > { %v2466_v30 = vpop.f32.mrf.mxu3  ;;  %v2902_v11 = vadd.f32 1.0, %v3870_v28  ;;  %v2905_v19 = vmul.f32 -0.5, %v3870_v28  ;;  %v2908_v29 = vand.u32 2147483647, %v3870_v28 }
 0x4e4   : > { %v5197_v24 = vadd.f32 %v5186_v39, %v2466_v30  ;;  %3873 = vpow2.f32 %v2693_v44 }
 0x4e5   : > { %v3872_v17 = vpop.eup %3871  ;;  %3875 = vlog2.f32 %v2902_v11  ;;  %v2906_v49 = vadd.f32 1.0, %v2905_v19  ;;  %vm2909_vm10 = vcmp.lt.f32.partialorder %v2908_v29, 0.0004427343 }
 0x4e6   : > { %v2895_v22 = vmul.f32 0.6931472, %v3872_v17  ;;  %v2608_v41 = vand.u32 2147483647, %v5197_v24  ;;  %v2512_v34 = vmax.f32 %v5197_v24, 0.0  ;;  %vm2544_vm15 = vcmp.ne.f32.partialorder %v5197_v24, %v5197_v24 }
 0x4e7   : > { %v2907_v60 = vmul.f32 %v3870_v28, %v2906_v49 }
 0x4e8   : > { %v2901_v47 = vsel %vm2900_vm8, %v2898_v3, %v2895_v22  ;;  %v2640_v13 = vsub.f32 0.0, %v2608_v41 }
 0x4e9   : > { %v3021_v50 = vadd.f32 %v2901_v47, %v2509_v61 }
 0x4ea   : > { %v3874_v25 = vpop.eup %3873  ;;  %v2695_v40 = vmul.f32 1.442695, %v2640_v13 }
 0x4eb   : > { %v3053_v62 = vsel %vm2541_vm9, %v5169_v53, %v3021_v50  ;;  %v2469_v63 = vpop.f32.mrf.mxu3  ;;  %v3876_v37 = vpop.eup %3875  ;;  %v2911_v35 = vadd.f32 1.0, %v3874_v25  ;;  %v2914_v54 = vmul.f32 -0.5, %v3874_v25  ;;  %v2917_v58 = vand.u32 2147483647, %v3874_v25 }
 0x4ec   : > { %3085 = vst [vmem:[%s4990_s9 + $0xa0] sm:$0xff] %v3053_v62  ;;  %v5206_v52 = vadd.f32 %v5186_v39, %v2469_v63  ;;  %v2904_v45 = vmul.f32 0.6931472, %v3876_v37  ;;  %3877 = vpow2.f32 %v2695_v40 }
 0x4ed   : > { %3879 = vlog2.f32 %v2911_v35  ;;  %v2915_v12 = vadd.f32 1.0, %v2914_v54  ;;  %vm2918_vm12 = vcmp.lt.f32.partialorder %v2917_v58, 0.0004427343 }
 0x4ee   : > { %v2910_v53 = vsel %vm2909_vm10, %v2907_v60, %v2904_v45  ;;  %v2609_v4 = vand.u32 2147483647, %v5206_v52  ;;  %v2513_v62 = vmax.f32 %v5206_v52, 0.0  ;;  %vm2545_vm1 = vcmp.ne.f32.partialorder %v5206_v52, %v5206_v52 }
 0x4ef   : > { %v3022_v57 = vadd.f32 %v2910_v53, %v2510_v0  ;;  %v2916_v10 = vmul.f32 %v3874_v25, %v2915_v12 }
 0x4f0   : > { %v2641_v43 = vsub.f32 0.0, %v2609_v4 }
 0x4f1   : > { %v3054_v42 = vsel %vm2542_vm11, %v5178_v15, %v3022_v57 }
 0x4f2   : > { %v3878_v26 = vpop.eup %3877  ;;  %3086 = vst [vmem:[%s4990_s9 + $0xa8] sm:$0xff] %v3054_v42  ;;  %v2697_v56 = vmul.f32 1.442695, %v2641_v43 }
 0x4f3   : > { %v2471_v21 = vpop.f32.mrf.mxu3  ;;  %v3880_v59 = vpop.eup %3879  ;;  %v2920_v14 = vadd.f32 1.0, %v3878_v26  ;;  %v2923_v51 = vmul.f32 -0.5, %v3878_v26  ;;  %v2926_v18 = vand.u32 2147483647, %v3878_v26 }
 0x4f4   : > { %v5215_v1 = vadd.f32 %v5186_v39, %v2471_v21  ;;  %v2913_v5 = vmul.f32 0.6931472, %v3880_v59  ;;  %3881 = vpow2.f32 %v2697_v56 }
 0x4f5   : > { %3883 = vlog2.f32 %v2920_v14  ;;  %v2924_v55 = vadd.f32 1.0, %v2923_v51  ;;  %vm2927_vm14 = vcmp.lt.f32.partialorder %v2926_v18, 0.0004427343 }
 0x4f6   : > { %v2919_v15 = vsel %vm2918_vm12, %v2916_v10, %v2913_v5  ;;  %v2610_v32 = vand.u32 2147483647, %v5215_v1  ;;  %v2514_v42 = vmax.f32 %v5215_v1, 0.0  ;;  %vm2546_vm3 = vcmp.ne.f32.partialorder %v5215_v1, %v5215_v1 }
 0x4f7   : > { %v3023_v9 = vadd.f32 %v2919_v15, %v2511_v31  ;;  %v2925_v8 = vmul.f32 %v3878_v26, %v2924_v55 }
 0x4f8   : > { %v2642_v33 = vsub.f32 0.0, %v2610_v32 }
 0x4f9   : > { %v3055_v46 = vsel %vm2543_vm13, %v5189_v27, %v3023_v9 }
 0x4fa   : > { %v3882_v23 = vpop.eup %3881  ;;  %3087 = vst [vmem:[%s4990_s9 + $0xb0] sm:$0xff] %v3055_v46  ;;  %v2699_v20 = vmul.f32 1.442695, %v2642_v33 }
 0x4fb   : > { %v2474_v2 = vpop.f32.mrf.mxu3  ;;  %v3884_v6 = vpop.eup %3883  ;;  %v2929_v7 = vadd.f32 1.0, %v3882_v23  ;;  %v2932_v36 = vmul.f32 -0.5, %v3882_v23  ;;  %v2935_v11 = vand.u32 2147483647, %v3882_v23 }
 0x4fc   : > { %v5224_v48 = vadd.f32 %v5186_v39, %v2474_v2  ;;  %v2922_v38 = vmul.f32 0.6931472, %v3884_v6  ;;  %3885 = vpow2.f32 %v2699_v20 }
 0x4fd   : > { %3887 = vlog2.f32 %v2929_v7  ;;  %v2933_v44 = vadd.f32 1.0, %v2932_v36  ;;  %vm2936_vm0 = vcmp.lt.f32.partialorder %v2935_v11, 0.0004427343 }
 0x4fe   : > { %v2928_v27 = vsel %vm2927_vm14, %v2925_v8, %v2922_v38  ;;  %v2611_v16 = vand.u32 2147483647, %v5224_v48  ;;  %v2515_v46 = vmax.f32 %v5224_v48, 0.0  ;;  %vm2547_vm5 = vcmp.ne.f32.partialorder %v5224_v48, %v5224_v48 }
 0x4ff   : > { %v3024_v28 = vadd.f32 %v2928_v27, %v2512_v34  ;;  %v2934_v49 = vmul.f32 %v3882_v23, %v2933_v44 }
 0x500   : > { %v2643_v30 = vsub.f32 0.0, %v2611_v16 }
 0x501   : > { %v3056_v17 = vsel %vm2544_vm15, %v5197_v24, %v3024_v28 }
 0x502   : > { %v3886_v22 = vpop.eup %3885  ;;  %3088 = vst [vmem:[%s4990_s9 + $0xb8] sm:$0xff] %v3056_v17  ;;  %v2701_v3 = vmul.f32 1.442695, %v2643_v30 }
 0x503   : > { %v2476_v19 = vpop.f32.mrf.mxu3  ;;  %v3888_v61 = vpop.eup %3887  ;;  %v2938_v47 = vadd.f32 1.0, %v3886_v22  ;;  %v2941_v13 = vmul.f32 -0.5, %v3886_v22  ;;  %v2944_v35 = vand.u32 2147483647, %v3886_v22 }
 0x504   : > { %v5233_v41 = vadd.f32 %v5186_v39, %v2476_v19  ;;  %v2931_v50 = vmul.f32 0.6931472, %v3888_v61  ;;  %3889 = vpow2.f32 %v2701_v3 }
 0x505   : > { %3891 = vlog2.f32 %v2938_v47  ;;  %v2942_v40 = vadd.f32 1.0, %v2941_v13  ;;  %vm2945_vm2 = vcmp.lt.f32.partialorder %v2944_v35, 0.0004427343 }
 0x506   : > { %v2937_v24 = vsel %vm2936_vm0, %v2934_v49, %v2931_v50  ;;  %v2612_v29 = vand.u32 2147483647, %v5233_v41  ;;  %v2516_v17 = vmax.f32 %v5233_v41, 0.0  ;;  %vm2548_vm7 = vcmp.ne.f32.partialorder %v5233_v41, %v5233_v41 }
 0x507   : > { %v3025_v25 = vadd.f32 %v2937_v24, %v2513_v62  ;;  %v2943_v12 = vmul.f32 %v3886_v22, %v2942_v40 }
 0x508   : > { %v2644_v63 = vsub.f32 0.0, %v2612_v29 }
 0x509   : > { %v3057_v37 = vsel %vm2545_vm1, %v5206_v52, %v3025_v25 }
 0x50a   : > { %v3890_v45 = vpop.eup %3889  ;;  %3089 = vst [vmem:[%s4990_s9 + $0xc0] sm:$0xff] %v3057_v37  ;;  %v2703_v60 = vmul.f32 1.442695, %v2644_v63 }
 0x50b   : > { %v2479_v54 = vpop.f32.mrf.mxu3  ;;  %v3892_v0 = vpop.eup %3891  ;;  %v2947_v53 = vadd.f32 1.0, %v3890_v45  ;;  %v2950_v43 = vmul.f32 -0.5, %v3890_v45  ;;  %v2953_v14 = vand.u32 2147483647, %v3890_v45 }
 0x50c   : > { %v5242_v4 = vadd.f32 %v5186_v39, %v2479_v54  ;;  %v2940_v57 = vmul.f32 0.6931472, %v3892_v0  ;;  %3893 = vpow2.f32 %v2703_v60 }
 0x50d   : > { %3895 = vlog2.f32 %v2947_v53  ;;  %v2951_v56 = vadd.f32 1.0, %v2950_v43  ;;  %vm2954_vm4 = vcmp.lt.f32.partialorder %v2953_v14, 0.0004427343 }
 0x50e   : > { %v2946_v52 = vsel %vm2945_vm2, %v2943_v12, %v2940_v57  ;;  %v2613_v58 = vand.u32 2147483647, %v5242_v4  ;;  %v2517_v37 = vmax.f32 %v5242_v4, 0.0  ;;  %vm2549_vm9 = vcmp.ne.f32.partialorder %v5242_v4, %v5242_v4 }
 0x50f   : > { %v3026_v26 = vadd.f32 %v2946_v52, %v2514_v42  ;;  %v2952_v55 = vmul.f32 %v3890_v45, %v2951_v56 }
 0x510   : > { %v2645_v21 = vsub.f32 0.0, %v2613_v58 }
 0x511   : > { %v3058_v59 = vsel %vm2546_vm3, %v5215_v1, %v3026_v26 }
 0x512   : > { %v3894_v5 = vpop.eup %3893  ;;  %3090 = vst [vmem:[%s4990_s9 + $0xc8] sm:$0xff] %v3058_v59  ;;  %v2705_v10 = vmul.f32 1.442695, %v2645_v21 }
 0x513   : > { %v2481_v51 = vpop.f32.mrf.mxu3  ;;  %v3896_v31 = vpop.eup %3895  ;;  %v2956_v15 = vadd.f32 1.0, %v3894_v5  ;;  %v2959_v33 = vmul.f32 -0.5, %v3894_v5  ;;  %v2962_v7 = vand.u32 2147483647, %v3894_v5 }
 0x514   : > { %v5251_v32 = vadd.f32 %v5186_v39, %v2481_v51  ;;  %v2949_v9 = vmul.f32 0.6931472, %v3896_v31  ;;  %3897 = vpow2.f32 %v2705_v10 }
 0x515   : > { %3899 = vlog2.f32 %v2956_v15  ;;  %v2960_v20 = vadd.f32 1.0, %v2959_v33  ;;  %vm2963_vm6 = vcmp.lt.f32.partialorder %v2962_v7, 0.0004427343 }
 0x516   : > { %v2955_v1 = vsel %vm2954_vm4, %v2952_v55, %v2949_v9  ;;  %v2614_v18 = vand.u32 2147483647, %v5251_v32  ;;  %v2518_v26 = vmax.f32 %v5251_v32, 0.0  ;;  %vm2550_vm11 = vcmp.ne.f32.partialorder %v5251_v32, %v5251_v32 }
 0x517   : > { %v3027_v23 = vadd.f32 %v2955_v1, %v2515_v46  ;;  %v2961_v44 = vmul.f32 %v3894_v5, %v2960_v20 }
 0x518   : > { %v2646_v2 = vsub.f32 0.0, %v2614_v18 }
 0x519   : > { %v3059_v6 = vsel %vm2547_vm5, %v5224_v48, %v3027_v23 }
 0x51a   : > { %v3898_v38 = vpop.eup %3897  ;;  %3091 = vst [vmem:[%s4990_s9 + $0xd0] sm:$0xff] %v3059_v6  ;;  %v2707_v8 = vmul.f32 1.442695, %v2646_v2 }
 0x51b   : > { %v2484_v36 = vpop.f32.mrf.mxu3  ;;  %v3900_v34 = vpop.eup %3899  ;;  %v2965_v27 = vadd.f32 1.0, %v3898_v38  ;;  %v2968_v30 = vmul.f32 -0.5, %v3898_v38  ;;  %v2971_v47 = vand.u32 2147483647, %v3898_v38 }
 0x51c   : > { %v5260_v16 = vadd.f32 %v5186_v39, %v2484_v36  ;;  %v2958_v28 = vmul.f32 0.6931472, %v3900_v34  ;;  %3901 = vpow2.f32 %v2707_v8 }
 0x51d   : > { %3903 = vlog2.f32 %v2965_v27  ;;  %v2969_v3 = vadd.f32 1.0, %v2968_v30  ;;  %vm2972_vm8 = vcmp.lt.f32.partialorder %v2971_v47, 0.0004427343 }
 0x51e   : > { %v2964_v48 = vsel %vm2963_vm6, %v2961_v44, %v2958_v28  ;;  %v2615_v11 = vand.u32 2147483647, %v5260_v16  ;;  %v2519_v55 = vmax.f32 %v5260_v16, 0.0  ;;  %vm2551_vm13 = vcmp.ne.f32.partialorder %v5260_v16, %v5260_v16 }
 0x51f   : > { %v3028_v22 = vadd.f32 %v2964_v48, %v2516_v17  ;;  %v2970_v40 = vmul.f32 %v3898_v38, %v2969_v3 }
 0x520   : > { %v2647_v19 = vsub.f32 0.0, %v2615_v11 }
 0x521   : > { %v3060_v61 = vsel %vm2548_vm7, %v5233_v41, %v3028_v22 }
 0x522   : > { %v3902_v50 = vpop.eup %3901  ;;  %3092 = vst [vmem:[%s4990_s9 + $0xd8] sm:$0xff] %v3060_v61  ;;  %v2709_v49 = vmul.f32 1.442695, %v2647_v19 }
 0x523   : > { %v2486_v13 = vpop.f32.mrf.mxu3  ;;  %v3904_v62 = vpop.eup %3903  ;;  %v2974_v24 = vadd.f32 1.0, %v3902_v50  ;;  %v2977_v63 = vmul.f32 -0.5, %v3902_v50  ;;  %v2980_v0 = vand.u32 2147483647, %v3902_v50 }
 0x524   : > { %v5269_v29 = vadd.f32 %v5186_v39, %v2486_v13  ;;  %v2967_v25 = vmul.f32 0.6931472, %v3904_v62  ;;  %3905 = vpow2.f32 %v2709_v49 }
 0x525   : > { %3907 = vlog2.f32 %v2974_v24  ;;  %v2978_v60 = vadd.f32 1.0, %v2977_v63  ;;  %vm2981_vm10 = vcmp.lt.f32.partialorder %v2980_v0, 0.0004427343 }
 0x526   : > { %v2973_v41 = vsel %vm2972_vm8, %v2970_v40, %v2967_v25  ;;  %v2616_v35 = vand.u32 2147483647, %v5269_v29  ;;  %v2520_v6 = vmax.f32 %v5269_v29, 0.0  ;;  %vm2552_vm15 = vcmp.ne.f32.partialorder %v5269_v29, %v5269_v29 }
 0x527   : > { %v3029_v45 = vadd.f32 %v2973_v41, %v2517_v37  ;;  %v2979_v52 = vmul.f32 %v3902_v50, %v2978_v60 }
 0x528   : > { %v2648_v54 = vsub.f32 0.0, %v2616_v35 }
 0x529   : > { %v3061_v39 = vsel %vm2549_vm9, %v5242_v4, %v3029_v45 }
 0x52a   : > { %v3906_v53 = vpop.eup %3905  ;;  %3093 = vst [vmem:[%s4990_s9 + $0xe0] sm:$0xff] %v3061_v39  ;;  %v2711_v57 = vmul.f32 1.442695, %v2648_v54 }
 0x52b   : > { %v3908_v12 = vpop.eup %3907  ;;  %v2983_v43 = vadd.f32 1.0, %v3906_v53  ;;  %v2986_v58 = vmul.f32 -0.5, %v3906_v53  ;;  %v2989_v14 = vand.u32 2147483647, %v3906_v53 }
 0x52c   : > { %v2976_v42 = vmul.f32 0.6931472, %v3908_v12  ;;  %3909 = vpow2.f32 %v2711_v57 }
 0x52d   : > { %3911 = vlog2.f32 %v2983_v43  ;;  %v2987_v4 = vadd.f32 1.0, %v2986_v58  ;;  %vm2990_vm12 = vcmp.lt.f32.partialorder %v2989_v14, 0.0004427343 }
 0x52e   : > { %v2982_v56 = vsel %vm2981_vm10, %v2979_v52, %v2976_v42 }
 0x52f   : > { %v3030_v21 = vadd.f32 %v2982_v56, %v2518_v26  ;;  %v2988_v15 = vmul.f32 %v3906_v53, %v2987_v4 }
 0x531   : > { %v3062_v59 = vsel %vm2550_vm11, %v5251_v32, %v3030_v21 }
 0x532   : > { %v3910_v5 = vpop.eup %3909  ;;  %3094 = vst [vmem:[%s4990_s9 + $0xe8] sm:$0xff] %v3062_v59 }
 0x533   : > { %v3912_v10 = vpop.eup %3911  ;;  %v2992_v51 = vadd.f32 1.0, %v3910_v5  ;;  %v2995_v9 = vmul.f32 -0.5, %v3910_v5  ;;  %v2998_v18 = vand.u32 2147483647, %v3910_v5 }
 0x534   : > { %v2985_v31 = vmul.f32 0.6931472, %v3912_v10 }
 0x535   : > { %3913 = vlog2.f32 %v2992_v51  ;;  %v2996_v32 = vadd.f32 1.0, %v2995_v9  ;;  %vm2999_vm14 = vcmp.lt.f32.partialorder %v2998_v18, 0.0004427343 }
 0x536   : > { %v2991_v33 = vsel %vm2990_vm12, %v2988_v15, %v2985_v31 }
 0x537   : > { %v3031_v46 = vadd.f32 %v2991_v33, %v2519_v55  ;;  %v2997_v2 = vmul.f32 %v3910_v5, %v2996_v32 }
 0x539   : > { %v3063_v1 = vsel %vm2551_vm13, %v5260_v16, %v3031_v46 }
 0x53a   : > { %3095 = vst [vmem:[%s4990_s9 + $0xf0] sm:$0xff] %v3063_v1 }
 0x53b   : > { %v3914_v23 = vpop.eup %3913 }
 0x53c   : > { %v2994_v20 = vmul.f32 0.6931472, %v3914_v23 }
 0x53e   : > { %v3000_v7 = vsel %vm2999_vm14, %v2997_v2, %v2994_v20 }
 0x53f   : > { %v3032_v38 = vadd.f32 %v3000_v7, %v2520_v6 }
 0x541   : > { %v3064_v8 = vsel %vm2552_vm15, %v5269_v29, %v3032_v38 }
 0x542   : > { %3096 = vst [vmem:[%s4990_s9 + $0xf8] sm:$0xff] %v3064_v8 }
 0x543   : > { %4003 = shalt.err (!%p4000_p8)
}
 0x544   : > { %s4055_s6 = smov 128   ;;  %s4056_s7 = smov 8  }
 0x545   : > { %3716 = dma.vmem_to_hbm [thread:$0]  (%p4120_p5), %s3111_s14, 4096, %s3113_s19, %s3098_s20, %s4055_s6, %s4055_s6, %s4056_s7  }
 0x546 PF: > { %p3733_p9 = scmp.ge.s32.totalorder %s4046_s18, 2  ;;  %s3127_s8 = sand.u32 1, %s4034_s15  }
 0x547   : > { %s3128_s9 = scalar_lea.sflag [#allocation5], %s3127_s8 }
 0x548   : > { %p3726_p10 = pnand %p3733_p9, %p4124_p6 }
 0x54a   : > { %p3727_p11 = pneg %p3726_p10 }
 0x54c   : > { %4029 = dma.done.wait (%p3727_p11), %s3128_s9, 4096  }
 0x54d   : > { %4031 = vsyncadd (%p3727_p11), %s3128_s9, 4294963200  ;;  %p16_p12 = scmp.ge.s32.totalorder %s4107_s21, 4   ;;  %s5404_s15 = smov %s4038_s16 }
 0x54e   : > { %s5405_s16 = smov %s4042_s17  ;;  %s5406_s17 = smov %s4118_s24 }
 0x54f   : > { %s5407_s18 = smov %s4107_s21  ;;  %18 = sbr.rel (!%p16_p12) target bundleno = 5 (0x5), region = 83 }
 0x554   :  { %3134 = vsyncpa [#allocation4], 1 }
 0x555   :  { %3136 = vsyncpa [#allocation4 + $0x1], 1 }
 0x556   :  { %3137 = vsyncpa [#allocation7], 1 }
 0x557   :  { %3138 = vsyncpa [#allocation5], 1 }
 0x558   :  { %3140 = vsyncpa [#allocation5 + $0x1], 1 }

</bundles_post_ra>
